<compile_context>
chip_gen: v5e
topology: v5e:2x2
jax: 0.10.0
libtpu: 0.0.40
codegen_flags: <defaults>
</compile_context>

<pallas_src>
import jax
import jax.numpy as jnp
from jax.experimental import pallas as pl
from jax.experimental.pallas import tpu as pltpu


_ROW_STRIP = 64  # rows of the fused table processed per accumulation step


def _make_kernel(n_rows, strip, off_item, off_data, off_pos):
    n_strips = n_rows // strip

    def kernel(u_ref, i_ref, d_ref, p_ref, table_ref, out_ref):
        blk = out_ref.shape[1]

        # Load each id row once; fold the static section offsets in-kernel
        # (cheap (1, blk) VPU adds, hidden under the compares).
        u = u_ref[...]                        # user section starts at row 0
        it = i_ref[...] + off_item
        dv = d_ref[...] + off_data
        ps = p_ref[...] + off_pos

        def strip_body(s, acc):
            base = pl.multiple_of(s * strip, strip)
            rows = jax.lax.broadcasted_iota(jnp.int32, (strip, blk), 0) + base
            match = (rows == u) | (rows == it) | (rows == dv) | (rows == ps)
            vals = table_ref[pl.ds(base, strip), :]           # (strip, 1)
            return acc + jnp.sum(jnp.where(match, vals, jnp.float32(0.0)),
                                 axis=0, keepdims=True)

        acc = jnp.zeros((1, blk), jnp.float32)
        acc = jax.lax.fori_loop(0, n_strips, strip_body, acc, unroll=True)
        out_ref[...] = acc                                    # (1, blk) lane-dense

    return kernel


def four_linear_forward(users, items, values, positions,
                        user_table, item_table, data_table, position_table,
                        *, block_b=1024):
    """users/items/values/positions: int [B]; tables: float32 [n_k, 1] -> f32 [B]."""
    B = users.shape[0]
    n_user = user_table.shape[0]
    n_item = item_table.shape[0]
    n_data = data_table.shape[0]
    n_pos = position_table.shape[0]
    n_total = n_user + n_item + n_data + n_pos

    # Fused table, sublane-major, zero-padded to a multiple of the row strip.
    strip = _ROW_STRIP
    n_rows = pl.cdiv(n_total, strip) * strip
    fused = jnp.concatenate(
        [user_table.reshape(-1), item_table.reshape(-1),
         data_table.reshape(-1), position_table.reshape(-1)]).astype(jnp.float32)
    fused_table = jnp.pad(fused, (0, n_rows - n_total)).reshape(n_rows, 1)

    # Batch tile: big by default (1024 lanes), but capped so the grid keeps
    # >= 2 steps when B allows it (v7x megacore splits the "parallel" axis).
    blk = max(128, (block_b // 128) * 128)
    if B > 128:
        blk = min(blk, max(128, pl.cdiv(pl.cdiv(B, 2), 128) * 128))
    b_pad = pl.cdiv(B, blk) * blk

    def prep(ids):
        ids = ids.astype(jnp.int32).reshape(1, B)
        if b_pad != B:  # only copies when B is not already a tile multiple
            ids = jnp.pad(ids, ((0, 0), (0, b_pad - B)))
        return ids

    u, it, dv, ps = prep(users), prep(items), prep(values), prep(positions)

    # Explicit VMEM budget: double-buffered id/out tiles + resident table
    # (lane-padded to 128 in VMEM) + per-strip temporaries, with 2x margin.
    tile_bytes = (4 * 2 * 4 * blk            # four id tiles, int32, 2 buffers
                  + 2 * 4 * blk              # output tile, f32, 2 buffers
                  + 2 * n_rows * 128 * 4     # fused table (lane-padded), 2 buffers
                  + 4 * strip * blk * 4)     # strip mask / select temporaries
    vmem_limit = int(min(48 << 20, max(32 << 20, 2 * tile_bytes)))

    kernel = _make_kernel(n_rows, strip,
                          n_user, n_user + n_item, n_user + n_item + n_data)

    out = pl.pallas_call(
        kernel,
        out_shape=jax.ShapeDtypeStruct((1, b_pad), jnp.float32),
        grid=(b_pad // blk,),
        in_specs=[
            pl.BlockSpec((1, blk), lambda i: (0, i)),        # users
            pl.BlockSpec((1, blk), lambda i: (0, i)),        # items
            pl.BlockSpec((1, blk), lambda i: (0, i)),        # values
            pl.BlockSpec((1, blk), lambda i: (0, i)),        # positions
            pl.BlockSpec((n_rows, 1), lambda i: (0, 0)),     # fused table, resident
        ],
        out_specs=pl.BlockSpec((1, blk), lambda i: (0, i)),  # lane-dense output
        compiler_params=pltpu.CompilerParams(
            dimension_semantics=("parallel",),               # megacore on v7x
            vmem_limit_bytes=vmem_limit),
    )(u, it, dv, ps, fused_table)

    return out[0, :B]  # squeeze -> (B,)


def init_params(key, n_user, n_item, n, n_position):
    """Deterministic synthetic init mirroring FourLinear.init_embedding(0)."""
    k_u, k_i, k_d, k_p = jax.random.split(key, 4)
    # kaiming_normal_(mode='fan_out', a=0) on an (n, 1) weight -> std = sqrt(2/n)
    user_table = jax.random.normal(k_u, (n_user, 1), jnp.float32) * jnp.sqrt(2.0 / n_user)
    item_table = jax.random.normal(k_i, (n_item, 1), jnp.float32) * jnp.sqrt(2.0 / n_item)
    data_table = (jax.random.normal(k_d, (n, 1), jnp.float32)
                  * jnp.sqrt(2.0 / n) * 0.001)
    # position_bias keeps default N(0,1) embedding init, then * 0.001
    position_table = jax.random.normal(k_p, (n_position, 1), jnp.float32) * 0.001
    return user_table, item_table, data_table, position_table


if __name__ == "__main__":
    key = jax.random.PRNGKey(0)
    n_user, n_item, n, n_position = 32, 48, 16, 8

    k_params, k_ids = jax.random.split(key)
    user_table, item_table, data_table, position_table = init_params(
        k_params, n_user, n_item, n, n_position)

    def run_check(B, k):
        k_u, k_i, k_v, k_p = jax.random.split(k, 4)
        users = jax.random.randint(k_u, (B,), 0, n_user, dtype=jnp.int32)
        items = jax.random.randint(k_i, (B,), 0, n_item, dtype=jnp.int32)
        values = jax.random.randint(k_v, (B,), 0, n, dtype=jnp.int32)
        positions = jax.random.randint(k_p, (B,), 0, n_position, dtype=jnp.int32)

        preds = four_linear_forward(users, items, values, positions,
                                    user_table, item_table, data_table,
                                    position_table)
        jax.block_until_ready(preds)

        # Reference in plain JAX (embedding lookup + sum).
        ref = (user_table[users, 0] + item_table[items, 0]
               + data_table[values, 0] + position_table[positions, 0])
        assert preds.shape == (B,)
        assert jnp.allclose(preds, ref, atol=1e-6), (preds, ref)

    k_small, k_big = jax.random.split(k_ids)
    run_check(8, k_small)    # single-tile path (B padded to one 128-lane block)
    run_check(300, k_big)    # multi-step "parallel" grid + batch tail padding

    print("KERNEL_OK")
</pallas_src>

<mosaic_0001>
module attributes {stable_mosaic.version = 11 : i64} {
  func.func @kernel(%arg0: i32, %arg1: memref<1x1024xi32, #tpu.memory_space<vmem>>, %arg2: memref<1x1024xi32, #tpu.memory_space<vmem>>, %arg3: memref<1x1024xi32, #tpu.memory_space<vmem>>, %arg4: memref<1x1024xi32, #tpu.memory_space<vmem>>, %arg5: memref<128x1xf32, #tpu.memory_space<vmem>>, %arg6: memref<1x1024xf32, #tpu.memory_space<vmem>>) attributes {dimension_semantics = [#tpu.dimension_semantics<parallel>], iteration_bounds = array<i64: 1>, scalar_prefetch = 0 : i64, scratch_operands = 0 : i64, tpu.core_type = #tpu.core_type<tc>, window_params = [{transform_indices = @transform_0, window_bounds = array<i64: 1, 1024>}, {transform_indices = @transform_1, window_bounds = array<i64: 1, 1024>}, {transform_indices = @transform_2, window_bounds = array<i64: 1, 1024>}, {transform_indices = @transform_3, window_bounds = array<i64: 1, 1024>}, {pipeline_mode = #tpu.pipeline_mode<synchronous>, transform_indices = @transform_4, window_bounds = array<i64: 128, 1>}, {transform_indices = @transform_5, window_bounds = array<i64: 1, 1024>}]} {
    %c0 = arith.constant 0 : index
    %c0_0 = arith.constant 0 : index
    %0 = vector.load %arg1[%c0, %c0_0] : memref<1x1024xi32, #tpu.memory_space<vmem>>, vector<1x1024xi32>
    %c0_1 = arith.constant 0 : index
    %c0_2 = arith.constant 0 : index
    %1 = vector.load %arg2[%c0_1, %c0_2] : memref<1x1024xi32, #tpu.memory_space<vmem>>, vector<1x1024xi32>
    %c32_i32 = arith.constant 32 : i32
    %2 = vector.broadcast %c32_i32 : i32 to vector<1x1024xi32>
    %3 = arith.addi %1, %2 : vector<1x1024xi32>
    %c0_3 = arith.constant 0 : index
    %c0_4 = arith.constant 0 : index
    %4 = vector.load %arg3[%c0_3, %c0_4] : memref<1x1024xi32, #tpu.memory_space<vmem>>, vector<1x1024xi32>
    %c80_i32 = arith.constant 80 : i32
    %5 = vector.broadcast %c80_i32 : i32 to vector<1x1024xi32>
    %6 = arith.addi %4, %5 : vector<1x1024xi32>
    %c0_5 = arith.constant 0 : index
    %c0_6 = arith.constant 0 : index
    %7 = vector.load %arg4[%c0_5, %c0_6] : memref<1x1024xi32, #tpu.memory_space<vmem>>, vector<1x1024xi32>
    %c96_i32 = arith.constant 96 : i32
    %8 = vector.broadcast %c96_i32 : i32 to vector<1x1024xi32>
    %9 = arith.addi %7, %8 : vector<1x1024xi32>
    %cst = arith.constant 0.000000e+00 : f32
    %10 = vector.broadcast %cst : f32 to vector<1x1024xf32>
    %c0_i32 = arith.constant 0 : i32
    %c64_i32 = arith.constant 64 : i32
    %11 = arith.muli %c0_i32, %c64_i32 : i32
    %12 = tpu.assume_multiple %11, 64 : i32
    %13 = tpu.iota {dimensions = array<i32: 0>} : vector<64x1024xi32>
    %14 = vector.broadcast %12 : i32 to vector<64x1024xi32>
    %15 = arith.addi %13, %14 : vector<64x1024xi32>
    %16 = vector.broadcast %0 : vector<1x1024xi32> to vector<64x1024xi32>
    %17 = arith.cmpi eq, %15, %16 : vector<64x1024xi32>
    %18 = vector.broadcast %3 : vector<1x1024xi32> to vector<64x1024xi32>
    %19 = arith.cmpi eq, %15, %18 : vector<64x1024xi32>
    %20 = arith.ori %17, %19 : vector<64x1024xi1>
    %21 = vector.broadcast %6 : vector<1x1024xi32> to vector<64x1024xi32>
    %22 = arith.cmpi eq, %15, %21 : vector<64x1024xi32>
    %23 = arith.ori %20, %22 : vector<64x1024xi1>
    %24 = vector.broadcast %9 : vector<1x1024xi32> to vector<64x1024xi32>
    %25 = arith.cmpi eq, %15, %24 : vector<64x1024xi32>
    %26 = arith.ori %23, %25 : vector<64x1024xi1>
    %27 = arith.index_cast %12 : i32 to index
    %c0_7 = arith.constant 0 : index
    %28 = vector.load %arg5[%27, %c0_7] : memref<128x1xf32, #tpu.memory_space<vmem>>, vector<64x1xf32>
    %cst_8 = arith.constant 0.000000e+00 : f32
    %29 = vector.shape_cast %28 : vector<64x1xf32> to vector<64x1xf32>
    %30 = vector.broadcast %29 : vector<64x1xf32> to vector<64x1024xf32>
    %31 = vector.broadcast %cst_8 : f32 to vector<64x1024xf32>
    %32 = arith.select %26, %30, %31 : vector<64x1024xi1>, vector<64x1024xf32>
    %cst_9 = arith.constant dense<0.000000e+00> : vector<1024xf32>
    %33 = vector.multi_reduction <add>, %32, %cst_9 [0] : vector<64x1024xf32> to vector<1024xf32>
    %34 = vector.shape_cast %33 : vector<1024xf32> to vector<1x1024xf32>
    %35 = arith.addf %10, %34 : vector<1x1024xf32>
    %c1_i32 = arith.constant 1 : i32
    %c64_i32_10 = arith.constant 64 : i32
    %36 = arith.muli %c1_i32, %c64_i32_10 : i32
    %37 = tpu.assume_multiple %36, 64 : i32
    %38 = tpu.iota {dimensions = array<i32: 0>} : vector<64x1024xi32>
    %39 = vector.broadcast %37 : i32 to vector<64x1024xi32>
    %40 = arith.addi %38, %39 : vector<64x1024xi32>
    %41 = vector.broadcast %0 : vector<1x1024xi32> to vector<64x1024xi32>
    %42 = arith.cmpi eq, %40, %41 : vector<64x1024xi32>
    %43 = vector.broadcast %3 : vector<1x1024xi32> to vector<64x1024xi32>
    %44 = arith.cmpi eq, %40, %43 : vector<64x1024xi32>
    %45 = arith.ori %42, %44 : vector<64x1024xi1>
    %46 = vector.broadcast %6 : vector<1x1024xi32> to vector<64x1024xi32>
    %47 = arith.cmpi eq, %40, %46 : vector<64x1024xi32>
    %48 = arith.ori %45, %47 : vector<64x1024xi1>
    %49 = vector.broadcast %9 : vector<1x1024xi32> to vector<64x1024xi32>
    %50 = arith.cmpi eq, %40, %49 : vector<64x1024xi32>
    %51 = arith.ori %48, %50 : vector<64x1024xi1>
    %52 = arith.index_cast %37 : i32 to index
    %c0_11 = arith.constant 0 : index
    %53 = vector.load %arg5[%52, %c0_11] : memref<128x1xf32, #tpu.memory_space<vmem>>, vector<64x1xf32>
    %cst_12 = arith.constant 0.000000e+00 : f32
    %54 = vector.shape_cast %53 : vector<64x1xf32> to vector<64x1xf32>
    %55 = vector.broadcast %54 : vector<64x1xf32> to vector<64x1024xf32>
    %56 = vector.broadcast %cst_12 : f32 to vector<64x1024xf32>
    %57 = arith.select %51, %55, %56 : vector<64x1024xi1>, vector<64x1024xf32>
    %cst_13 = arith.constant dense<0.000000e+00> : vector<1024xf32>
    %58 = vector.multi_reduction <add>, %57, %cst_13 [0] : vector<64x1024xf32> to vector<1024xf32>
    %59 = vector.shape_cast %58 : vector<1024xf32> to vector<1x1024xf32>
    %60 = arith.addf %35, %59 : vector<1x1024xf32>
    %c2_i32 = arith.constant 2 : i32
    %c0_14 = arith.constant 0 : index
    %c0_15 = arith.constant 0 : index
    %61 = vector.load %arg6[%c0_14, %c0_15] : memref<1x1024xf32, #tpu.memory_space<vmem>>, vector<1x1024xf32>
    tpu.vector_store %arg6[%c0_14, %c0_15], %60 {strides = array<i32>} : memref<1x1024xf32, #tpu.memory_space<vmem>>, vector<1x1024xf32>,
    return
  }
  func.func @transform_0(%arg0: i32) -> (i32, i32) {
    %c0_i32 = arith.constant 0 : i32
    %c0_i32_0 = arith.constant 0 : i32
    return %c0_i32, %arg0 : i32, i32
  }
  func.func @transform_1(%arg0: i32) -> (i32, i32) {
    %c0_i32 = arith.constant 0 : i32
    %c0_i32_0 = arith.constant 0 : i32
    return %c0_i32, %arg0 : i32, i32
  }
  func.func @transform_2(%arg0: i32) -> (i32, i32) {
    %c0_i32 = arith.constant 0 : i32
    %c0_i32_0 = arith.constant 0 : i32
    return %c0_i32, %arg0 : i32, i32
  }
  func.func @transform_3(%arg0: i32) -> (i32, i32) {
    %c0_i32 = arith.constant 0 : i32
    %c0_i32_0 = arith.constant 0 : i32
    return %c0_i32, %arg0 : i32, i32
  }
  func.func @transform_4(%arg0: i32) -> (i32, i32) {
    %c0_i32 = arith.constant 0 : i32
    %c0_i32_0 = arith.constant 0 : i32
    %c0_i32_1 = arith.constant 0 : i32
    return %c0_i32, %c0_i32_0 : i32, i32
  }
  func.func @transform_5(%arg0: i32) -> (i32, i32) {
    %c0_i32 = arith.constant 0 : i32
    %c0_i32_0 = arith.constant 0 : i32
    return %c0_i32, %arg0 : i32, i32
  }
}

</mosaic_0001>

<bundles_post_ra>
// kernel: tpu_custom_call.1
= control target key start
LH: loop header
LB: loop body
LE: loop exit
PB: predicated region body
PF: predicated region fallthrough
CT: control target
= control target key end

     0   :  { %v1518_v3 = vmov 0   ;;  %s6881_s0 = inlined_call_operand.vmem [shape: s32[1,1024], index: 0, kind: input, shape index: {}]   ;;  %s6882_s1 = inlined_call_operand.vmem [shape: s32[1,1024], index: 1, kind: input, shape index: {}]   ;;  %s6883_s2 = inlined_call_operand.vmem [shape: s32[1,1024], index: 2, kind: input, shape index: {}]   ;;  %s6884_s3 = inlined_call_operand.vmem [shape: s32[1,1024], index: 3, kind: input, shape index: {}]   ;;  %s6885_s4 = inlined_call_operand.vmem [shape: f32[128,1], index: 4, kind: input, shape index: {}]   ;;  %s6886_s5 = inlined_call_operand.hbm [shape: f32[1,1024], index: 5, kind: output, shape index: {}]  }
   0x1   :  { %v1479_v0 = vld [vmem:[%s6885_s4 + $0x40] sm:$0xff]  ;;  %v528_v1 = vld [vmem:[%s6885_s4 + $0x10] sm:$0xff]  ;;  %1491 = vset.pattern.permute.xlu2 %v1518_v3  ;;  %1490 = vset.pattern.permute.xlu1 %v1518_v3 }
   0x2   :  { %v526_v2 = vld [vmem:[%s6885_s4] sm:$0xff]  ;;  %1489 = vset.pattern.permute.xlu0 %v1518_v3  ;;  %1218 = vperm.xlu2 %1491, %v1479_v0  }
   0x3   :  { %546 = vperm.xlu1 %1490, %v528_v1   ;;  %536 = vperm.xlu0 %1489, %v526_v2  }
   0x4   :  { %10 = vsyncpa [#allocation3], 0  ;;  %v1480_v4 = vld [vmem:[%s6885_s4 + $0x48] sm:$0xff]  ;;  %v529_v5 = vld [vmem:[%s6885_s4 + $0x18] sm:$0xff]  ;;  %v28_v17 = vlaneseq  ;;  %v7118_v57 = vmov 0  ;;  %v7121_v60 = vmov 0 }
   0x5   :  { %v527_v6 = vld [vmem:[%s6885_s4 + $0x8] sm:$0xff]  ;;  %v530_v7 = vld [vmem:[%s6885_s4 + $0x20] sm:$0xff]  ;;  %v1482_v8 = vld [vmem:[%s6885_s4 + $0x58] sm:$0xff]  ;;  %v7123_v62 = vmov 0  ;;  %v7125_v63 = vmov 0  ;;  %v7127_v0 = vmov 0 }
   0x6   :  { %v1481_v9 = vld [vmem:[%s6885_s4 + $0x50] sm:$0xff]  ;;  %v1484_v10 = vld [vmem:[%s6885_s4 + $0x68] sm:$0xff]  ;;  %v1483_v12 = vld [vmem:[%s6885_s4 + $0x60] sm:$0xff]  ;;  %v1601_v20 = vshrl.u32 %v28_v17, 7  ;;  %v7129_v1 = vmov 0  ;;  %v7131_v2 = vmov 0 }
   0x7   :  { %v531_v11 = vld [vmem:[%s6885_s4 + $0x28] sm:$0xff]  ;;  %v533_v13 = vld [vmem:[%s6885_s4 + $0x38] sm:$0xff]  ;;  %v1485_v14 = vld [vmem:[%s6885_s4 + $0x70] sm:$0xff]  ;;  %v7155_v17 = vmov 0  ;;  %v7172_v38 = vmov 0  ;;  %v7175_v40 = vmov 0 }
   0x8   :  { %v532_v15 = vld [vmem:[%s6885_s4 + $0x30] sm:$0xff]  ;;  %v1486_v16 = vld [vmem:[%s6885_s4 + $0x78] sm:$0xff]  ;;  %v22_v18 = vld [vmem:[%s6882_s1] sm:$0xff]  ;;  %7089 = vst [vmem:[#allocation5_spill] sm:$0xff] %v1601_v20  ;;  %v1610_v23 = vadd.s32 64, %v1601_v20  ;;  %v1669_v41 = vadd.s32 8, %v1601_v20 }
   0x9   :  { %v23_v19 = vadd.s32 32, %v22_v18  ;;  %v21_v21 = vld [vmem:[%s6881_s0] sm:$0xff]  ;;  %v7179_v44 = vmov 0  ;;  %v2017_v51 = vadd.s32 32, %v1601_v20  ;;  %v7251_v55 = vmov 0  ;;  %s1470_s7 = sshll.u32 %s6886_s5, 4  ;;  %s1471_s7 = int_to_ptr.hbm [resolvable:$true] %s1470_s7 }
   0xa   :  { %1223 = vperm.xlu2 %1491, %v1480_v4   ;;  %v24_v22 = vld [vmem:[%s6883_s2] sm:$0xff]  ;;  %v1612_v24 = vperm.slane %v21_v21, 0  ;;  %v1616_v27 = vperm.slane %v21_v21, 1  ;;  %v1618_v28 = vperm.slane %v21_v21, 2  ;;  %v1622_v30 = vperm.slane %v21_v21, 3  ;;  %7105 = vst [vmem:[#allocation17_spill] sm:$0xff] %v1669_v41 }
   0xb   :  { %551 = vperm.xlu1 %1490, %v529_v5   ;;  %541 = vperm.xlu0 %1489, %v527_v6   ;;  %v1614_v25 = vperm.slane %v23_v19, 0  ;;  %v25_v26 = vadd.s32 80, %v24_v22  ;;  %v1620_v29 = vperm.slane %v23_v19, 1  ;;  %v1624_v31 = vperm.slane %v23_v19, 2  ;;  %v26_v53 = vld [vmem:[%s6884_s3] sm:$0xff]  ;;  %7189 = vst [vmem:[#allocation24_spill] sm:$0xff] %v2017_v51 }
   0xc   :  { %7090 = vst [vmem:[#allocation6_spill] sm:$0xff] %v1612_v24  ;;  %vm759_vm0 = vcmp.eq.s32.totalorder %v1610_v23, %v1612_v24  ;;  %v1630_v32 = vperm.slane %v21_v21, 4  ;;  %v1632_v33 = vperm.slane %v23_v19, 3  ;;  %vm760_vm2 = vcmp.eq.s32.totalorder %v1610_v23, %v1616_v27  ;;  %s1519_s2 = smov [#allocation2]  }
   0xd   :  { %7091 = vst [vmem:[#allocation7_spill] sm:$0xff] %v1614_v25  ;;  %vm823_vm1 = vcmp.eq.s32.totalorder %v1610_v23, %v1614_v25  ;;  %vm824_vm3 = vcmp.eq.s32.totalorder %v1610_v23, %v1620_v29  ;;  %v1638_v34 = vperm.slane %v21_v21, 5  ;;  %v1640_v35 = vperm.slane %v23_v19, 4  ;;  %s1468_s3 = sshll.u32 %s1519_s2, 4  ;;  %s1469_s3 = int_to_ptr.vmem [resolvable:$true] %s1468_s3 }
   0xe   :  { %7092 = vst [vmem:[#allocation8_spill] sm:$0xff] %v1616_v27  ;;  %vm761_vm4 = vcmp.eq.s32.totalorder %v1610_v23, %v1618_v28  ;;  %vm825_vm5 = vcmp.eq.s32.totalorder %v1610_v23, %v1624_v31  ;;  %v1646_v36 = vperm.slane %v21_v21, 6  ;;  %v1648_v37 = vperm.slane %v23_v19, 5  ;;  %vm1654_vm8 = vmor %vm759_vm0, %vm823_vm1 }
   0xf   :  { %7093 = vst [vmem:[#allocation9_spill] sm:$0xff] %v1618_v28  ;;  %vm762_vm6 = vcmp.eq.s32.totalorder %v1610_v23, %v1622_v30  ;;  %vm826_vm7 = vcmp.eq.s32.totalorder %v1610_v23, %v1632_v33  ;;  %v1658_v39 = vperm.slane %v23_v19, 6  ;;  %vm763_vm9 = vcmp.eq.s32.totalorder %v1610_v23, %v1630_v32  ;;  %vm1664_vm11 = vmor %vm760_vm2, %vm824_vm3 }
  0x10   :  { %7094 = vst [vmem:[#allocation10_spill] sm:$0xff] %v1620_v29  ;;  %vm827_vm10 = vcmp.eq.s32.totalorder %v1610_v23, %v1640_v35  ;;  %v1671_v42 = vperm.slane %v21_v21, 7  ;;  %v1673_v43 = vperm.slane %v23_v19, 7  ;;  %vm764_vm12 = vcmp.eq.s32.totalorder %v1610_v23, %v1638_v34  ;;  %vm1685_vm14 = vmor %vm761_vm4, %vm825_vm5 }
  0x11   :  { %7095 = vst [vmem:[#allocation11_spill] sm:$0xff] %v1622_v30  ;;  %vm828_vm13 = vcmp.eq.s32.totalorder %v1610_v23, %v1648_v37  ;;  %v1689_v45 = vperm.slane %v25_v26, 0  ;;  %vm765_vm15 = vcmp.eq.s32.totalorder %v1610_v23, %v1646_v36  ;;  %vm829_vm0 = vcmp.eq.s32.totalorder %v1610_v23, %v1658_v39  ;;  %vm1701_vm1 = vmor %vm762_vm6, %vm826_vm7 }
  0x12   :  { %556 = vperm.xlu2 %1491, %v530_v7   ;;  %7096 = vst [vmem:[#allocation12_spill] sm:$0xff] %v1624_v31  ;;  %v1705_v47 = vperm.slane %v25_v26, 1  ;;  %v1707_v48 = vperm.slane %v25_v26, 2  ;;  %vm766_vm2 = vcmp.eq.s32.totalorder %v1610_v23, %v1671_v42  ;;  %vm830_vm3 = vcmp.eq.s32.totalorder %v1610_v23, %v1673_v43  ;;  %vm1719_vm4 = vmor %vm763_vm9, %vm827_vm10 }
  0x13   :  { %1233 = vperm.xlu1 %1490, %v1482_v8   ;;  %1228 = vperm.xlu0 %1489, %v1481_v9   ;;  %7097 = vst [vmem:[#allocation13_spill] sm:$0xff] %v1632_v33  ;;  %v1723_v50 = vperm.slane %v25_v26, 3  ;;  %vm1725_vm5 = vmor %vm764_vm12, %vm828_vm13  ;;  %vm951_vm6 = vcmp.eq.s32.totalorder %v1610_v23, %v1689_v45  ;;  %v1732_v52 = vadd.s32 64, %v1669_v41  ;;  %v1737_v54 = vperm.slane %v25_v26, 4 }
  0x14   :  { %7098 = vst [vmem:[#allocation14_spill] sm:$0xff] %v1640_v35  ;;  %vm1739_vm7 = vmor %vm765_vm15, %vm829_vm0  ;;  %vm952_vm9 = vcmp.eq.s32.totalorder %v1610_v23, %v1705_v47  ;;  %vm953_vm10 = vcmp.eq.s32.totalorder %v1610_v23, %v1707_v48  ;;  %v1747_v56 = vperm.slane %v25_v26, 5  ;;  %v1755_v58 = vperm.slane %v25_v26, 6 }
  0x15   :  { %7099 = vst [vmem:[#allocation15_spill] sm:$0xff] %v1648_v37  ;;  %vm1749_vm12 = vmor %vm766_vm2, %vm830_vm3  ;;  %vm954_vm13 = vcmp.eq.s32.totalorder %v1610_v23, %v1723_v50  ;;  %v1757_v59 = vperm.slane %v25_v26, 7  ;;  %vm955_vm15 = vcmp.eq.s32.totalorder %v1610_v23, %v1737_v54  ;;  %v27_v61 = vadd.s32 96, %v26_v53 }
  0x16   :  { %7102 = vst [vmem:[#allocation16_spill] sm:$0xff] %v1658_v39  ;;  %v7119_v57 = vsel %vm1749_vm12, 4294967295, %v7118_v57  ;;  %vm1763_vm0 = vmor %vm1654_vm8, %vm951_vm6  ;;  %vm956_vm2 = vcmp.eq.s32.totalorder %v1610_v23, %v1747_v56  ;;  %vm767_vm8 = vcmp.eq.s32.totalorder %v1732_v52, %v1612_v24  ;;  %vm831_vm6 = vcmp.eq.s32.totalorder %v1732_v52, %v1614_v25 }
  0x17   :  { %7106 = vst [vmem:[#allocation18_spill] sm:$0xff] %v1673_v43  ;;  %v7122_v60 = vsel %vm1763_vm0, 4294967295, %v7121_v60  ;;  %vm1771_vm3 = vmor %vm1664_vm11, %vm952_vm9  ;;  %vm957_vm0 = vcmp.eq.s32.totalorder %v1610_v23, %v1755_v58  ;;  %vm958_vm11 = vcmp.eq.s32.totalorder %v1610_v23, %v1757_v59  ;;  %v7135_v4 = vmov 0 }
  0x18   :  { %7111 = vst [vmem:[#allocation19_spill] sm:$0xff] %v1705_v47  ;;  %v7124_v62 = vsel %vm1771_vm3, 4294967295, %v7123_v62  ;;  %vm1777_vm12 = vmor %vm1685_vm14, %vm953_vm10  ;;  %vm768_vm14 = vcmp.eq.s32.totalorder %v1732_v52, %v1616_v27  ;;  %vm832_vm10 = vcmp.eq.s32.totalorder %v1732_v52, %v1620_v29  ;;  %vm769_vm3 = vcmp.eq.s32.totalorder %v1732_v52, %v1618_v28 }
  0x19   :  { %7120 = vst [vmem:[#allocation20_spill] sm:$0xff] %v1757_v59  ;;  %v7126_v63 = vsel %vm1777_vm12, 4294967295, %v7125_v63  ;;  %vm1791_vm9 = vmor %vm1701_vm1, %vm954_vm13  ;;  %vm833_vm1 = vcmp.eq.s32.totalorder %v1732_v52, %v1624_v31  ;;  %v7138_v5 = vmov 0  ;;  %v1843_v7 = vperm.slane %v27_v61, 0 }
  0x1a   :  { %1243 = vperm.xlu2 %1491, %v1484_v10   ;;  %v7128_v0 = vsel %vm1791_vm9, 4294967295, %v7127_v0  ;;  %vm1801_vm12 = vmor %vm1719_vm4, %vm955_vm15  ;;  %vm834_vm4 = vcmp.eq.s32.totalorder %v1732_v52, %v1632_v33  ;;  %vm771_vm9 = vcmp.eq.s32.totalorder %v1732_v52, %v1630_v32  ;;  %v1853_v9 = vperm.slane %v27_v61, 1 }
  0x1b   :  { %561 = vperm.xlu1 %1490, %v531_v11   ;;  %1238 = vperm.xlu0 %1489, %v1483_v12   ;;  %v7130_v1 = vsel %vm1801_vm12, 4294967295, %v7129_v1  ;;  %vm1811_vm13 = vmor %vm1725_vm5, %vm956_vm2  ;;  %vm7137_vm5 = vnez %v7119_v57  ;;  %v1855_v10 = vperm.slane %v27_v61, 2  ;;  %v7145_v11 = vmov 0 }
  0x1c   :  { %v7132_v2 = vsel %vm1811_vm13, 4294967295, %v7131_v2  ;;  %vm1819_vm15 = vmor %vm767_vm8, %vm831_vm6  ;;  %vm835_vm8 = vcmp.eq.s32.totalorder %v1732_v52, %v1640_v35  ;;  %v1871_v12 = vperm.slane %v27_v61, 3  ;;  %v1920_v18 = vperm.slane %v27_v61, 6 }
  0x1d   :  { %vm1825_vm12 = vmor %vm1739_vm7, %vm957_vm0  ;;  %vm836_vm0 = vcmp.eq.s32.totalorder %v1732_v52, %v1648_v37  ;;  %vm7151_vm7 = vcmp.eq.s32.totalorder %v1732_v52, %v1638_v34  ;;  %v1922_v19 = vperm.slane %v27_v61, 7  ;;  %v7160_v21 = vmov 0 }
  0x1e   :  { %v7136_v4 = vsel %vm1825_vm12, 4294967295, %v7135_v4  ;;  %vm1831_vm2 = vmor %vm7137_vm5, %vm958_vm11  ;;  %vm7144_vm5 = vcmp.eq.s32.totalorder %v1732_v52, %v1622_v30  ;;  %7147 = vst [vmem:[#allocation21_spill] sm:$0xff] %v1871_v12  ;;  %v7164_v22 = vmov 0  ;;  %v7168_v26 = vmov 0 }
  0x1f   :  { %v7139_v5 = vsel %vm1831_vm2, 4294967295, %v7138_v5  ;;  %vm1839_vm6 = vmor %vm768_vm14, %vm832_vm10  ;;  %vm837_vm10 = vcmp.eq.s32.totalorder %v1732_v52, %v1658_v39  ;;  %vm7154_vm14 = vcmp.eq.s32.totalorder %v1732_v52, %v1646_v36  ;;  %7157 = vst [vmem:[#allocation23_spill] sm:$0xff] %v1922_v19  ;;  %vm962_vm2 = vcmp.eq.s32.totalorder %v1732_v52, %v1723_v50 }
  0x20   :  { %vm1849_vm11 = vmor %vm769_vm3, %vm833_vm1  ;;  %vm7174_vm12 = vcmp.eq.s32.totalorder %v1732_v52, %v1689_v45  ;;  %v7191_v53 = vmov 0  ;;  %v7197_v57 = vmov 0  ;;  %v7297_v3 = vmov 0 }
  0x21   :  { %vm1867_vm3 = vmor %vm7144_vm5, %vm834_vm4  ;;  %v7609_v6 = vmov 0 }
  0x22   :  { %571 = vperm.xlu2 %1491, %v533_v13   ;;  %v7146_v11 = vsel %vm1867_vm3, 4294967295, %v7145_v11  ;;  %vm1885_vm4 = vmor %vm771_vm9, %vm835_vm8  ;;  %v7148_v13 = vmov 0  ;;  %vm7158_vm8 = vcmp.eq.s32.totalorder %v1610_v23, %v1843_v7  ;;  %vm7159_vm9 = vnez %v7122_v60 }
  0x23   :  { %1248 = vperm.xlu1 %1490, %v1485_v14   ;;  %566 = vperm.xlu0 %1489, %v532_v15   ;;  %v7149_v13 = vsel %vm1885_vm4, 4294967295, %v7148_v13  ;;  %v1889_v14 = vperm.slane %v27_v61, 4  ;;  %vm1901_vm1 = vmor %vm7151_vm7, %vm836_vm0  ;;  %v7152_v15 = vmov 0  ;;  %vm7184_vm3 = vnez %v7130_v1 }
  0x24   :  { %v7153_v15 = vsel %vm1901_vm1, 4294967295, %v7152_v15  ;;  %vm1914_vm5 = vmor %vm7154_vm14, %vm837_vm10  ;;  %vm7162_vm14 = vcmp.eq.s32.totalorder %v1732_v52, %v1673_v43  ;;  %vm7163_vm10 = vcmp.eq.s32.totalorder %v1732_v52, %v1671_v42  ;;  %v7200_v60 = vmov 0 }
  0x25   :  { %7150 = vst [vmem:[#allocation22_spill] sm:$0xff] %v1889_v14  ;;  %v7156_v17 = vsel %vm1914_vm5, 4294967295, %v7155_v17  ;;  %vm1083_vm0 = vcmp.eq.s32.totalorder %v1610_v23, %v1889_v14  ;;  %vm1931_vm1 = vmor %vm7159_vm9, %vm7158_vm8  ;;  %vm961_vm5 = vcmp.eq.s32.totalorder %v1732_v52, %v1707_v48  ;;  %vm7166_vm9 = vcmp.eq.s32.totalorder %v1610_v23, %v1853_v9 }
  0x26   :  { %v7161_v21 = vsel %vm1931_vm1, 4294967295, %v7160_v21  ;;  %vm1941_vm7 = vmor %vm7163_vm10, %vm7162_vm14  ;;  %vm7167_vm8 = vnez %v7124_v62  ;;  %vm7170_vm14 = vcmp.eq.s32.totalorder %v1610_v23, %v1855_v10  ;;  %vm7171_vm10 = vnez %v7126_v63 }
  0x27   :  { %v7165_v22 = vsel %vm1941_vm7, 4294967295, %v7164_v22  ;;  %vm1954_vm1 = vmor %vm7167_vm8, %vm7166_vm9  ;;  %vm1085_vm8 = vcmp.eq.s32.totalorder %v1610_v23, %v1920_v18  ;;  %v2258_v63 = vadd.s32 16, %v1601_v20  ;;  %v7619_v62 = vmov 0 }
  0x28   :  { %v7169_v26 = vsel %vm1954_vm1, 4294967295, %v7168_v26  ;;  %vm1963_vm7 = vmor %vm7171_vm10, %vm7170_vm14  ;;  %vm1086_vm14 = vcmp.eq.s32.totalorder %v1610_v23, %v1922_v19  ;;  %vm7177_vm10 = vcmp.eq.s32.totalorder %v1610_v23, %v1871_v12 }
  0x29   :  { %v7173_v38 = vsel %vm1963_vm7, 4294967295, %v7172_v38  ;;  %vm1974_vm9 = vmor %vm1819_vm15, %vm7174_vm12  ;;  %vm7178_vm7 = vnez %v7128_v0  ;;  %vm963_vm12 = vcmp.eq.s32.totalorder %v1732_v52, %v1737_v54  ;;  %vm7181_vm15 = vcmp.eq.s32.totalorder %v1732_v52, %v1705_v47  ;;  %7262 = vst [vmem:[#allocation25_spill] sm:$0xff] %v2258_v63 }
  0x2a   :  { %v7176_v40 = vsel %vm1974_vm9, 4294967295, %v7175_v40  ;;  %vm1987_vm1 = vmor %vm7178_vm7, %vm7177_vm10  ;;  %vm964_vm7 = vcmp.eq.s32.totalorder %v1732_v52, %v1747_v56 }
  0x2b   :  { %1253 = vperm.xlu0 %1489, %v1486_v16   ;;  %v1907_v16 = vperm.slane %v27_v61, 5  ;;  %v7180_v44 = vsel %vm1987_vm1, 4294967295, %v7179_v44  ;;  %vm1998_vm9 = vmor %vm1839_vm6, %vm7181_vm15  ;;  %vm7190_vm6 = vnez %v7132_v2 }
  0x2c   :  { %vm2004_vm13 = vmor %vm7184_vm3, %vm1083_vm0  ;;  %vm965_vm3 = vcmp.eq.s32.totalorder %v1732_v52, %v1755_v58  ;;  %vm7193_vm0 = vnez %v7146_v11  ;;  %v7231_v11 = vmov 0 }
  0x2d   :  { %vm1084_vm4 = vcmp.eq.s32.totalorder %v1610_v23, %v1907_v16  ;;  %v7185_v23 = vmov 0  ;;  %vm2012_vm10 = vmor %vm1849_vm11, %vm961_vm5  ;;  %vm7196_vm11 = vnez %v7136_v4  ;;  %v7301_v4 = vmov 0 }
  0x2e   :  { %v7186_v23 = vsel %vm2004_vm13, 4294967295, %v7185_v23  ;;  %vm2021_vm15 = vmor %vm7190_vm6, %vm1084_vm4  ;;  %vm7199_vm4 = vnez %v7139_v5  ;;  %v7223_v5 = vmov 0 }
  0x2f   :  { %v7192_v53 = vsel %vm2021_vm15, 4294967295, %v7191_v53  ;;  %vm2029_vm13 = vmor %vm7193_vm0, %vm962_vm2  ;;  %vm966_vm15 = vcmp.eq.s32.totalorder %v1732_v52, %v1757_v59  ;;  %vm7202_vm2 = vnez %v7149_v13  ;;  %v7234_v13 = vmov 0 }
  0x30   :  { %vm2035_vm5 = vmor %vm7196_vm11, %vm1085_vm8  ;;  %vm7205_vm8 = vnez %v7153_v15  ;;  %v7279_v15 = vmov 0 }
  0x31   :  { %v7198_v57 = vsel %vm2035_vm5, 4294967295, %v7197_v57  ;;  %vm2041_vm6 = vmor %vm7199_vm4, %vm1086_vm14  ;;  %vm1087_vm14 = vcmp.eq.s32.totalorder %v1732_v52, %v1843_v7  ;;  %vm7211_vm4 = vnez %v7165_v22 }
  0x32   :  { %v7201_v60 = vsel %vm2041_vm6, 4294967295, %v7200_v60  ;;  %vm2049_vm0 = vmor %vm7202_vm2, %vm963_vm12  ;;  %vm7208_vm6 = vnez %v7156_v17  ;;  %vm1089_vm12 = vcmp.eq.s32.totalorder %v1732_v52, %v1855_v10 }
  0x33   :  { %vm2055_vm11 = vmor %vm7205_vm8, %vm964_vm7 }
  0x34   :  { %vm2065_vm5 = vmor %vm7208_vm6, %vm965_vm3  ;;  %vm7217_vm3 = vcmp.eq.s32.totalorder %v1732_v52, %v1853_v9 }
  0x35   :  { %vm2079_vm1 = vmor %vm7211_vm4, %vm966_vm15  ;;  %vm7214_vm4 = vnez %v7176_v40  ;;  %v7243_v40 = vmov 0 }
  0x36   :  { %vm2097_vm8 = vmor %vm7214_vm4, %vm1087_vm14  ;;  %vm7222_vm4 = vcmp.eq.s32.totalorder %v1732_v52, %v1871_v12 }
  0x37   :  { %vm2112_vm15 = vmor %vm1998_vm9, %vm7217_vm3  ;;  %vm7233_vm3 = vcmp.eq.s32.totalorder %v1732_v52, %v1907_v16 }
  0x38   :  { %vm2121_vm14 = vmor %vm2012_vm10, %vm1089_vm12  ;;  %vm7225_vm10 = vcmp.eq.s32.totalorder %v2017_v51, %v1614_v25  ;;  %vm7226_vm12 = vcmp.eq.s32.totalorder %v2017_v51, %v1612_v24 }
  0x39   :  { %vm2130_vm2 = vmor %vm2029_vm13, %vm7222_vm4  ;;  %vm7230_vm4 = vcmp.eq.s32.totalorder %v1732_v52, %v1889_v14 }
  0x3a   :  { %v7224_v5 = vsel %vm2130_vm2, 4294967295, %v7223_v5  ;;  %vm2144_vm6 = vmor %vm7226_vm12, %vm7225_vm10  ;;  %vm7242_vm12 = vcmp.eq.s32.totalorder %v1732_v52, %v1920_v18 }
  0x3b   :  { %vm2156_vm9 = vmor %vm2049_vm0, %vm7230_vm4  ;;  %vm7236_vm0 = vcmp.eq.s32.totalorder %v2017_v51, %v1620_v29  ;;  %vm7237_vm4 = vcmp.eq.s32.totalorder %v2017_v51, %v1616_v27 }
  0x3c   :  { %v7232_v11 = vsel %vm2156_vm9, 4294967295, %v7231_v11  ;;  %vm2165_vm10 = vmor %vm2055_vm11, %vm7233_vm3  ;;  %vm7246_vm11 = vcmp.eq.s32.totalorder %v2017_v51, %v1618_v28  ;;  %vm7253_vm3 = vcmp.eq.s32.totalorder %v2017_v51, %v1632_v33  ;;  %vm7278_vm9 = vcmp.eq.s32.totalorder %v2017_v51, %v1646_v36 }
  0x3d   :  { %v7235_v13 = vsel %vm2165_vm10, 4294967295, %v7234_v13  ;;  %vm2179_vm13 = vmor %vm7237_vm4, %vm7236_vm0  ;;  %vm7245_vm4 = vcmp.eq.s32.totalorder %v2017_v51, %v1624_v31 }
  0x3e   :  { %vm2194_vm7 = vmor %vm2065_vm5, %vm7242_vm12  ;;  %vm7250_vm12 = vcmp.eq.s32.totalorder %v1732_v52, %v1922_v19  ;;  %vm7254_vm5 = vcmp.eq.s32.totalorder %v2017_v51, %v1622_v30  ;;  %v7293_v19 = vmov 0 }
  0x3f   :  { %v7244_v40 = vsel %vm2194_vm7, 4294967295, %v7243_v40  ;;  %vm2206_vm10 = vmor %vm7246_vm11, %vm7245_vm4  ;;  %vm7258_vm11 = vcmp.eq.s32.totalorder %v2017_v51, %v1640_v35 }
  0x40   :  { %vm2220_vm0 = vmor %vm2079_vm1, %vm7250_vm12  ;;  %vm295_vm1 = vcmp.eq.s32.totalorder %v2017_v51, %v1705_v47  ;;  %vm7263_vm12 = vnez %v7192_v53 }
  0x41   :  { %v7252_v55 = vsel %vm2220_vm0, 4294967295, %v7251_v55  ;;  %vm2234_vm7 = vmor %vm7254_vm5, %vm7253_vm3  ;;  %vm7259_vm0 = vcmp.eq.s32.totalorder %v2017_v51, %v1630_v32  ;;  %vm296_vm5 = vcmp.eq.s32.totalorder %v2017_v51, %v1707_v48 }
  0x42   :  { %vm2251_vm3 = vmor %vm7259_vm0, %vm7258_vm11  ;;  %vm7264_vm11 = vcmp.eq.s32.totalorder %v2017_v51, %v1689_v45 }
  0x43   :  { %vm2274_vm2 = vmor %vm2144_vm6, %vm7264_vm11  ;;  %vm7273_vm6 = vcmp.eq.s32.totalorder %v2017_v51, %v1648_v37 }
  0x44   :  { %vm2288_vm0 = vmor %vm2179_vm13, %vm295_vm1  ;;  %vm7308_vm1 = vnez %v7232_v11  ;;  %v7315_v11 = vmov 0 }
  0x45   :  { %vm2296_vm11 = vmor %vm2206_vm10, %vm296_vm5  ;;  %vm7274_vm10 = vcmp.eq.s32.totalorder %v2017_v51, %v1638_v34 }
  0x46   :  { %vm2314_vm5 = vmor %vm7274_vm10, %vm7273_vm6  ;;  %vm7281_vm6 = vcmp.eq.s32.totalorder %v2017_v51, %v1723_v50 }
  0x47   :  { %vm2337_vm10 = vmor %vm2234_vm7, %vm7281_vm6  ;;  %vm7284_vm7 = vcmp.eq.s32.totalorder %v2017_v51, %v1737_v54 }
  0x48   :  { %vm2356_vm6 = vmor %vm2251_vm3, %vm7284_vm7  ;;  %vm7287_vm3 = vcmp.eq.s32.totalorder %v2017_v51, %v1673_v43  ;;  %vm7288_vm7 = vcmp.eq.s32.totalorder %v2017_v51, %v1671_v42 }
  0x49   :  { %vm2376_vm4 = vmor %vm7288_vm7, %vm7287_vm3  ;;  %vm7292_vm3 = vcmp.eq.s32.totalorder %v2017_v51, %v1843_v7 }
  0x4a   :  { %vm2397_vm7 = vmor %vm2274_vm2, %vm7292_vm3  ;;  %vm7304_vm3 = vcmp.eq.s32.totalorder %v2258_v63, %v1614_v25 }
  0x4b   :  { %v7294_v19 = vsel %vm2397_vm7, 4294967295, %v7293_v19  ;;  %vm7411_vm7 = vcmp.eq.s32.totalorder %v1601_v20, %v1632_v33 }
  0x4c   :  { %7295 = vst [vmem:[#allocation26_spill] sm:$0xff] %v7294_v19  ;;  %v7475_v19 = vmov 0 }
  0x5c   :  { %v2091_v1 = vpop.permute.xlu2 %1218 }
  0x5d   :  { %v1261_v0 = vsel %vm7263_vm12, %v2091_v1, 0.0  ;;  %vm7267_vm12 = vnez %v7198_v57  ;;  %v7311_v57 = vmov 0 }
  0x5e   :  { %v1262_v53 = vsel %vm7267_vm12, %v2091_v1, 0.0  ;;  %vm7277_vm12 = vcmp.eq.s32.totalorder %v2017_v51, %v1658_v39 }
  0x5f   :  { %vm2324_vm13 = vmor %vm7278_vm9, %vm7277_vm12  ;;  %vm144_vm12 = vcmp.eq.s32.totalorder %v2258_v63, %v1624_v31  ;;  %vm7296_vm9 = vcmp.eq.s32.totalorder %v2017_v51, %v1853_v9 }
  0x60   :  { %v7280_v15 = vsel %vm2324_vm13, 4294967295, %v7279_v15  ;;  %vm143_vm13 = vcmp.eq.s32.totalorder %v2258_v63, %v1620_v29 }
  0x64   :  { %v1224_v49 = vpop.permute.xlu2 %1223 }
  0x65   :  { %v1264_v17 = vsel %vm2097_vm8, %v1224_v49, 0.0  ;;  %v1265_v2 = vsel %vm2112_vm15, %v1224_v49, 0.0  ;;  %v1266_v8 = vsel %vm2121_vm14, %v1224_v49, 0.0  ;;  %vm7291_vm8 = vnez %v7224_v5  ;;  %vm2406_vm15 = vmor %vm2288_vm0, %vm7296_vm9 }
  0x66   :  { %v1267_v41 = vsel %vm7291_vm8, %v1224_v49, 0.0  ;;  %v7298_v3 = vsel %vm2406_vm15, 4294967295, %v7297_v3  ;;  %vm7300_vm14 = vcmp.eq.s32.totalorder %v2017_v51, %v1855_v10  ;;  %vm7305_vm0 = vcmp.eq.s32.totalorder %v2258_v63, %v1612_v24 }
  0x67   :  { %7299 = vst [vmem:[#allocation27_spill] sm:$0xff] %v7298_v3  ;;  %vm2415_vm8 = vmor %vm2296_vm11, %vm7300_vm14  ;;  %v1268_v22 = vsel %vm7308_vm1, %v1224_v49, 0.0  ;;  %vm7309_vm11 = vnez %v7235_v13  ;;  %vm7310_vm14 = vcmp.eq.s32.totalorder %v2017_v51, %v1871_v12  ;;  %vm7332_vm1 = vnez %v7173_v38 }
  0x68   :  { %v7302_v4 = vsel %vm2415_vm8, 4294967295, %v7301_v4  ;;  %vm2427_vm9 = vmor %vm7305_vm0, %vm7304_vm3  ;;  %v1269_v61 = vsel %vm7309_vm11, %v1224_v49, 0.0  ;;  %vm7314_vm3 = vcmp.eq.s32.totalorder %v2017_v51, %v1889_v14  ;;  %vm7347_vm11 = vcmp.eq.s32.totalorder %v2258_v63, %v1630_v32 }
  0x69   :  { %7303 = vst [vmem:[#allocation28_spill] sm:$0xff] %v7302_v4  ;;  %vm2440_vm2 = vmor %vm2337_vm10, %vm7310_vm14  ;;  %vm7318_vm10 = vcmp.eq.s32.totalorder %v2258_v63, %v1616_v27  ;;  %v7424_v13 = vmov 0  ;;  %v7462_v4 = vmov 0  ;;  %v7470_v3 = vmov 0 }
  0x6a   :  { %v7312_v57 = vsel %vm2440_vm2, 4294967295, %v7311_v57  ;;  %vm2449_vm0 = vmor %vm2356_vm6, %vm7314_vm3  ;;  %vm7321_vm6 = vnez %v7244_v40  ;;  %vm7322_vm3 = vnez %v7161_v21  ;;  %v7326_v40 = vmov 0 }
  0x6b   :  { %7313 = vst [vmem:[#allocation29_spill] sm:$0xff] %v7312_v57  ;;  %v7316_v11 = vsel %vm2449_vm0, 4294967295, %v7315_v11  ;;  %vm2463_vm14 = vmor %vm7318_vm10, %vm143_vm13  ;;  %v1270_v46 = vsel %vm7321_vm6, %v1224_v49, 0.0  ;;  %v7323_v52 = vsel %vm7322_vm3, %v2091_v1, 0.0  ;;  %vm7325_vm13 = vcmp.eq.s32.totalorder %v2258_v63, %v1618_v28 }
  0x6c   :  { %7317 = vst [vmem:[#allocation30_spill] sm:$0xff] %v7316_v11  ;;  %v2473_v11 = vadd.f32 %v1264_v17, %v7323_v52  ;;  %vm2485_vm10 = vmor %vm7325_vm13, %vm144_vm12  ;;  %vm7328_vm6 = vnez %v7252_v55  ;;  %vm7329_vm3 = vnez %v7169_v26  ;;  %vm7335_vm12 = vnez %v7180_v44 }
  0x6d   :  { %v7327_v40 = vsel %vm2485_vm10, 4294967295, %v7326_v40  ;;  %v1271_v21 = vsel %vm7328_vm6, %v1224_v49, 0.0  ;;  %v7330_v17 = vsel %vm7329_vm3, %v2091_v1, 0.0  ;;  %v7336_v14 = vsel %vm7335_vm12, %v2091_v1, 0.0 }
  0x6e   :  { %7324 = vst [vmem:[#allocation31_spill] sm:$0xff] %v2473_v11  ;;  %v2495_v52 = vadd.f32 %v1265_v2, %v7330_v17  ;;  %v7333_v11 = vsel %vm7332_vm1, %v2091_v1, 0.0  ;;  %v2507_v12 = vadd.f32 %v1267_v41, %v7336_v14  ;;  %vm7338_vm13 = vcmp.eq.s32.totalorder %v2258_v63, %v1632_v33  ;;  %v7380_v2 = vld [vmem:[#allocation23_spill] sm:$0xff]  ;;  %v7409_v17 = vld [vmem:[#allocation21_spill] sm:$0xff] }
  0x6f   :  { %v2501_v57 = vadd.f32 %v1266_v8, %v7333_v11  ;;  %vm7339_vm6 = vcmp.eq.s32.totalorder %v2258_v63, %v1622_v30  ;;  %v7340_v26 = vmov 0  ;;  %vm7342_vm1 = vnez %v7186_v23 }
  0x70   :  { %7331 = vst [vmem:[#allocation32_spill] sm:$0xff] %v2495_v52  ;;  %vm2515_vm3 = vmor %vm7339_vm6, %vm7338_vm13  ;;  %v7343_v38 = vsel %vm7342_vm1, %v2091_v1, 0.0  ;;  %v2525_v44 = vadd.f32 %v1269_v61, %v1261_v0  ;;  %vm7346_vm12 = vcmp.eq.s32.totalorder %v2258_v63, %v1640_v35  ;;  %v7348_v41 = vmov 0  ;;  %v2669_v61 = vpop.permute.xlu2 %556 }
  0x71   :  { %7334 = vst [vmem:[#allocation33_spill] sm:$0xff] %v2501_v57  ;;  %v7341_v26 = vsel %vm2515_vm3, 4294967295, %v7340_v26  ;;  %v2523_v8 = vadd.f32 %v1268_v22, %v7343_v38  ;;  %vm2533_vm0 = vmor %vm7347_vm11, %vm7346_vm12  ;;  %v2541_v14 = vadd.f32 %v1270_v46, %v1262_v53  ;;  %vm7351_vm1 = vcmp.eq.s32.totalorder %v2258_v63, %v1648_v37 }
  0x72   :  { %7337 = vst [vmem:[#allocation34_spill] sm:$0xff] %v2507_v12  ;;  %v7349_v41 = vsel %vm2533_vm0, 4294967295, %v7348_v41  ;;  %vm7352_vm2 = vcmp.eq.s32.totalorder %v2258_v63, %v1638_v34  ;;  %v7353_v23 = vmov 0  ;;  %vm7355_vm13 = vnez %v7201_v60 }
  0x73   :  { %7344 = vst [vmem:[#allocation35_spill] sm:$0xff] %v2523_v8  ;;  %vm2549_vm3 = vmor %vm7352_vm2, %vm7351_vm1  ;;  %v7356_v49 = vsel %vm7355_vm13, %v2091_v1, 0.0  ;;  %vm7358_vm2 = vcmp.eq.s32.totalorder %v2258_v63, %v1658_v39  ;;  %vm7359_vm1 = vcmp.eq.s32.totalorder %v2258_v63, %v1646_v36  ;;  %vm7362_vm6 = vcmp.eq.s32.totalorder %v2258_v63, %v1673_v43 }
  0x74   :  { %7345 = vst [vmem:[#allocation36_spill] sm:$0xff] %v2525_v44  ;;  %v7354_v23 = vsel %vm2549_vm3, 4294967295, %v7353_v23  ;;  %v2563_v55 = vadd.f32 %v1271_v21, %v7356_v49  ;;  %vm2571_vm3 = vmor %vm7359_vm1, %vm7358_vm2  ;;  %vm7363_vm0 = vcmp.eq.s32.totalorder %v2258_v63, %v1671_v42  ;;  %vm7366_vm13 = vcmp.eq.s32.totalorder %v2017_v51, %v1747_v56 }
  0x75   :  { %7350 = vst [vmem:[#allocation37_spill] sm:$0xff] %v2541_v14  ;;  %vm2587_vm10 = vmor %vm7363_vm0, %vm7362_vm6  ;;  %v7367_v1 = vmov 0  ;;  %vm7369_vm6 = vcmp.eq.s32.totalorder %v2017_v51, %v1755_v58  ;;  %vm7370_vm1 = vnez %v7280_v15  ;;  %v7371_v53 = vmov 0 }
  0x76   :  { %7357 = vst [vmem:[#allocation38_spill] sm:$0xff] %v2563_v55  ;;  %vm2604_vm0 = vmor %vm2314_vm5, %vm7366_vm13  ;;  %vm7374_vm11 = vcmp.eq.s32.totalorder %v1601_v20, %v1612_v24  ;;  %vm7377_vm12 = vcmp.eq.s32.totalorder %v2017_v51, %v1757_v59  ;;  %v2667_v22 = vadd.s32 56, %v1601_v20  ;;  %vm7387_vm5 = vcmp.eq.s32.totalorder %v2258_v63, %v1689_v45 }
  0x77   :  { %v7368_v1 = vsel %vm2604_vm0, 4294967295, %v7367_v1  ;;  %vm2613_vm2 = vmor %vm7370_vm1, %vm7369_vm6  ;;  %vm7373_vm6 = vcmp.eq.s32.totalorder %v1601_v20, %v1614_v25  ;;  %vm7381_vm1 = vcmp.eq.s32.totalorder %v1601_v20, %v1620_v29  ;;  %7386 = vst [vmem:[#allocation39_spill] sm:$0xff] %v2669_v61  ;;  %v7388_v11 = vmov 0 }
  0x78   :  { %v7372_v53 = vsel %vm2613_vm2, 4294967295, %v7371_v53  ;;  %vm2635_vm2 = vmor %vm7374_vm11, %vm7373_vm6  ;;  %7385 = vst [vmem:[#allocation23_spill] sm:$0xff] %v2667_v22  ;;  %v7391_v46 = vmov 0  ;;  %vm7394_vm0 = vcmp.eq.s32.totalorder %v1601_v20, %v1618_v28  ;;  %vm7397_vm6 = vcmp.eq.s32.totalorder %v2258_v63, %v1707_v48 }
  0x79   :  { %vm2644_vm13 = vmor %vm2376_vm4, %vm7377_vm12  ;;  %vm7382_vm4 = vcmp.eq.s32.totalorder %v1601_v20, %v1616_v27  ;;  %v7399_v38 = vmov 0  ;;  %v7403_v49 = vmov 0  ;;  %vm7406_vm8 = vnez %v7349_v41 }
  0x7a   :  { %vm2662_vm12 = vmor %vm7382_vm4, %vm7381_vm1  ;;  %vm7390_vm1 = vcmp.eq.s32.totalorder %v2258_v63, %v1705_v47  ;;  %v7421_v44 = vmov 0  ;;  %v7443_v8 = vmov 0  ;;  %v2871_v12 = vadd.s32 24, %v1601_v20 }
  0x7b   :  { %vm2676_vm11 = vmor %vm2427_vm9, %vm7387_vm5  ;;  %vm7401_vm5 = vcmp.eq.s32.totalorder %v2258_v63, %v1723_v50  ;;  %vm7402_vm9 = vnez %v7341_v26  ;;  %v7410_v26 = vld [vmem:[#allocation22_spill] sm:$0xff]  ;;  %v7447_v57 = vmov 0  ;;  %v7451_v52 = vmov 0 }
  0x7c   :  { %v7389_v11 = vsel %vm2676_vm11, 4294967295, %v7388_v11  ;;  %vm2685_vm4 = vmor %vm2463_vm14, %vm7390_vm1  ;;  %vm7393_vm1 = vcmp.eq.s32.totalorder %v1601_v20, %v1624_v31  ;;  %vm7405_vm11 = vcmp.eq.s32.totalorder %v2258_v63, %v1737_v54  ;;  %v7455_v55 = vmov 0 }
  0x7d   :  { %v7392_v46 = vsel %vm2685_vm4, 4294967295, %v7391_v46  ;;  %vm2707_vm4 = vmor %vm7394_vm0, %vm7393_vm1  ;;  %vm7398_vm0 = vnez %v7327_v40  ;;  %v7407_v40 = vmov 0  ;;  %v7459_v21 = vmov 0 }
  0x7e   :  { %vm2725_vm1 = vmor %vm7398_vm0, %vm7397_vm6  ;;  %vm7419_vm0 = vcmp.eq.s32.totalorder %v2258_v63, %v1747_v56  ;;  %v7490_v5 = vmov 0  ;;  %v7497_v15 = vmov 0  ;;  %v7505_v0 = vmov 0 }
  0x7f   :  { %v7400_v38 = vsel %vm2725_vm1, 4294967295, %v7399_v38  ;;  %vm2734_vm14 = vmor %vm7402_vm9, %vm7401_vm5  ;;  %vm7420_vm5 = vnez %v7354_v23  ;;  %vm7426_vm9 = vcmp.eq.s32.totalorder %v2258_v63, %v1757_v59  ;;  %v7427_v23 = vmov 0 }
  0x80   :  { %v7404_v49 = vsel %vm2734_vm14, 4294967295, %v7403_v49  ;;  %vm2743_vm15 = vmor %vm7406_vm8, %vm7405_vm11  ;;  %vm7412_vm8 = vcmp.eq.s32.totalorder %v1601_v20, %v1622_v30  ;;  %vm7441_vm14 = vcmp.eq.s32.totalorder %v1601_v20, %v1673_v43  ;;  %vm7458_vm1 = vcmp.eq.s32.totalorder %v2667_v22, %v1622_v30 }
  0x81   :  { %v7408_v40 = vsel %vm2743_vm15, 4294967295, %v7407_v40  ;;  %vm2761_vm11 = vmor %vm7412_vm8, %vm7411_vm7  ;;  %vm7423_vm7 = vcmp.eq.s32.totalorder %v2258_v63, %v1755_v58  ;;  %v7526_v14 = vmov 0  ;;  %v7632_v60 = vmov 0 }
  0x82   :  { %vm2776_vm15 = vmor %vm7420_vm5, %vm7419_vm0  ;;  %vm7433_vm5 = vcmp.eq.s32.totalorder %v1601_v20, %v1648_v37  ;;  %v7683_v61 = vmov 0 }
  0x83   :  { %v7422_v44 = vsel %vm2776_vm15, 4294967295, %v7421_v44  ;;  %vm2785_vm8 = vmor %vm2571_vm3, %vm7423_vm7  ;;  %vm7429_vm7 = vcmp.eq.s32.totalorder %v1601_v20, %v1640_v35  ;;  %vm7434_vm3 = vcmp.eq.s32.totalorder %v1601_v20, %v1638_v34 }
  0x84   :  { %v7425_v13 = vsel %vm2785_vm8, 4294967295, %v7424_v13  ;;  %vm2794_vm6 = vmor %vm2587_vm10, %vm7426_vm9  ;;  %vm7430_vm8 = vcmp.eq.s32.totalorder %v1601_v20, %v1630_v32  ;;  %vm7446_vm10 = vcmp.eq.s32.totalorder %v2667_v22, %v1612_v24  ;;  %vm7449_vm9 = vcmp.eq.s32.totalorder %v2667_v22, %v1620_v29 }
  0x85   :  { %v7428_v23 = vsel %vm2794_vm6, 4294967295, %v7427_v23  ;;  %vm2810_vm15 = vmor %vm7430_vm8, %vm7429_vm7  ;;  %vm7437_vm6 = vcmp.eq.s32.totalorder %v1601_v20, %v1658_v39  ;;  %vm7445_vm7 = vcmp.eq.s32.totalorder %v2667_v22, %v1614_v25  ;;  %vm7457_vm8 = vcmp.eq.s32.totalorder %v2667_v22, %v1632_v33 }
  0x86   :  { %vm2824_vm0 = vmor %vm7434_vm3, %vm7433_vm5  ;;  %vm7438_vm5 = vcmp.eq.s32.totalorder %v1601_v20, %v1646_v36 }
  0x87   :  { %vm2842_vm3 = vmor %vm7438_vm5, %vm7437_vm6  ;;  %vm7442_vm6 = vcmp.eq.s32.totalorder %v1601_v20, %v1671_v42 }
  0x88   :  { %vm2860_vm5 = vmor %vm7442_vm6, %vm7441_vm14  ;;  %vm7450_vm14 = vcmp.eq.s32.totalorder %v2667_v22, %v1616_v27 }
  0x89   :  { %v7444_v8 = vsel %vm2860_vm5, 4294967295, %v7443_v8  ;;  %vm2887_vm5 = vmor %vm7446_vm10, %vm7445_vm7  ;;  %vm7464_vm7 = vcmp.eq.s32.totalorder %v2667_v22, %v1640_v35 }
  0x8a   :  { %v7448_v57 = vsel %vm2887_vm5, 4294967295, %v7447_v57  ;;  %vm2897_vm6 = vmor %vm7450_vm14, %vm7449_vm9  ;;  %vm7453_vm5 = vcmp.eq.s32.totalorder %v2667_v22, %v1624_v31  ;;  %vm7454_vm9 = vcmp.eq.s32.totalorder %v2667_v22, %v1618_v28 }
  0x8b   :  { %v7452_v52 = vsel %vm2897_vm6, 4294967295, %v7451_v52  ;;  %vm2915_vm14 = vmor %vm7454_vm9, %vm7453_vm5  ;;  %vm7461_vm6 = vcmp.eq.s32.totalorder %v1601_v20, %v1689_v45 }
  0x8c   :  { %v7456_v55 = vsel %vm2915_vm14, 4294967295, %v7455_v55  ;;  %vm2925_vm10 = vmor %vm7458_vm1, %vm7457_vm8  ;;  %vm7473_vm1 = vcmp.eq.s32.totalorder %v2017_v51, %v1920_v18  ;;  %vm7474_vm8 = vnez %v7372_v53  ;;  %v7482_v53 = vmov 0 }
  0x8d   :  { %v7460_v21 = vsel %vm2925_vm10, 4294967295, %v7459_v21  ;;  %vm2936_vm5 = vmor %vm2635_vm2, %vm7461_vm6  ;;  %vm7465_vm10 = vcmp.eq.s32.totalorder %v2667_v22, %v1630_v32  ;;  %vm7468_vm2 = vcmp.eq.s32.totalorder %v2017_v51, %v1907_v16  ;;  %vm7469_vm6 = vnez %v7368_v1 }
  0x8e   :  { %v7463_v4 = vsel %vm2936_vm5, 4294967295, %v7462_v4  ;;  %vm2952_vm14 = vmor %vm7465_vm10, %vm7464_vm7  ;;  %vm7478_vm10 = vcmp.eq.s32.totalorder %v1601_v20, %v1705_v47  ;;  %v7479_v1 = vmov 0 }
  0x8f   :  { %vm2961_vm9 = vmor %vm7469_vm6, %vm7468_vm2  ;;  %vm7481_vm2 = vcmp.eq.s32.totalorder %v1601_v20, %v1707_v48 }
  0x90   :  { %v7471_v3 = vsel %vm2961_vm9, 4294967295, %v7470_v3  ;;  %vm2970_vm5 = vmor %vm7474_vm8, %vm7473_vm1  ;;  %vm7489_vm1 = vcmp.eq.s32.totalorder %v2017_v51, %v7380_v2  ;;  %v7510_v51 = vmov 0 }
  0x91   :  { %7472 = vst [vmem:[#allocation21_spill] sm:$0xff] %v7471_v3  ;;  %v7476_v19 = vsel %vm2970_vm5, 4294967295, %v7475_v19  ;;  %vm2979_vm7 = vmor %vm2662_vm12, %vm7478_vm10  ;;  %vm7485_vm12 = vcmp.eq.s32.totalorder %v2667_v22, %v1648_v37  ;;  %vm7486_vm10 = vcmp.eq.s32.totalorder %v2667_v22, %v1638_v34  ;;  %v7797_v3 = vmov 0 }
  0x92   :  { %7477 = vst [vmem:[#allocation22_spill] sm:$0xff] %v7476_v19  ;;  %v7480_v1 = vsel %vm2979_vm7, 4294967295, %v7479_v1  ;;  %vm2988_vm6 = vmor %vm2707_vm4, %vm7481_vm2  ;;  %vm7496_vm4 = vcmp.eq.s32.totalorder %v1601_v20, %v1737_v54  ;;  %v7655_v19 = vmov 0 }
  0x93   :  { %v7483_v53 = vsel %vm2988_vm6, 4294967295, %v7482_v53  ;;  %vm3002_vm7 = vmor %vm7486_vm10, %vm7485_vm12  ;;  %vm7493_vm12 = vcmp.eq.s32.totalorder %v1601_v20, %v1723_v50 }
  0x94   :  { %7484 = vst [vmem:[#allocation40_spill] sm:$0xff] %v7483_v53  ;;  %vm3015_vm8 = vmor %vm2644_vm13, %vm7489_vm1  ;;  %v7494_v53 = vmov 0  ;;  %vm7503_vm13 = vcmp.eq.s32.totalorder %v2258_v63, %v1843_v7  ;;  %vm7504_vm1 = vnez %v7389_v11  ;;  %v7514_v11 = vmov 0 }
  0x95   :  { %v7491_v5 = vsel %vm3015_vm8, 4294967295, %v7490_v5  ;;  %vm3024_vm10 = vmor %vm2761_vm11, %vm7493_vm12  ;;  %vm7499_vm11 = vcmp.eq.s32.totalorder %v2667_v22, %v1658_v39  ;;  %vm7500_vm12 = vcmp.eq.s32.totalorder %v2667_v22, %v1646_v36 }
  0x96   :  { %7492 = vst [vmem:[#allocation41_spill] sm:$0xff] %v7491_v5  ;;  %v7495_v53 = vsel %vm3024_vm10, 4294967295, %v7494_v53  ;;  %vm3033_vm2 = vmor %vm2810_vm15, %vm7496_vm4  ;;  %vm7513_vm15 = vcmp.eq.s32.totalorder %v1601_v20, %v1747_v56  ;;  %v7673_v5 = vmov 0 }
  0x97   :  { %v7498_v15 = vsel %vm3033_vm2, 4294967295, %v7497_v15  ;;  %vm3047_vm10 = vmor %vm7500_vm12, %vm7499_vm11  ;;  %vm7508_vm11 = vcmp.eq.s32.totalorder %v2258_v63, %v1853_v9  ;;  %vm7509_vm12 = vnez %v7392_v46  ;;  %v7517_v46 = vmov 0 }
  0x98   :  { %vm3060_vm2 = vmor %vm7504_vm1, %vm7503_vm13  ;;  %vm7516_vm13 = vcmp.eq.s32.totalorder %v1601_v20, %v1755_v58 }
  0x99   :  { %v7506_v0 = vsel %vm3060_vm2, 4294967295, %v7505_v0  ;;  %vm3069_vm8 = vmor %vm7509_vm12, %vm7508_vm11  ;;  %vm7534_vm11 = vcmp.eq.s32.totalorder %v2258_v63, %v7410_v26  ;;  %vm7535_vm12 = vnez %v7408_v40  ;;  %v7545_v40 = vmov 0 }
  0x9a   :  { %7507 = vst [vmem:[#allocation42_spill] sm:$0xff] %v7506_v0  ;;  %v7511_v51 = vsel %vm3069_vm8, 4294967295, %v7510_v51  ;;  %vm3078_vm4 = vmor %vm2824_vm0, %vm7513_vm15  ;;  %vm7520_vm0 = vcmp.eq.s32.totalorder %v2667_v22, %v1673_v43  ;;  %vm7521_vm15 = vcmp.eq.s32.totalorder %v2667_v22, %v1671_v42  ;;  %v3693_v0 = vadd.s32 64, %v2871_v12 }
  0x9b   :  { %7512 = vst [vmem:[#allocation43_spill] sm:$0xff] %v7511_v51  ;;  %v7515_v11 = vsel %vm3078_vm4, 4294967295, %v7514_v11  ;;  %vm3087_vm1 = vmor %vm2842_vm3, %vm7516_vm13  ;;  %vm7529_vm3 = vcmp.eq.s32.totalorder %v2258_v63, %v7409_v17  ;;  %vm7530_vm13 = vnez %v7404_v49  ;;  %v7541_v49 = vmov 0 }
  0x9c   :  { %v7518_v46 = vsel %vm3087_vm1, 4294967295, %v7517_v46  ;;  %vm3101_vm4 = vmor %vm7521_vm15, %vm7520_vm0  ;;  %vm7524_vm1 = vcmp.eq.s32.totalorder %v2258_v63, %v1855_v10  ;;  %vm7525_vm0 = vnez %v7400_v38  ;;  %v7536_v38 = vmov 0 }
  0x9d   :  { %7519 = vst [vmem:[#allocation44_spill] sm:$0xff] %v7518_v46  ;;  %vm3118_vm15 = vmor %vm7525_vm0, %vm7524_vm1  ;;  %v7531_v46 = vmov 0  ;;  %vm7543_vm1 = vcmp.eq.s32.totalorder %v2258_v63, %v1907_v16  ;;  %vm7544_vm0 = vnez %v7422_v44  ;;  %v7555_v44 = vmov 0 }
  0x9e   :  { %v7527_v14 = vsel %vm3118_vm15, 4294967295, %v7526_v14  ;;  %vm3127_vm8 = vmor %vm7530_vm13, %vm7529_vm3  ;;  %vm7548_vm3 = vcmp.eq.s32.totalorder %v2258_v63, %v1920_v18  ;;  %vm7549_vm13 = vnez %v7425_v13  ;;  %v7560_v13 = vmov 0 }
  0x9f   :  { %7528 = vst [vmem:[#allocation45_spill] sm:$0xff] %v7527_v14  ;;  %v7532_v46 = vsel %vm3127_vm8, 4294967295, %v7531_v46  ;;  %vm3136_vm2 = vmor %vm7535_vm12, %vm7534_vm11  ;;  %vm7539_vm8 = vcmp.eq.s32.totalorder %v2871_v12, %v1614_v25  ;;  %vm7540_vm11 = vcmp.eq.s32.totalorder %v2871_v12, %v1612_v24  ;;  %v7723_v14 = vmov 0 }
  0xa0   :  { %7533 = vst [vmem:[#allocation46_spill] sm:$0xff] %v7532_v46  ;;  %v7537_v38 = vsel %vm3136_vm2, 4294967295, %v7536_v38  ;;  %vm3154_vm12 = vmor %vm7540_vm11, %vm7539_vm8  ;;  %vm7553_vm8 = vcmp.eq.s32.totalorder %v2258_v63, %v7380_v2  ;;  %vm7554_vm11 = vnez %v7428_v23  ;;  %v7564_v23 = vmov 0 }
  0xa1   :  { %7538 = vst [vmem:[#allocation47_spill] sm:$0xff] %v7537_v38  ;;  %v7542_v49 = vsel %vm3154_vm12, 4294967295, %v7541_v49  ;;  %vm3163_vm2 = vmor %vm7544_vm0, %vm7543_vm1  ;;  %v7550_v38 = vmov 0  ;;  %vm7566_vm1 = vcmp.eq.s32.totalorder %v1601_v20, %v1757_v59  ;;  %vm7567_vm0 = vnez %v7444_v8  ;;  %v7575_v8 = vld [vmem:[#allocation17_spill] sm:$0xff] }
  0xa2   :  { %v7546_v40 = vsel %vm3163_vm2, 4294967295, %v7545_v40  ;;  %vm3172_vm15 = vmor %vm7549_vm13, %vm7548_vm3  ;;  %vm154_vm13 = vcmp.eq.s32.totalorder %v2871_v12, %v1640_v35  ;;  %vm7562_vm2 = vcmp.eq.s32.totalorder %v2871_v12, %v1624_v31  ;;  %v7568_v63 = vmov 0 }
  0xa3   :  { %7547 = vst [vmem:[#allocation48_spill] sm:$0xff] %v7546_v40  ;;  %v7551_v38 = vsel %vm3172_vm15, 4294967295, %v7550_v38  ;;  %vm3181_vm12 = vmor %vm7554_vm11, %vm7553_vm8  ;;  %vm7558_vm15 = vcmp.eq.s32.totalorder %v2871_v12, %v1620_v29  ;;  %vm7559_vm8 = vcmp.eq.s32.totalorder %v2871_v12, %v1616_v27  ;;  %vm7580_vm3 = vnez %v7448_v57 }
  0xa4   :  { %7552 = vst [vmem:[#allocation49_spill] sm:$0xff] %v7551_v38  ;;  %v7556_v44 = vsel %vm3181_vm12, 4294967295, %v7555_v44  ;;  %vm3199_vm11 = vmor %vm7559_vm8, %vm7558_vm15  ;;  %vm7563_vm15 = vcmp.eq.s32.totalorder %v2871_v12, %v1618_v28  ;;  %vm7576_vm12 = vcmp.eq.s32.totalorder %v2871_v12, %v1630_v32  ;;  %v7581_v38 = vmov 0 }
  0xa5   :  { %7557 = vst [vmem:[#allocation50_spill] sm:$0xff] %v7556_v44  ;;  %v7561_v13 = vsel %vm3199_vm11, 4294967295, %v7560_v13  ;;  %vm3217_vm8 = vmor %vm7563_vm15, %vm7562_vm2  ;;  %vm7571_vm2 = vcmp.eq.s32.totalorder %v2871_v12, %v1632_v33  ;;  %vm7572_vm15 = vcmp.eq.s32.totalorder %v2871_v12, %v1622_v30  ;;  %v7573_v44 = vmov 0 }
  0xa6   :  { %v7565_v23 = vsel %vm3217_vm8, 4294967295, %v7564_v23  ;;  %vm3226_vm11 = vmor %vm7567_vm0, %vm7566_vm1  ;;  %vm7579_vm0 = vcmp.eq.s32.totalorder %v2667_v22, %v1689_v45  ;;  %v7585_v40 = vmov 0  ;;  %vm7589_vm1 = vcmp.eq.s32.totalorder %v2871_v12, %v1638_v34 }
  0xa7   :  { %v7569_v63 = vsel %vm3226_vm11, 4294967295, %v7568_v63  ;;  %vm3240_vm8 = vmor %vm7572_vm15, %vm7571_vm2  ;;  %vm7588_vm15 = vcmp.eq.s32.totalorder %v2871_v12, %v1648_v37  ;;  %vm7636_vm5 = vnez %v7542_v49  ;;  %v7645_v49 = vmov 0 }
  0xa8   :  { %7570 = vst [vmem:[#allocation51_spill] sm:$0xff] %v7569_v63  ;;  %v7574_v44 = vsel %vm3240_vm8, 4294967295, %v7573_v44  ;;  %vm3253_vm11 = vmor %vm7576_vm12, %vm154_vm13  ;;  %v7577_v63 = vmov 0  ;;  %vm7583_vm12 = vcmp.eq.s32.totalorder %v2667_v22, %v1705_v47  ;;  %vm7584_vm13 = vnez %v7452_v52 }
  0xa9   :  { %v7578_v63 = vsel %vm3253_vm11, 4294967295, %v7577_v63  ;;  %vm3268_vm8 = vmor %vm7580_vm3, %vm7579_vm0  ;;  %vm7596_vm3 = vcmp.eq.s32.totalorder %v2667_v22, %v1723_v50  ;;  %vm7597_vm0 = vnez %v7460_v21  ;;  %v7729_v46 = vmov 0 }
  0xaa   :  { %v7582_v38 = vsel %vm3268_vm8, 4294967295, %v7581_v38  ;;  %vm3277_vm2 = vmor %vm7584_vm13, %vm7583_vm12  ;;  %vm7600_vm12 = vcmp.eq.s32.totalorder %v2667_v22, %v1737_v54  ;;  %v7737_v21 = vmov 0  ;;  %v7747_v57 = vmov 0 }
  0xab   :  { %v7586_v40 = vsel %vm3277_vm2, 4294967295, %v7585_v40  ;;  %vm3287_vm11 = vmor %vm7589_vm1, %vm7588_vm15  ;;  %vm7592_vm2 = vcmp.eq.s32.totalorder %v2667_v22, %v1707_v48  ;;  %vm7593_vm1 = vnez %v7456_v55  ;;  %v7601_v55 = vmov 0 }
  0xac   :  { %7587 = vst [vmem:[#allocation17_spill] sm:$0xff] %v7586_v40  ;;  %vm3304_vm15 = vmor %vm7593_vm1, %vm7592_vm2  ;;  %v7598_v40 = vmov 0  ;;  %vm7607_vm2 = vcmp.eq.s32.totalorder %v1601_v20, %v1843_v7  ;;  %vm7608_vm1 = vnez %v7463_v4  ;;  %v7616_v4 = vmov 0 }
  0xad   :  { %vm3313_vm8 = vmor %vm7597_vm0, %vm7596_vm3  ;;  %vm7612_vm3 = vcmp.eq.s32.totalorder %v2667_v22, %v1747_v56  ;;  %v7764_v52 = vmov 0 }
  0xae   :  { %v7599_v40 = vsel %vm3313_vm8, 4294967295, %v7598_v40  ;;  %vm3322_vm13 = vmor %vm2952_vm14, %vm7600_vm12  ;;  %vm7603_vm8 = vcmp.eq.s32.totalorder %v7575_v8, %v1614_v25  ;;  %vm7604_vm14 = vcmp.eq.s32.totalorder %v7575_v8, %v1612_v24  ;;  %v7613_v25 = vmov 0  ;;  %v3466_v24 = vpop.permute.xlu1 %546 }
  0xaf   :  { %v7602_v55 = vsel %vm3322_vm13, 4294967295, %v7601_v55  ;;  %vm3340_vm12 = vmor %vm7604_vm14, %vm7603_vm8  ;;  %vm7615_vm8 = vcmp.eq.s32.totalorder %v2667_v22, %v1755_v58  ;;  %7652 = vst [vmem:[#allocation54_spill] sm:$0xff] %v3466_v24  ;;  %v7727_v51 = vld [vmem:[#allocation51_spill] sm:$0xff]  ;;  %v7772_v24 = vmov 0 }
  0xb0   :  { %vm3349_vm13 = vmor %vm7608_vm1, %vm7607_vm2  ;;  %vm7618_vm2 = vcmp.eq.s32.totalorder %v2667_v22, %v1757_v59 }
  0xb1   :  { %v7610_v6 = vsel %vm3349_vm13, 4294967295, %v7609_v6  ;;  %vm3358_vm0 = vmor %vm3002_vm7, %vm7612_vm3  ;;  %vm7635_vm7 = vcmp.eq.s32.totalorder %v2871_v12, %v1689_v45 }
  0xb2   :  { %7611 = vst [vmem:[#allocation52_spill] sm:$0xff] %v7610_v6  ;;  %v7614_v25 = vsel %vm3358_vm0, 4294967295, %v7613_v25  ;;  %vm3367_vm14 = vmor %vm3047_vm10, %vm7615_vm8  ;;  %vm7625_vm10 = vcmp.eq.s32.totalorder %v1601_v20, %v1853_v9  ;;  %vm7626_vm8 = vnez %v7480_v1  ;;  %v7637_v1 = vmov 0  ;;  %v7859_v6 = vld [vmem:[#allocation15_spill] sm:$0xff] }
  0xb3   :  { %v7617_v4 = vsel %vm3367_vm14, 4294967295, %v7616_v4  ;;  %vm3376_vm1 = vmor %vm3101_vm4, %vm7618_vm2  ;;  %vm7621_vm14 = vcmp.eq.s32.totalorder %v7575_v8, %v1620_v29  ;;  %vm7622_vm4 = vcmp.eq.s32.totalorder %v7575_v8, %v1616_v27  ;;  %v7627_v29 = vmov 0  ;;  %v7745_v41 = vld [vmem:[#allocation17_spill] sm:$0xff] }
  0xb4   :  { %v7620_v62 = vsel %vm3376_vm1, 4294967295, %v7619_v62  ;;  %vm3394_vm2 = vmor %vm7622_vm4, %vm7621_vm14  ;;  %vm7630_vm14 = vcmp.eq.s32.totalorder %v1601_v20, %v1855_v10  ;;  %v7641_v27 = vmov 0 }
  0xb5   :  { %vm3409_vm3 = vmor %vm7626_vm8, %vm7625_vm10  ;;  %vm7639_vm10 = vcmp.eq.s32.totalorder %v2871_v12, %v1705_v47  ;;  %vm7640_vm8 = vnez %v7561_v13  ;;  %v7759_v13 = vmov 0  ;;  %vm7781_vm13 = vnez %v7620_v62  ;;  %v7809_v62 = vld [vmem:[#allocation7_spill] sm:$0xff] }
  0xb6   :  { %v7628_v29 = vsel %vm3409_vm3, 4294967295, %v7627_v29  ;;  %vm3418_vm4 = vmor %vm2988_vm6, %vm7630_vm14  ;;  %vm7643_vm6 = vcmp.eq.s32.totalorder %v2871_v12, %v1707_v48  ;;  %vm7644_vm14 = vnez %v7565_v23  ;;  %v7660_v23 = vmov 0 }
  0xb7   :  { %7629 = vst [vmem:[#allocation53_spill] sm:$0xff] %v7628_v29  ;;  %v7633_v60 = vsel %vm3418_vm4, 4294967295, %v7632_v60  ;;  %vm3427_vm9 = vmor %vm7636_vm5, %vm7635_vm7  ;;  %vm7653_vm5 = vcmp.eq.s32.totalorder %v1601_v20, %v7409_v17  ;;  %vm7654_vm7 = vnez %v7495_v53  ;;  %v7665_v53 = vmov 0 }
  0xb8   :  { %7634 = vst [vmem:[#allocation40_spill] sm:$0xff] %v7633_v60  ;;  %v7638_v1 = vsel %vm3427_vm9, 4294967295, %v7637_v1  ;;  %vm3436_vm3 = vmor %vm7640_vm8, %vm7639_vm10  ;;  %vm7647_vm10 = vcmp.eq.s32.totalorder %v7575_v8, %v1624_v31  ;;  %vm7648_vm8 = vcmp.eq.s32.totalorder %v7575_v8, %v1618_v28  ;;  %vm7664_vm9 = vcmp.eq.s32.totalorder %v2871_v12, %v1646_v36  ;;  %v7830_v60 = vld [vmem:[#allocation8_spill] sm:$0xff] }
  0xb9   :  { %v7642_v27 = vsel %vm3436_vm3, 4294967295, %v7641_v27  ;;  %vm3445_vm4 = vmor %vm7644_vm14, %vm7643_vm6  ;;  %vm7663_vm14 = vcmp.eq.s32.totalorder %v2871_v12, %v1658_v39 }
  0xba   :  { %v7646_v49 = vsel %vm3445_vm4, 4294967295, %v7645_v49  ;;  %vm3459_vm3 = vmor %vm7648_vm8, %vm7647_vm10  ;;  %vm7658_vm10 = vcmp.eq.s32.totalorder %v1601_v20, %v7410_v26  ;;  %vm7659_vm8 = vnez %v7498_v15  ;;  %v7669_v15 = vmov 0 }
  0xbb   :  { %vm3475_vm4 = vmor %vm7654_vm7, %vm7653_vm5  ;;  %vm7667_vm5 = vcmp.eq.s32.totalorder %v2871_v12, %v1723_v50  ;;  %vm7668_vm7 = vnez %v7574_v44  ;;  %v7777_v44 = vmov 0 }
  0xbc   :  { %v7656_v19 = vsel %vm3475_vm4, 4294967295, %v7655_v19  ;;  %vm3484_vm6 = vmor %vm7659_vm8, %vm7658_vm10  ;;  %vm7671_vm10 = vcmp.eq.s32.totalorder %v2871_v12, %v1737_v54  ;;  %vm7672_vm8 = vnez %v7578_v63  ;;  %v7689_v63 = vmov 0 }
  0xbd   :  { %7657 = vst [vmem:[#allocation55_spill] sm:$0xff] %v7656_v19  ;;  %v7661_v23 = vsel %vm3484_vm6, 4294967295, %v7660_v23  ;;  %vm3494_vm1 = vmor %vm7664_vm9, %vm7663_vm14  ;;  %vm7681_vm9 = vcmp.eq.s32.totalorder %v1601_v20, %v1907_v16  ;;  %vm7682_vm14 = vnez %v7515_v11  ;;  %v7694_v11 = vmov 0 }
  0xbe   :  { %7662 = vst [vmem:[#allocation56_spill] sm:$0xff] %v7661_v23  ;;  %v7666_v53 = vsel %vm3494_vm1, 4294967295, %v7665_v53  ;;  %vm3503_vm4 = vmor %vm7668_vm7, %vm7667_vm5  ;;  %vm7675_vm5 = vcmp.eq.s32.totalorder %v7575_v8, %v1632_v33  ;;  %vm7676_vm7 = vcmp.eq.s32.totalorder %v7575_v8, %v1622_v30  ;;  %v7687_v33 = vld [vmem:[#allocation44_spill] sm:$0xff]  ;;  %v3647_v30 = vpop.permute.xlu2 %1243  ;;  %v7831_v23 = vld [vmem:[#allocation10_spill] sm:$0xff]  ;;  %v7937_v19 = vmov 0 }
  0xbf   :  { %v7670_v15 = vsel %vm3503_vm4, 4294967295, %v7669_v15  ;;  %vm3512_vm6 = vmor %vm7672_vm8, %vm7671_vm10  ;;  %vm7692_vm8 = vcmp.eq.s32.totalorder %v2871_v12, %v1673_v43  ;;  %vm7693_vm10 = vcmp.eq.s32.totalorder %v2871_v12, %v1671_v42  ;;  %7725 = vst [vmem:[#allocation58_spill] sm:$0xff] %v3647_v30  ;;  %v3675_v30 = vpop.permute.xlu0 %536 }
  0xc0   :  { %v7674_v5 = vsel %vm3512_vm6, 4294967295, %v7673_v5  ;;  %vm3526_vm4 = vmor %vm7676_vm7, %vm7675_vm5  ;;  %vm7686_vm5 = vcmp.eq.s32.totalorder %v1601_v20, %v1920_v18  ;;  %vm7688_vm7 = vnez %v7687_v33  ;;  %v7697_v33 = vmov 0  ;;  %7735 = vst [vmem:[#allocation59_spill] sm:$0xff] %v3675_v30 }
  0xc1   :  { %vm3541_vm6 = vmor %vm7682_vm14, %vm7681_vm9  ;;  %vm7696_vm9 = vcmp.eq.s32.totalorder %v2871_v12, %v1747_v56  ;;  %v7891_v30 = vmov 0 }
  0xc2   :  { %v7684_v61 = vsel %vm3541_vm6, 4294967295, %v7683_v61  ;;  %vm3550_vm1 = vmor %vm7688_vm7, %vm7686_vm5  ;;  %vm7707_vm7 = vcmp.eq.s32.totalorder %v7575_v8, %v1648_v37  ;;  %v7719_v37 = vmov 0  ;;  %vm7721_vm6 = vcmp.eq.s32.totalorder %v7575_v8, %v1673_v43 }
  0xc3   :  { %7685 = vst [vmem:[#allocation57_spill] sm:$0xff] %v7684_v61  ;;  %v7690_v63 = vsel %vm3550_vm1, 4294967295, %v7689_v63  ;;  %vm3560_vm0 = vmor %vm7693_vm10, %vm7692_vm8  ;;  %vm7699_vm10 = vcmp.eq.s32.totalorder %v7575_v8, %v1640_v35  ;;  %vm7700_vm8 = vcmp.eq.s32.totalorder %v7575_v8, %v1630_v32  ;;  %v7814_v35 = vmov 0 }
  0xc4   :  { %7691 = vst [vmem:[#allocation44_spill] sm:$0xff] %v7690_v63  ;;  %v7695_v11 = vsel %vm3560_vm0, 4294967295, %v7694_v11  ;;  %vm3569_vm14 = vmor %vm3287_vm11, %vm7696_vm9  ;;  %vm7726_vm9 = vcmp.eq.s32.totalorder %v1601_v20, %v7380_v2  ;;  %vm7740_vm11 = vnez %v7582_v38  ;;  %v7741_v20 = vmov 0  ;;  %v7853_v63 = vld [vmem:[#allocation14_spill] sm:$0xff]  ;;  %v7953_v38 = vld [vmem:[#allocation7_spill] sm:$0xff] }
  0xc5   :  { %v7698_v33 = vsel %vm3569_vm14, 4294967295, %v7697_v33  ;;  %vm3583_vm0 = vmor %vm7700_vm8, %vm7699_vm10  ;;  %vm7708_vm10 = vcmp.eq.s32.totalorder %v7575_v8, %v1638_v34  ;;  %vm7728_vm14 = vnez %v7727_v51  ;;  %v7856_v61 = vmov 0 }
  0xc6   :  { %vm3602_vm8 = vmor %vm7708_vm10, %vm7707_vm7  ;;  %vm7717_vm7 = vcmp.eq.s32.totalorder %v7575_v8, %v1658_v39  ;;  %vm7718_vm10 = vcmp.eq.s32.totalorder %v7575_v8, %v1646_v36  ;;  %v3984_v29 = vpop.permute.xlu2 %571 }
  0xc7   :  { %vm3623_vm1 = vmor %vm7718_vm10, %vm7717_vm7  ;;  %vm7722_vm7 = vcmp.eq.s32.totalorder %v7575_v8, %v1671_v42 }
  0xc8   :  { %v7720_v37 = vsel %vm3623_vm1, 4294967295, %v7719_v37  ;;  %vm3641_vm10 = vmor %vm7722_vm7, %vm7721_vm6  ;;  %vm7732_vm1 = vcmp.eq.s32.totalorder %v7575_v8, %v1689_v45  ;;  %vm7736_vm7 = vcmp.eq.s32.totalorder %v7575_v8, %v1705_v47 }
  0xc9   :  { %v7724_v14 = vsel %vm3641_vm10, 4294967295, %v7723_v14  ;;  %vm3654_vm5 = vmor %vm7728_vm14, %vm7726_vm9  ;;  %vm7744_vm10 = vcmp.eq.s32.totalorder %v2667_v22, %v1853_v9 }
  0xca   :  { %v7730_v46 = vsel %vm3654_vm5, 4294967295, %v7729_v46  ;;  %vm3671_vm14 = vmor %vm3340_vm12, %vm7732_vm1  ;;  %vm7739_vm1 = vcmp.eq.s32.totalorder %v2667_v22, %v1843_v7 }
  0xcb   :  { %7731 = vst [vmem:[#allocation51_spill] sm:$0xff] %v7730_v46  ;;  %vm3688_vm12 = vmor %vm3394_vm2, %vm7736_vm7  ;;  %vm7746_vm2 = vnez %v7745_v41  ;;  %v7754_v41 = vmov 0  ;;  %v7876_v46 = vmov 0 }
  0xcc   :  { %v7738_v21 = vsel %vm3688_vm12, 4294967295, %v7737_v21  ;;  %vm3700_vm9 = vmor %vm7740_vm11, %vm7739_vm1  ;;  %vm7757_vm1 = vcmp.eq.s32.totalorder %v2667_v22, %v7409_v17  ;;  %vm7758_vm11 = vnez %v7599_v40 }
  0xcd   :  { %v7742_v20 = vsel %vm3700_vm9, 4294967295, %v7741_v20  ;;  %vm3709_vm7 = vmor %vm7746_vm2, %vm7744_vm10  ;;  %vm7750_vm9 = vcmp.eq.s32.totalorder %v7575_v8, %v1707_v48  ;;  %vm7753_vm2 = vcmp.eq.s32.totalorder %v2667_v22, %v1855_v10 }
  0xce   :  { %7743 = vst [vmem:[#allocation60_spill] sm:$0xff] %v7742_v20  ;;  %v7748_v57 = vsel %vm3709_vm7, 4294967295, %v7747_v57  ;;  %vm3726_vm10 = vmor %vm3459_vm3, %vm7750_vm9  ;;  %vm7762_vm3 = vcmp.eq.s32.totalorder %v2667_v22, %v7410_v26  ;;  %vm7763_vm9 = vnez %v7602_v55  ;;  %v7808_v55 = vld [vmem:[#allocation6_spill] sm:$0xff]  ;;  %v7901_v20 = vmov 0 }
  0xcf   :  { %7749 = vst [vmem:[#allocation17_spill] sm:$0xff] %v7748_v57  ;;  %vm3735_vm12 = vmor %vm3304_vm15, %vm7753_vm2  ;;  %vm7780_vm15 = vcmp.eq.s32.totalorder %v2667_v22, %v7380_v2  ;;  %v7968_v57 = vmov 0 }
  0xd0   :  { %v7755_v41 = vsel %vm3735_vm12, 4294967295, %v7754_v41  ;;  %vm3744_vm6 = vmor %vm7758_vm11, %vm7757_vm1  ;;  %vm7771_vm11 = vnez %v7614_v25  ;;  %vm7775_vm1 = vcmp.eq.s32.totalorder %v2667_v22, %v1920_v18  ;;  %v7782_v25 = vmov 0 }
  0xd1   :  { %7756 = vst [vmem:[#allocation61_spill] sm:$0xff] %v7755_v41  ;;  %v7760_v13 = vsel %vm3744_vm6, 4294967295, %v7759_v13  ;;  %vm3753_vm7 = vmor %vm7763_vm9, %vm7762_vm3  ;;  %vm7767_vm6 = vcmp.eq.s32.totalorder %v7575_v8, %v1723_v50  ;;  %vm7770_vm9 = vcmp.eq.s32.totalorder %v2667_v22, %v1907_v16  ;;  %v7792_v22 = vmov 0  ;;  %v7973_v41 = vld [vmem:[#allocation59_spill] sm:$0xff] }
  0xd2   :  { %7761 = vst [vmem:[#allocation62_spill] sm:$0xff] %v7760_v13  ;;  %v7765_v52 = vsel %vm3753_vm7, 4294967295, %v7764_v52  ;;  %vm3770_vm3 = vmor %vm3526_vm4, %vm7767_vm6  ;;  %vm7776_vm4 = vnez %v7617_v4  ;;  %vm7904_vm12 = vcmp.eq.s32.totalorder %v3693_v0, %v1646_v36  ;;  %v7964_v13 = vld [vmem:[#allocation12_spill] sm:$0xff] }
  0xd3   :  { %7766 = vst [vmem:[#allocation63_spill] sm:$0xff] %v7765_v52  ;;  %vm3782_vm2 = vmor %vm7771_vm11, %vm7770_vm9  ;;  %vm7791_vm9 = vnez %v7638_v1  ;;  %v7802_v1 = vmov 0  ;;  %v7911_v52 = vmov 0 }
  0xd4   :  { %v7773_v24 = vsel %vm3782_vm2, 4294967295, %v7772_v24  ;;  %vm3791_vm6 = vmor %vm7776_vm4, %vm7775_vm1  ;;  %vm7785_vm4 = vcmp.eq.s32.totalorder %v7575_v8, %v1737_v54  ;;  %vm7790_vm1 = vcmp.eq.s32.totalorder %v2871_v12, %v1843_v7 }
  0xd5   :  { %7774 = vst [vmem:[#allocation64_spill] sm:$0xff] %v7773_v24  ;;  %v7778_v44 = vsel %vm3791_vm6, 4294967295, %v7777_v44  ;;  %vm3800_vm7 = vmor %vm7781_vm13, %vm7780_vm15  ;;  %vm7800_vm15 = vcmp.eq.s32.totalorder %v2871_v12, %v1855_v10  ;;  %vm7801_vm13 = vnez %v7646_v49  ;;  %v7818_v49 = vmov 0 }
  0xd6   :  { %7779 = vst [vmem:[#allocation65_spill] sm:$0xff] %v7778_v44  ;;  %v7783_v25 = vsel %vm3800_vm7, 4294967295, %v7782_v25  ;;  %vm3815_vm6 = vmor %vm3583_vm0, %vm7785_vm4  ;;  %vm7795_vm0 = vcmp.eq.s32.totalorder %v2871_v12, %v1853_v9  ;;  %vm7796_vm4 = vnez %v7642_v27  ;;  %v7958_v27 = vld [vmem:[#allocation10_spill] sm:$0xff] }
  0xd7   :  { %7784 = vst [vmem:[#allocation66_spill] sm:$0xff] %v7783_v25  ;;  %vm3830_vm11 = vmor %vm7791_vm9, %vm7790_vm1  ;;  %vm7805_vm9 = vcmp.eq.s32.totalorder %v7575_v8, %v1747_v56 }
  0xd8   :  { %v7793_v22 = vsel %vm3830_vm11, 4294967295, %v7792_v22  ;;  %vm3839_vm7 = vmor %vm7796_vm4, %vm7795_vm0  ;;  %vm7816_vm0 = vcmp.eq.s32.totalorder %v2871_v12, %v7409_v17  ;;  %vm7817_vm4 = vnez %v7670_v15  ;;  %v7828_v15 = vmov 0 }
  0xd9   :  { %7794 = vst [vmem:[#allocation67_spill] sm:$0xff] %v7793_v22  ;;  %v7798_v3 = vsel %vm3839_vm7, 4294967295, %v7797_v3  ;;  %vm3848_vm2 = vmor %vm7801_vm13, %vm7800_vm15  ;;  %vm7821_vm15 = vcmp.eq.s32.totalorder %v2871_v12, %v7410_v26  ;;  %vm7822_vm13 = vnez %v7674_v5  ;;  %v7840_v5 = vmov 0 }
  0xda   :  { %7799 = vst [vmem:[#allocation68_spill] sm:$0xff] %v7798_v3  ;;  %v7803_v1 = vsel %vm3848_vm2, 4294967295, %v7802_v1  ;;  %vm3857_vm1 = vmor %vm3602_vm8, %vm7805_vm9  ;;  %vm7812_vm8 = vcmp.eq.s32.totalorder %v2871_v12, %v1755_v58  ;;  %vm7813_vm9 = vnez %v7666_v53  ;;  %v7823_v53 = vmov 0 }
  0xdb   :  { %7804 = vst [vmem:[#allocation69_spill] sm:$0xff] %v7803_v1  ;;  %vm3876_vm2 = vmor %vm7813_vm9, %vm7812_vm8  ;;  %vm7826_vm8 = vcmp.eq.s32.totalorder %v7575_v8, %v1755_v58  ;;  %vm7827_vm9 = vnez %v7720_v37  ;;  %v7836_v37 = vmov 0  ;;  %v7983_v1 = vld [vmem:[#allocation40_spill] sm:$0xff] }
  0xdc   :  { %v7815_v35 = vsel %vm3876_vm2, 4294967295, %v7814_v35  ;;  %vm3885_vm7 = vmor %vm7817_vm4, %vm7816_vm0  ;;  %vm7838_vm0 = vcmp.eq.s32.totalorder %v2871_v12, %v1907_v16  ;;  %vm7839_vm4 = vnez %v7698_v33  ;;  %v7847_v33 = vld [vmem:[#allocation11_spill] sm:$0xff] }
  0xdd   :  { %v7819_v49 = vsel %vm3885_vm7, 4294967295, %v7818_v49  ;;  %vm3894_vm11 = vmor %vm7822_vm13, %vm7821_vm15  ;;  %vm7843_vm15 = vcmp.eq.s32.totalorder %v7575_v8, %v1757_v59  ;;  %vm7844_vm13 = vnez %v7724_v14  ;;  %v7848_v14 = vld [vmem:[#allocation13_spill] sm:$0xff]  ;;  %7858 = vst [vmem:[#allocation11_spill] sm:$0xff] %v3984_v29 }
  0xde   :  { %7820 = vst [vmem:[#allocation70_spill] sm:$0xff] %v7819_v49  ;;  %v7824_v53 = vsel %vm3894_vm11, 4294967295, %v7823_v53  ;;  %vm3903_vm2 = vmor %vm7827_vm9, %vm7826_vm8  ;;  %vm7834_vm8 = vcmp.eq.s32.totalorder %v2871_v12, %v1757_v59  ;;  %vm7835_vm9 = vnez %v7695_v11  ;;  %v7925_v11 = vmov 0 }
  0xdf   :  { %7825 = vst [vmem:[#allocation71_spill] sm:$0xff] %v7824_v53  ;;  %v7829_v15 = vsel %vm3903_vm2, 4294967295, %v7828_v15  ;;  %vm3922_vm11 = vmor %vm7835_vm9, %vm7834_vm8  ;;  %vm7850_vm8 = vcmp.eq.s32.totalorder %v3693_v0, %v7808_v55  ;;  %vm7854_vm9 = vcmp.eq.s32.totalorder %v3693_v0, %v7831_v23  ;;  %v7975_v53 = vld [vmem:[#allocation14_spill] sm:$0xff] }
  0xe0   :  { %v7837_v37 = vsel %vm3922_vm11, 4294967295, %v7836_v37  ;;  %vm3931_vm7 = vmor %vm7839_vm4, %vm7838_vm0  ;;  %vm7864_vm0 = vcmp.eq.s32.totalorder %v7575_v8, %v1843_v7  ;;  %vm7867_vm4 = vcmp.eq.s32.totalorder %v3693_v0, %v7848_v14  ;;  %v4083_v14 = vpop.permute.xlu1 %551 }
  0xe1   :  { %v7841_v5 = vsel %vm3931_vm7, 4294967295, %v7840_v5  ;;  %vm3940_vm2 = vmor %vm7844_vm13, %vm7843_vm15  ;;  %vm7849_vm15 = vcmp.eq.s32.totalorder %v3693_v0, %v7809_v62  ;;  %vm7868_vm13 = vcmp.eq.s32.totalorder %v3693_v0, %v7847_v33  ;;  %v8052_v62 = vld [vmem:[#allocation43_spill] sm:$0xff] }
  0xe2   :  { %7842 = vst [vmem:[#allocation72_spill] sm:$0xff] %v7841_v5  ;;  %vm3962_vm11 = vmor %vm7850_vm8, %vm7849_vm15  ;;  %vm7855_vm8 = vcmp.eq.s32.totalorder %v3693_v0, %v7830_v60 }
  0xe3   :  { %vm3980_vm15 = vmor %vm7855_vm8, %vm7854_vm9  ;;  %vm7860_vm9 = vcmp.eq.s32.totalorder %v3693_v0, %v1624_v31  ;;  %vm7861_vm8 = vcmp.eq.s32.totalorder %v3693_v0, %v1618_v28  ;;  %v7865_v31 = vmov 0 }
  0xe4   :  { %v7857_v61 = vsel %vm3980_vm15, 4294967295, %v7856_v61  ;;  %vm4000_vm15 = vmor %vm7861_vm8, %vm7860_vm9  ;;  %vm7871_vm9 = vcmp.eq.s32.totalorder %v7575_v8, %v1853_v9  ;;  %vm7872_vm8 = vnez %v7738_v21  ;;  %v7879_v21 = vmov 0 }
  0xe5   :  { %vm4014_vm7 = vmor %vm3671_vm14, %vm7864_vm0  ;;  %vm7878_vm14 = vcmp.eq.s32.totalorder %v7575_v8, %v7409_v17 }
  0xe6   :  { %v7866_v31 = vsel %vm4014_vm7, 4294967295, %v7865_v31  ;;  %vm4028_vm5 = vmor %vm7868_vm13, %vm7867_vm4  ;;  %vm7875_vm4 = vcmp.eq.s32.totalorder %v7575_v8, %v1855_v10 }
  0xe7   :  { %vm4041_vm7 = vmor %vm7872_vm8, %vm7871_vm9  ;;  %vm7887_vm8 = vcmp.eq.s32.totalorder %v7575_v8, %v7410_v26  ;;  %vm7893_vm9 = vcmp.eq.s32.totalorder %v3693_v0, %v7859_v6 }
  0xe8   :  { %vm4050_vm13 = vmor %vm3726_vm10, %vm7875_vm4  ;;  %vm7881_vm10 = vcmp.eq.s32.totalorder %v3693_v0, %v7853_v63  ;;  %vm7882_vm4 = vcmp.eq.s32.totalorder %v3693_v0, %v1630_v32  ;;  %v7971_v63 = vld [vmem:[#allocation52_spill] sm:$0xff] }
  0xe9   :  { %v7877_v46 = vsel %vm4050_vm13, 4294967295, %v7876_v46  ;;  %vm4059_vm0 = vmor %vm3770_vm3, %vm7878_vm14  ;;  %vm7894_vm3 = vcmp.eq.s32.totalorder %v3693_v0, %v1638_v34 }
  0xea   :  { %v7880_v21 = vsel %vm4059_vm0, 4294967295, %v7879_v21  ;;  %vm4073_vm13 = vmor %vm7882_vm4, %vm7881_vm10  ;;  %vm7890_vm4 = vcmp.eq.s32.totalorder %v7575_v8, %v1907_v16 }
  0xeb   :  { %vm4092_vm10 = vmor %vm3815_vm6, %vm7887_vm8  ;;  %vm7903_vm6 = vcmp.eq.s32.totalorder %v3693_v0, %v1658_v39  ;;  %vm7913_vm8 = vcmp.eq.s32.totalorder %v3693_v0, %v1673_v43 }
  0xec   :  { %vm4101_vm14 = vmor %vm3857_vm1, %vm7890_vm4 }
  0xed   :  { %v7892_v30 = vsel %vm4101_vm14, 4294967295, %v7891_v30  ;;  %vm4111_vm0 = vmor %vm7894_vm3, %vm7893_vm9  ;;  %vm7899_vm9 = vcmp.eq.s32.totalorder %v7575_v8, %v1920_v18  ;;  %vm7900_vm3 = vnez %v7829_v15  ;;  %vm7914_vm14 = vcmp.eq.s32.totalorder %v3693_v0, %v1671_v42 }
  0xee   :  { %vm4131_vm4 = vmor %vm7900_vm3, %vm7899_vm9  ;;  %v7921_v15 = vmov 0 }
  0xef   :  { %v7902_v20 = vsel %vm4131_vm4, 4294967295, %v7901_v20  ;;  %vm4141_vm1 = vmor %vm7904_vm12, %vm7903_vm6  ;;  %vm7910_vm12 = vcmp.eq.s32.totalorder %v7575_v8, %v7380_v2  ;;  %vm7923_vm4 = vcmp.eq.s32.totalorder %v2871_v12, %v1920_v18  ;;  %v7934_v8 = vld [vmem:[#allocation25_spill] sm:$0xff] }
  0xf0   :  { %vm4161_vm6 = vmor %vm3940_vm2, %vm7910_vm12  ;;  %vm7924_vm2 = vnez %v7815_v35  ;;  %v7932_v35 = vmov 0  ;;  %v4224_v25 = vadd.s32 64, %v7934_v8  ;;  %vm7936_vm12 = vnez %v7837_v37  ;;  %v542_v37 = vpop.permute.xlu0 %541 }
  0xf1   :  { %v7912_v52 = vsel %vm4161_vm6, 4294967295, %v7911_v52  ;;  %vm4171_vm9 = vmor %vm7914_vm14, %vm7913_vm8  ;;  %vm7920_vm8 = vcmp.eq.s32.totalorder %v3693_v0, %v1689_v45  ;;  %v586_v51 = vsel %vm4092_vm10, %v542_v37, 0.0  ;;  %vm7970_vm10 = vnez %v7902_v20 }
  0xf2   :  { %vm4193_vm3 = vmor %vm3962_vm11, %vm7920_vm8  ;;  %vm7930_vm8 = vcmp.eq.s32.totalorder %v3693_v0, %v1705_v47  ;;  %vm7947_vm11 = vcmp.eq.s32.totalorder %v3693_v0, %v1737_v54  ;;  %v7977_v20 = vmov 0 }
  0xf3   :  { %v7922_v15 = vsel %vm4193_vm3, 4294967295, %v7921_v15  ;;  %vm4202_vm6 = vmor %vm7924_vm2, %vm7923_vm4  ;;  %vm7931_vm3 = vnez %v7857_v61  ;;  %vm7935_vm2 = vcmp.eq.s32.totalorder %v2871_v12, %v7380_v2 }
  0xf4   :  { %v7926_v11 = vsel %vm4202_vm6, 4294967295, %v7925_v11  ;;  %vm4219_vm4 = vmor %vm7931_vm3, %vm7930_vm8  ;;  %vm7950_vm6 = vcmp.eq.s32.totalorder %v3693_v0, %v1747_v56 }
  0xf5   :  { %7927 = vst [vmem:[#allocation15_spill] sm:$0xff] %v7926_v11  ;;  %v7933_v35 = vsel %vm4219_vm4, 4294967295, %v7932_v35  ;;  %vm4231_vm14 = vmor %vm7936_vm12, %vm7935_vm2  ;;  %vm7941_vm4 = vcmp.eq.s32.totalorder %v3693_v0, %v1707_v48  ;;  %vm7944_vm2 = vcmp.eq.s32.totalorder %v3693_v0, %v1723_v50  ;;  %v8041_v11 = vmov 0 }
  0xf6   :  { %v7938_v19 = vsel %vm4231_vm14, 4294967295, %v7937_v19  ;;  %vm4249_vm12 = vmor %vm4000_vm15, %vm7941_vm4  ;;  %vm839_vm4 = vcmp.eq.s32.totalorder %v4224_v25, %v7953_v38 }
  0xf7   :  { %7939 = vst [vmem:[#allocation25_spill] sm:$0xff] %v7938_v19  ;;  %vm4258_vm3 = vmor %vm4028_vm5, %vm7944_vm2  ;;  %vm7954_vm2 = vnez %v7866_v31  ;;  %v583_v31 = vsel %vm4041_vm7, %v542_v37, 0.0  ;;  %vm7965_vm7 = vnez %v7892_v30  ;;  %v588_v30 = vsel %vm7970_vm10, %v542_v37, 0.0 }
  0xf8   :  { %vm4275_vm5 = vmor %vm4073_vm13, %vm7947_vm11  ;;  %v582_v61 = vsel %vm7954_vm2, %v542_v37, 0.0  ;;  %vm840_vm11 = vcmp.eq.s32.totalorder %v4224_v25, %v7958_v27  ;;  %vm7959_vm2 = vnez %v7877_v46  ;;  %v587_v46 = vsel %vm7965_vm7, %v542_v37, 0.0  ;;  %v7986_v27 = vld [vmem:[#allocation55_spill] sm:$0xff] }
  0xf9   :  { %vm4292_vm13 = vmor %vm4111_vm0, %vm7950_vm6  ;;  %vm7955_vm0 = vcmp.eq.s32.totalorder %v3693_v0, %v1755_v58  ;;  %v584_v44 = vsel %vm7959_vm2, %v542_v37, 0.0  ;;  %vm7972_vm7 = vnez %v7971_v63  ;;  %vm7979_vm10 = vnez %v7912_v52 }
  0xfa   :  { %vm4311_vm6 = vmor %vm4141_vm1, %vm7955_vm0  ;;  %vm7960_vm1 = vnez %v7880_v21  ;;  %vm7961_vm0 = vcmp.eq.s32.totalorder %v3693_v0, %v1757_v59  ;;  %v7966_v21 = vld [vmem:[#allocation13_spill] sm:$0xff]  ;;  %v7974_v29 = vsel %vm7972_vm7, %v7973_v41, 0.0  ;;  %v589_v63 = vsel %vm7979_vm10, %v542_v37, 0.0 }
  0xfb   :  { %v585_v40 = vsel %vm7960_vm1, %v542_v37, 0.0  ;;  %vm4332_vm8 = vmor %vm4171_vm9, %vm7961_vm0  ;;  %vm7967_vm9 = vcmp.eq.s32.totalorder %v4224_v25, %v7808_v55  ;;  %v638_v5 = vadd.f32 %v582_v61, %v7974_v29  ;;  %v7980_v29 = vld [vmem:[#allocation53_spill] sm:$0xff]  ;;  %vm7984_vm1 = vnez %v7983_v1 }
  0xfc   :  { %vm4352_vm0 = vmor %vm7967_vm9, %vm839_vm4  ;;  %vm7976_vm4 = vcmp.eq.s32.totalorder %v4224_v25, %v7830_v60  ;;  %vm7981_vm7 = vnez %v7980_v29  ;;  %v7985_v3 = vsel %vm7984_vm1, %v7973_v41, 0.0  ;;  %vm7987_vm2 = vnez %v7986_v27 }
  0xfd   :  { %v7969_v57 = vsel %vm4352_vm0, 4294967295, %v7968_v57  ;;  %vm4372_vm9 = vmor %vm7976_vm4, %vm840_vm11  ;;  %v7982_v61 = vsel %vm7981_vm7, %v7973_v41, 0.0  ;;  %v664_v22 = vadd.f32 %v584_v44, %v7985_v3  ;;  %v7988_v60 = vsel %vm7987_vm2, %v7973_v41, 0.0  ;;  %v8003_v3 = vld [vmem:[#allocation56_spill] sm:$0xff] }
  0xfe   :  { %v7978_v20 = vsel %vm4372_vm9, 4294967295, %v7977_v20  ;;  %v651_v49 = vadd.f32 %v583_v31, %v7982_v61  ;;  %v677_v59 = vadd.f32 %v585_v40, %v7988_v60  ;;  %vm7989_vm11 = vcmp.eq.s32.totalorder %v3693_v0, %v1843_v7 }
  0xff   :  { %vm7990_vm4 = vnez %v7922_v15  ;;  %v7991_v52 = vmov 0  ;;  %vm7994_vm7 = vcmp.eq.s32.totalorder %v3693_v0, %v1853_v9  ;;  %vm7995_vm1 = vnez %v7933_v35  ;;  %v8006_v15 = vld [vmem:[#allocation57_spill] sm:$0xff] }
 0x100   :  { %vm4395_vm10 = vmor %vm7990_vm4, %vm7989_vm11  ;;  %v7996_v44 = vmov 0  ;;  %vm7999_vm2 = vcmp.eq.s32.totalorder %v4224_v25, %v7964_v13  ;;  %vm8000_vm9 = vcmp.eq.s32.totalorder %v4224_v25, %v1618_v28  ;;  %vm8004_vm11 = vnez %v8003_v3 }
 0x101   :  { %v7992_v52 = vsel %vm4395_vm10, 4294967295, %v7991_v52  ;;  %vm4404_vm15 = vmor %vm7995_vm1, %vm7994_vm7  ;;  %v8005_v1 = vsel %vm8004_vm11, %v7973_v41, 0.0  ;;  %vm8007_vm4 = vnez %v8006_v15  ;;  %vm8009_vm7 = vcmp.eq.s32.totalorder %v3693_v0, %v1855_v10 }
 0x102   :  { %7993 = vst [vmem:[#allocation13_spill] sm:$0xff] %v7992_v52  ;;  %v7997_v44 = vsel %vm4404_vm15, 4294967295, %v7996_v44  ;;  %vm4414_vm0 = vmor %vm8000_vm9, %vm7999_vm2  ;;  %v690_v27 = vadd.f32 %v586_v51, %v8005_v1  ;;  %v8008_v35 = vsel %vm8007_vm4, %v7973_v41, 0.0  ;;  %v8010_v31 = vmov 0  ;;  %v8018_v51 = vld [vmem:[#allocation44_spill] sm:$0xff]  ;;  %v8035_v1 = vld [vmem:[#allocation54_spill] sm:$0xff] }
 0x103   :  { %7998 = vst [vmem:[#allocation52_spill] sm:$0xff] %v7997_v44  ;;  %v703_v37 = vadd.f32 %v587_v46, %v8008_v35  ;;  %vm4431_vm1 = vmor %vm4249_vm12, %vm8009_vm7  ;;  %vm8013_vm11 = vcmp.eq.s32.totalorder %v4224_v25, %v7966_v21  ;;  %vm8014_vm4 = vcmp.eq.s32.totalorder %v4224_v25, %v7847_v33  ;;  %vm8019_vm7 = vnez %v8018_v51  ;;  %v8037_v51 = vld [vmem:[#allocation51_spill] sm:$0xff]  ;;  %v8169_v52 = vld [vmem:[#allocation68_spill] sm:$0xff] }
 0x104   :  { %v8011_v31 = vsel %vm4431_vm1, 4294967295, %v8010_v31  ;;  %vm4445_vm15 = vmor %vm8014_vm4, %vm8013_vm11  ;;  %v8020_v46 = vsel %vm8019_vm7, %v7973_v41, 0.0  ;;  %vm8021_vm9 = vcmp.eq.s32.totalorder %v3693_v0, %v7409_v17  ;;  %v8022_v61 = vmov 0 }
 0x105   :  { %8012 = vst [vmem:[#allocation59_spill] sm:$0xff] %v8011_v31  ;;  %v716_v29 = vadd.f32 %v588_v30, %v8020_v46  ;;  %vm4461_vm2 = vmor %vm4258_vm3, %vm8021_vm9  ;;  %vm8025_vm11 = vcmp.eq.s32.totalorder %v3693_v0, %v7410_v26  ;;  %v8026_v3 = vmov 0  ;;  %vm8029_vm3 = vcmp.eq.s32.totalorder %v4224_v25, %v7975_v53  ;;  %v8033_v30 = vld [vmem:[#allocation42_spill] sm:$0xff] }
 0x106   :  { %v8023_v61 = vsel %vm4461_vm2, 4294967295, %v8022_v61  ;;  %vm4470_vm4 = vmor %vm4275_vm5, %vm8025_vm11  ;;  %vm8030_vm9 = vcmp.eq.s32.totalorder %v4224_v25, %v1630_v32  ;;  %vm8034_vm5 = vnez %v8033_v30  ;;  %vm8038_vm11 = vnez %v8037_v51  ;;  %v8055_v30 = vld [vmem:[#allocation45_spill] sm:$0xff] }
 0x107   :  { %8024 = vst [vmem:[#allocation14_spill] sm:$0xff] %v8023_v61  ;;  %v8027_v3 = vsel %vm4470_vm4, 4294967295, %v8026_v3  ;;  %vm4484_vm2 = vmor %vm8030_vm9, %vm8029_vm3  ;;  %v8036_v15 = vsel %vm8034_vm5, %v8035_v1, 0.0  ;;  %v8039_v46 = vsel %vm8038_vm11, %v7973_v41, 0.0  ;;  %vm8040_vm3 = vcmp.eq.s32.totalorder %v3693_v0, %v1907_v16  ;;  %v8216_v41 = vld [vmem:[#allocation39_spill] sm:$0xff] }
 0x108   :  { %8028 = vst [vmem:[#allocation53_spill] sm:$0xff] %v8027_v3  ;;  %v4495_v35 = vadd.f32 %v638_v5, %v8036_v15  ;;  %v729_v12 = vadd.f32 %v589_v63, %v8039_v46  ;;  %vm4506_vm9 = vmor %vm4292_vm13, %vm8040_vm3  ;;  %vm8044_vm7 = vcmp.eq.s32.totalorder %v3693_v0, %v1920_v18  ;;  %v8045_v5 = vmov 0  ;;  %v8058_v46 = vld [vmem:[#allocation46_spill] sm:$0xff] }
 0x109   :  { %v8042_v11 = vsel %vm4506_vm9, 4294967295, %v8041_v11  ;;  %vm4515_vm5 = vmor %vm4311_vm6, %vm8044_vm7  ;;  %vm8048_vm11 = vcmp.eq.s32.totalorder %v4224_v25, %v7859_v6  ;;  %vm8049_vm12 = vcmp.eq.s32.totalorder %v4224_v25, %v1638_v34  ;;  %vm8053_vm3 = vnez %v8052_v62 }
 0x10a   :  { %8043 = vst [vmem:[#allocation40_spill] sm:$0xff] %v8042_v11  ;;  %v8046_v5 = vsel %vm4515_vm5, 4294967295, %v8045_v5  ;;  %vm4525_vm14 = vmor %vm8049_vm12, %vm8048_vm11  ;;  %v8054_v4 = vsel %vm8053_vm3, %v8035_v1, 0.0  ;;  %vm8056_vm6 = vnez %v8055_v30  ;;  %vm8059_vm12 = vnez %v8058_v46  ;;  %v8080_v46 = vld [vmem:[#allocation49_spill] sm:$0xff] }
 0x10b   :  { %8047 = vst [vmem:[#allocation55_spill] sm:$0xff] %v8046_v5  ;;  %v4535_v63 = vadd.f32 %v651_v49, %v8054_v4  ;;  %v8057_v15 = vsel %vm8056_vm6, %v8035_v1, 0.0  ;;  %v8060_v23 = vsel %vm8059_vm12, %v8035_v1, 0.0  ;;  %vm8061_vm7 = vcmp.eq.s32.totalorder %v3693_v0, %v7380_v2  ;;  %v8244_v11 = vld [vmem:[#allocation29_spill] sm:$0xff] }
 0x10c   :  { %v4541_v51 = vadd.f32 %v664_v22, %v8057_v15  ;;  %v4547_v19 = vadd.f32 %v677_v59, %v8060_v23  ;;  %vm4554_vm11 = vmor %vm4332_vm8, %vm8061_vm7  ;;  %v8062_v49 = vmov 0  ;;  %vm8065_vm3 = vcmp.eq.s32.totalorder %v4224_v25, %v1658_v39  ;;  %v8069_v59 = vld [vmem:[#allocation47_spill] sm:$0xff]  ;;  %v8072_v23 = vld [vmem:[#allocation48_spill] sm:$0xff] }
 0x10d   :  { %v8063_v49 = vsel %vm4554_vm11, 4294967295, %v8062_v49  ;;  %vm8066_vm6 = vcmp.eq.s32.totalorder %v4224_v25, %v1646_v36  ;;  %v8067_v22 = vmov 0  ;;  %vm968_vm12 = vcmp.eq.s32.totalorder %v4224_v25, %v1705_v47 }
 0x10e   :  { %8064 = vst [vmem:[#allocation56_spill] sm:$0xff] %v8063_v49  ;;  %vm4564_vm13 = vmor %vm8066_vm6, %vm8065_vm3  ;;  %vm8070_vm5 = vnez %v8069_v59  ;;  %vm8073_vm8 = vnez %v8072_v23  ;;  %vm8075_vm7 = vcmp.eq.s32.totalorder %v4224_v25, %v1673_v43  ;;  %vm8076_vm3 = vcmp.eq.s32.totalorder %v4224_v25, %v1671_v42 }
 0x10f   :  { %v8068_v22 = vsel %vm4564_vm13, 4294967295, %v8067_v22  ;;  %v8071_v24 = vsel %vm8070_vm5, %v8035_v1, 0.0  ;;  %v8074_v62 = vsel %vm8073_vm8, %v8035_v1, 0.0  ;;  %vm4588_vm6 = vmor %vm8076_vm3, %vm8075_vm7  ;;  %v8077_v30 = vmov 0 }
 0x110   :  { %v4574_v0 = vadd.f32 %v690_v27, %v8071_v24  ;;  %v4580_v4 = vadd.f32 %v703_v37, %v8074_v62  ;;  %v8078_v30 = vsel %vm4588_vm6, 4294967295, %v8077_v30  ;;  %vm969_vm5 = vcmp.eq.s32.totalorder %v4224_v25, %v1707_v48  ;;  %v8079_v27 = vld [vmem:[#allocation5_spill] sm:$0xff]  ;;  %v5062_v24 = vpop.permute.xlu0 %1228 }
 0x111   :  { %v4595_v15 = vadd.s32 40, %v8079_v27  ;;  %vm8081_vm8 = vnez %v8080_v46  ;;  %vm8083_vm6 = vcmp.eq.s32.totalorder %v4224_v25, %v1689_v45  ;;  %vm8084_vm9 = vnez %v7969_v57  ;;  %v4636_v57 = vpop.permute.xlu1 %1233  ;;  %vm4642_vm7 = vmor %vm4414_vm0, %vm969_vm5  ;;  %v8153_v46 = vld [vmem:[#allocation24_spill] sm:$0xff] }
 0x112   :  { %v8082_v37 = vsel %vm8081_vm8, %v8035_v1, 0.0  ;;  %vm4614_vm13 = vmor %vm8084_vm9, %vm8083_vm6  ;;  %vm8090_vm3 = vnez %v7978_v20  ;;  %8093 = vst [vmem:[#allocation57_spill] sm:$0xff] %v4636_v57  ;;  %v8097_v20 = vld [vmem:[#allocation8_spill] sm:$0xff]  ;;  %vm8099_vm6 = vcmp.eq.s32.totalorder %v4224_v25, %v1723_v50  ;;  %vm8102_vm9 = vcmp.eq.s32.totalorder %v4224_v25, %v1737_v54 }
 0x113   :  { %v4601_v59 = vadd.f32 %v716_v29, %v8082_v37  ;;  %v8087_v29 = vld [vmem:[#allocation50_spill] sm:$0xff]  ;;  %vm4628_vm11 = vmor %vm8090_vm3, %vm968_vm12  ;;  %v8103_v40 = vmov 0  ;;  %vm8105_vm3 = vcmp.eq.s32.totalorder %v4595_v15, %v7953_v38  ;;  %v8111_v27 = vmov 0 }
 0x114   :  { %vm8088_vm8 = vnez %v8087_v29  ;;  %v8098_v37 = vld [vmem:[#allocation10_spill] sm:$0xff]  ;;  %vm8114_vm10 = vcmp.eq.s32.totalorder %v4595_v15, %v8097_v20  ;;  %v8124_v44 = vmov 0  ;;  %vm8126_vm4 = vcmp.eq.s32.totalorder %v4595_v15, %v7966_v21 }
 0x115   :  { %v8089_v23 = vsel %vm8088_vm8, %v8035_v1, 0.0  ;;  %v8094_v1 = vld [vmem:[#allocation20_spill] sm:$0xff]  ;;  %vm4657_vm8 = vmor %vm4445_vm15, %vm8099_vm6  ;;  %vm8110_vm6 = vcmp.eq.s32.totalorder %v4224_v25, %v1747_v56  ;;  %vm8113_vm5 = vcmp.eq.s32.totalorder %v4595_v15, %v8098_v37  ;;  %vm8127_vm1 = vcmp.eq.s32.totalorder %v4595_v15, %v7847_v33  ;;  %v8214_v29 = vld [vmem:[#allocation26_spill] sm:$0xff] }
 0x116   :  { %v4622_v62 = vadd.f32 %v729_v12, %v8089_v23  ;;  %vm4674_vm15 = vmor %vm4484_vm2, %vm8102_vm9  ;;  %vm8106_vm2 = vcmp.eq.s32.totalorder %v4595_v15, %v7808_v55  ;;  %v8134_v3 = vmov 0  ;;  %v8142_v31 = vmov 0 }
 0x117   :  { %v8104_v40 = vsel %vm4674_vm15, 4294967295, %v8103_v40  ;;  %vm4692_vm9 = vmor %vm8106_vm2, %vm8105_vm3  ;;  %vm8117_vm2 = vcmp.eq.s32.totalorder %v4595_v15, %v7964_v13  ;;  %v8146_v5 = vmov 0  ;;  %v8155_v49 = vmov 0 }
 0x118   :  { %vm4707_vm0 = vmor %vm4525_vm14, %vm8110_vm6  ;;  %vm8122_vm6 = vcmp.eq.s32.totalorder %v4224_v25, %v1755_v58  ;;  %vm8123_vm14 = vnez %v8068_v22  ;;  %v8221_v23 = vmov 0 }
 0x119   :  { %v8112_v27 = vsel %vm4707_vm0, 4294967295, %v8111_v27  ;;  %vm4723_vm15 = vmor %vm8114_vm10, %vm8113_vm5  ;;  %vm8118_vm10 = vcmp.eq.s32.totalorder %v4595_v15, %v1618_v28 }
 0x11a   :  { %vm4742_vm5 = vmor %vm8118_vm10, %vm8117_vm2  ;;  %vm8132_vm2 = vcmp.eq.s32.totalorder %v4224_v25, %v8094_v1  ;;  %vm8133_vm10 = vnez %v8078_v30  ;;  %v4844_v30 = vadd.s32 64, %v8153_v46  ;;  %v8166_v46 = vld [vmem:[#allocation67_spill] sm:$0xff] }
 0x11b   :  { %vm4757_vm3 = vmor %vm8123_vm14, %vm8122_vm6  ;;  %vm8136_vm14 = vcmp.eq.s32.totalorder %v4595_v15, %v7975_v53  ;;  %vm8137_vm6 = vcmp.eq.s32.totalorder %v4595_v15, %v1630_v32 }
 0x11c   :  { %v8125_v44 = vsel %vm4757_vm3, 4294967295, %v8124_v44  ;;  %vm4773_vm0 = vmor %vm8127_vm1, %vm8126_vm4  ;;  %vm8141_vm1 = vcmp.eq.s32.totalorder %v4224_v25, %v1843_v7 }
 0x11d   :  { %vm4788_vm12 = vmor %vm8133_vm10, %vm8132_vm2  ;;  %vm8149_vm2 = vcmp.eq.s32.totalorder %v4595_v15, %v7859_v6  ;;  %vm8150_vm10 = vcmp.eq.s32.totalorder %v4595_v15, %v1638_v34 }
 0x11e   :  { %v8135_v3 = vsel %vm4788_vm12, 4294967295, %v8134_v3  ;;  %vm4802_vm3 = vmor %vm8137_vm6, %vm8136_vm14  ;;  %vm8145_vm14 = vcmp.eq.s32.totalorder %v4224_v25, %v1853_v9 }
 0x11f   :  { %vm4816_vm4 = vmor %vm4614_vm13, %vm8141_vm1 }
 0x120   :  { %v8143_v31 = vsel %vm4816_vm4, 4294967295, %v8142_v31  ;;  %vm4825_vm6 = vmor %vm4628_vm11, %vm8145_vm14  ;;  %vm8154_vm11 = vcmp.eq.s32.totalorder %v4224_v25, %v1855_v10 }
 0x121   :  { %8144 = vst [vmem:[#allocation44_spill] sm:$0xff] %v8143_v31  ;;  %v8147_v5 = vsel %vm4825_vm6, 4294967295, %v8146_v5  ;;  %vm4835_vm12 = vmor %vm8150_vm10, %vm8149_vm2  ;;  %vm8158_vm2 = vcmp.eq.s32.totalorder %v4595_v15, %v1658_v39  ;;  %vm8159_vm10 = vcmp.eq.s32.totalorder %v4595_v15, %v1646_v36  ;;  %vm8167_vm6 = vnez %v8166_v46 }
 0x122   :  { %8148 = vst [vmem:[#allocation42_spill] sm:$0xff] %v8147_v5  ;;  %vm4851_vm14 = vmor %vm4642_vm7, %vm8154_vm11  ;;  %v8168_v61 = vsel %vm8167_vm6, %v4083_v14, 0.0  ;;  %vm8170_vm11 = vnez %v8169_v52  ;;  %v8172_v5 = vld [vmem:[#allocation69_spill] sm:$0xff]  ;;  %v8176_v46 = vmov 0  ;;  %v8180_v52 = vmov 0 }
 0x123   :  { %v8156_v49 = vsel %vm4851_vm14, 4294967295, %v8155_v49  ;;  %vm4861_vm13 = vmor %vm8159_vm10, %vm8158_vm2  ;;  %vm8162_vm14 = vcmp.eq.s32.totalorder %v4595_v15, %v1673_v43  ;;  %vm8163_vm2 = vcmp.eq.s32.totalorder %v4595_v15, %v1671_v42  ;;  %v640_v57 = vadd.f32 %v4495_v35, %v8168_v61  ;;  %v8183_v61 = vld [vmem:[#allocation70_spill] sm:$0xff] }
 0x124   :  { %8157 = vst [vmem:[#allocation54_spill] sm:$0xff] %v8156_v49  ;;  %vm4879_vm10 = vmor %vm8163_vm2, %vm8162_vm14  ;;  %v8171_v49 = vsel %vm8170_vm11, %v4083_v14, 0.0  ;;  %vm8173_vm14 = vnez %v8172_v5  ;;  %vm8175_vm2 = vcmp.eq.s32.totalorder %v4224_v25, %v7409_v17  ;;  %vm8179_vm11 = vcmp.eq.s32.totalorder %v4595_v15, %v1689_v45  ;;  %v8186_v5 = vld [vmem:[#allocation71_spill] sm:$0xff] }
 0x125   :  { %v653_v43 = vadd.f32 %v4535_v63, %v8171_v49  ;;  %v8174_v31 = vsel %vm8173_vm14, %v4083_v14, 0.0  ;;  %vm4905_vm6 = vmor %vm4657_vm8, %vm8175_vm2  ;;  %vm8184_vm14 = vnez %v8183_v61  ;;  %vm8187_vm8 = vnez %v8186_v5  ;;  %v8189_v49 = vld [vmem:[#allocation72_spill] sm:$0xff]  ;;  %v8226_v5 = vld [vmem:[#allocation27_spill] sm:$0xff] }
 0x126   :  { %v666_v39 = vadd.f32 %v4541_v51, %v8174_v31  ;;  %v8177_v46 = vsel %vm4905_vm6, 4294967295, %v8176_v46  ;;  %vm4914_vm1 = vmor %vm4692_vm9, %vm8179_vm11  ;;  %v8185_v31 = vsel %vm8184_vm14, %v4083_v14, 0.0  ;;  %v8188_v63 = vsel %vm8187_vm8, %v4083_v14, 0.0 }
 0x127   :  { %8178 = vst [vmem:[#allocation51_spill] sm:$0xff] %v8177_v46  ;;  %v8181_v52 = vsel %vm4914_vm1, 4294967295, %v8180_v52  ;;  %v679_v35 = vadd.f32 %v4547_v19, %v8185_v31  ;;  %v692_v51 = vadd.f32 %v4574_v0, %v8188_v63  ;;  %vm8190_vm2 = vnez %v8189_v49  ;;  %v8192_v46 = vld [vmem:[#allocation15_spill] sm:$0xff]  ;;  %v8198_v0 = vld [vmem:[#allocation25_spill] sm:$0xff]  ;;  %v8230_v49 = vld [vmem:[#allocation28_spill] sm:$0xff] }
 0x128   :  { %8182 = vst [vmem:[#allocation43_spill] sm:$0xff] %v8181_v52  ;;  %v8191_v60 = vsel %vm8190_vm2, %v4083_v14, 0.0  ;;  %vm8193_vm9 = vnez %v8192_v46  ;;  %vm8195_vm11 = vcmp.eq.s32.totalorder %v4595_v15, %v1705_v47  ;;  %v8196_v19 = vmov 0 }
 0x129   :  { %v705_v8 = vadd.f32 %v4580_v4, %v8191_v60  ;;  %v8194_v61 = vsel %vm8193_vm9, %v4083_v14, 0.0  ;;  %vm4943_vm14 = vmor %vm4723_vm15, %vm8195_vm11  ;;  %vm8199_vm2 = vnez %v8198_v0  ;;  %vm8201_vm15 = vcmp.eq.s32.totalorder %v4595_v15, %v1707_v48 }
 0x12a   :  { %v718_v52 = vadd.f32 %v4601_v59, %v8194_v61  ;;  %v8197_v19 = vsel %vm4943_vm14, 4294967295, %v8196_v19  ;;  %v8200_v4 = vsel %vm8199_vm2, %v4083_v14, 0.0  ;;  %vm4963_vm11 = vmor %vm4742_vm5, %vm8201_vm15  ;;  %vm8204_vm14 = vcmp.eq.s32.totalorder %v4224_v25, %v7410_v26  ;;  %v8438_v59 = vld [vmem:[#allocation37_spill] sm:$0xff] }
 0x12b   :  { %v731_v46 = vadd.f32 %v4622_v62, %v8200_v4  ;;  %vm8205_vm5 = vnez %v8104_v40  ;;  %v8206_v14 = vmov 0  ;;  %vm8208_vm2 = vcmp.eq.s32.totalorder %v4595_v15, %v1723_v50 }
 0x12c   :  { %vm4980_vm15 = vmor %vm8205_vm5, %vm8204_vm14  ;;  %v8209_v62 = vmov 0  ;;  %vm8211_vm9 = vcmp.eq.s32.totalorder %v4595_v15, %v1737_v54  ;;  %v8212_v40 = vmov 0  ;;  %vm8220_vm14 = vnez %v8112_v27 }
 0x12d   :  { %v8207_v14 = vsel %vm4980_vm15, 4294967295, %v8206_v14  ;;  %vm4989_vm8 = vmor %vm4773_vm0, %vm8208_vm2  ;;  %vm8215_vm0 = vnez %v8214_v29  ;;  %v8242_v0 = vmov 0  ;;  %vm8291_vm15 = vcmp.eq.s32.totalorder %v4844_v30, %v7975_v53 }
 0x12e   :  { %v8210_v62 = vsel %vm4989_vm8, 4294967295, %v8209_v62  ;;  %vm4998_vm7 = vmor %vm4802_vm3, %vm8211_vm9  ;;  %v8217_v22 = vsel %vm8215_vm0, %v8216_v41, 0.0  ;;  %vm8219_vm9 = vcmp.eq.s32.totalorder %v4224_v25, %v1907_v16  ;;  %vm8223_vm0 = vcmp.eq.s32.totalorder %v4595_v15, %v1747_v56 }
 0x12f   :  { %v8213_v40 = vsel %vm4998_vm7, 4294967295, %v8212_v40  ;;  %v5010_v31 = vadd.f32 %v640_v57, %v8217_v22  ;;  %vm5021_vm7 = vmor %vm8220_vm14, %vm8219_vm9  ;;  %v8224_v57 = vmov 0  ;;  %vm8227_vm3 = vnez %v8226_v5  ;;  %v8248_v22 = vld [vmem:[#allocation30_spill] sm:$0xff] }
 0x130   :  { %v8222_v23 = vsel %vm5021_vm7, 4294967295, %v8221_v23  ;;  %vm5030_vm5 = vmor %vm4835_vm12, %vm8223_vm0  ;;  %v8228_v27 = vsel %vm8227_vm3, %v8216_v41, 0.0  ;;  %vm8231_vm14 = vnez %v8230_v49  ;;  %vm8234_vm0 = vcmp.eq.s32.totalorder %v4844_v30, %v7953_v38 }
 0x131   :  { %8218 = vst [vmem:[#allocation45_spill] sm:$0xff] %v5010_v31  ;;  %v8225_v57 = vsel %vm5030_vm5, 4294967295, %v8224_v57  ;;  %v5040_v63 = vadd.f32 %v653_v43, %v8228_v27  ;;  %v8232_v60 = vsel %vm8231_vm14, %v8216_v41, 0.0  ;;  %vm8235_vm3 = vcmp.eq.s32.totalorder %v4844_v30, %v7808_v55  ;;  %v8261_v27 = vld [vmem:[#allocation21_spill] sm:$0xff]  ;;  %v8307_v31 = vld [vmem:[#allocation32_spill] sm:$0xff] }
 0x132   :  { %v5046_v61 = vadd.f32 %v666_v39, %v8232_v60  ;;  %vm5058_vm2 = vmor %vm8235_vm3, %vm8234_vm0  ;;  %vm8238_vm14 = vcmp.eq.s32.totalorder %v4595_v15, %v1755_v58  ;;  %v8239_v39 = vmov 0  ;;  %vm8241_vm9 = vcmp.eq.s32.totalorder %v4595_v15, %v8094_v1 }
 0x133   :  { %8229 = vst [vmem:[#allocation46_spill] sm:$0xff] %v5040_v63  ;;  %vm5069_vm12 = vmor %vm4861_vm13, %vm8238_vm14  ;;  %vm8245_vm13 = vnez %v8244_v11  ;;  %vm8249_vm14 = vnez %v8248_v22  ;;  %vm8252_vm5 = vcmp.eq.s32.totalorder %v4844_v30, %v8098_v37  ;;  %v8265_v11 = vld [vmem:[#allocation22_spill] sm:$0xff]  ;;  %v8331_v43 = vmov 0 }
 0x134   :  { %8233 = vst [vmem:[#allocation47_spill] sm:$0xff] %v5046_v61  ;;  %v8240_v39 = vsel %vm5069_vm12, 4294967295, %v8239_v39  ;;  %vm5078_vm0 = vmor %vm4879_vm10, %vm8241_vm9  ;;  %v8246_v4 = vsel %vm8245_vm13, %v8216_v41, 0.0  ;;  %v8250_v12 = vsel %vm8249_vm14, %v8216_v41, 0.0  ;;  %vm8253_vm13 = vcmp.eq.s32.totalorder %v4844_v30, %v8097_v20  ;;  %v8305_v61 = vld [vmem:[#allocation31_spill] sm:$0xff] }
 0x135   :  { %v8243_v0 = vsel %vm5078_vm0, 4294967295, %v8242_v0  ;;  %v5090_v29 = vadd.f32 %v679_v35, %v8246_v4  ;;  %v5096_v5 = vadd.f32 %v692_v51, %v8250_v12  ;;  %vm5108_vm3 = vmor %vm8253_vm13, %vm8252_vm5  ;;  %vm8256_vm14 = vcmp.eq.s32.totalorder %v4224_v25, %v1920_v18 }
 0x136   :  { %vm8257_vm0 = vnez %v8125_v44  ;;  %v8258_v51 = vmov 0  ;;  %vm8262_vm10 = vnez %v8261_v27  ;;  %vm8266_vm5 = vnez %v8265_v11 }
 0x137   :  { %8247 = vst [vmem:[#allocation48_spill] sm:$0xff] %v5090_v29  ;;  %vm5117_vm12 = vmor %vm8257_vm0, %vm8256_vm14  ;;  %v8263_v49 = vsel %vm8262_vm10, %v8216_v41, 0.0  ;;  %v8267_v4 = vsel %vm8266_vm5, %v8216_v41, 0.0  ;;  %vm860_vm0 = vcmp.eq.s32.totalorder %v4844_v30, %v7859_v6  ;;  %vm8269_vm14 = vcmp.eq.s32.totalorder %v4844_v30, %v7964_v13 }
 0x138   :  { %8251 = vst [vmem:[#allocation49_spill] sm:$0xff] %v5096_v5  ;;  %v8259_v51 = vsel %vm5117_vm12, 4294967295, %v8258_v51  ;;  %v5125_v60 = vadd.f32 %v705_v8, %v8263_v49  ;;  %v5131_v22 = vadd.f32 %v718_v52, %v8267_v4  ;;  %vm8270_vm10 = vcmp.eq.s32.totalorder %v4844_v30, %v1618_v28  ;;  %v8278_v8 = vld [vmem:[#allocation41_spill] sm:$0xff]  ;;  %v8282_v49 = vld [vmem:[#allocation16_spill] sm:$0xff]  ;;  %v8290_v4 = vld [vmem:[#allocation18_spill] sm:$0xff] }
 0x139   :  { %8260 = vst [vmem:[#allocation50_spill] sm:$0xff] %v8259_v51  ;;  %vm5143_vm9 = vmor %vm8270_vm10, %vm8269_vm14  ;;  %vm8273_vm5 = vcmp.eq.s32.totalorder %v4224_v25, %v7380_v2  ;;  %vm8274_vm12 = vnez %v8135_v3  ;;  %v8275_v52 = vmov 0  ;;  %vm8279_vm13 = vnez %v8278_v8  ;;  %v8295_v3 = vld [vmem:[#allocation54_spill] sm:$0xff] }
 0x13a   :  { %8264 = vst [vmem:[#allocation20_spill] sm:$0xff] %v5125_v60  ;;  %vm5152_vm7 = vmor %vm8274_vm12, %vm8273_vm5  ;;  %v8280_v12 = vsel %vm8279_vm13, %v8216_v41, 0.0  ;;  %vm797_vm14 = vcmp.eq.s32.totalorder %v4844_v30, %v1646_v36  ;;  %vm861_vm8 = vcmp.eq.s32.totalorder %v4844_v30, %v8282_v49  ;;  %vm8283_vm12 = vcmp.eq.s32.totalorder %v4844_v30, %v7966_v21  ;;  %v8288_v41 = vld [vmem:[#allocation42_spill] sm:$0xff] }
 0x13b   :  { %8268 = vst [vmem:[#allocation24_spill] sm:$0xff] %v5131_v22  ;;  %v8276_v52 = vsel %vm5152_vm7, 4294967295, %v8275_v52  ;;  %v5160_v27 = vadd.f32 %v731_v46, %v8280_v12  ;;  %vm8284_vm5 = vcmp.eq.s32.totalorder %v4844_v30, %v7847_v33  ;;  %v8285_v25 = vmov 0 }
 0x13c   :  { %8277 = vst [vmem:[#allocation67_spill] sm:$0xff] %v8276_v52  ;;  %vm5174_vm7 = vmor %vm8284_vm5, %vm8283_vm12  ;;  %v1272_v46 = vsel %vm4816_vm4, %v5062_v24, 0.0  ;;  %vm8289_vm13 = vnez %v8288_v41  ;;  %vm8292_vm12 = vcmp.eq.s32.totalorder %v4844_v30, %v1630_v32  ;;  %v8293_v8 = vmov 0 }
 0x13d   :  { %8281 = vst [vmem:[#allocation68_spill] sm:$0xff] %v5160_v27  ;;  %v8286_v25 = vsel %vm5174_vm7, 4294967295, %v8285_v25  ;;  %v1273_v11 = vsel %vm8289_vm13, %v5062_v24, 0.0  ;;  %vm5192_vm5 = vmor %vm8292_vm12, %vm8291_vm15  ;;  %v5197_v12 = vadd.s32 64, %v4595_v15  ;;  %vm8296_vm4 = vnez %v8295_v3  ;;  %v8302_v3 = vld [vmem:[#allocation5_spill] sm:$0xff] }
 0x13e   :  { %v8294_v8 = vsel %vm5192_vm5, 4294967295, %v8293_v8  ;;  %v1274_v41 = vsel %vm8296_vm4, %v5062_v24, 0.0  ;;  %vm8297_vm13 = vcmp.eq.s32.totalorder %v4844_v30, %v1638_v34  ;;  %vm983_vm15 = vcmp.eq.s32.totalorder %v4844_v30, %v1689_v45  ;;  %vm5215_vm7 = vmor %vm797_vm14, %vm861_vm8 }
 0x13f   :  { %vm5205_vm10 = vmor %vm8297_vm13, %vm860_vm0  ;;  %vm984_vm12 = vcmp.eq.s32.totalorder %v4844_v30, %v1705_v47  ;;  %v5226_v60 = vadd.s32 48, %v8302_v3  ;;  %v1275_v29 = vsel %vm4905_vm6, %v5062_v24, 0.0  ;;  %v5232_v63 = vadd.f32 %v8305_v61, %v1272_v46 }
 0x140   :  { %v5235_v52 = vadd.f32 %v8307_v31, %v1273_v11  ;;  %vm8309_vm8 = vcmp.eq.s32.totalorder %v4595_v15, %v1843_v7  ;;  %vm8313_vm13 = vcmp.eq.s32.totalorder %v4844_v30, %v8290_v4  ;;  %vm8314_vm6 = vcmp.eq.s32.totalorder %v4844_v30, %v1671_v42  ;;  %v8317_v31 = vld [vmem:[#allocation33_spill] sm:$0xff] }
 0x141   :  { %8303 = vst [vmem:[#allocation69_spill] sm:$0xff] %v5226_v60  ;;  %vm5242_vm14 = vmor %vm4914_vm1, %vm8309_vm8  ;;  %v5259_v5 = vadd.f32 %v8317_v31, %v1274_v41  ;;  %vm8319_vm1 = vcmp.eq.s32.totalorder %v4595_v15, %v1853_v9  ;;  %vm8320_vm8 = vnez %v8197_v19  ;;  %v8339_v44 = vmov 0  ;;  %v8357_v41 = vld [vmem:[#allocation34_spill] sm:$0xff] }
 0x142   :  { %8306 = vst [vmem:[#allocation70_spill] sm:$0xff] %v5232_v63  ;;  %vm5252_vm0 = vmor %vm8314_vm6, %vm8313_vm13  ;;  %vm8323_vm13 = vcmp.eq.s32.totalorder %v4595_v15, %v1855_v10  ;;  %v8347_v11 = vmov 0  ;;  %v5388_v3 = vadd.f32 %v8357_v41, %v1275_v29  ;;  %v8361_v22 = vmov 0  ;;  %v8387_v31 = vld [vmem:[#allocation50_spill] sm:$0xff] }
 0x143   :  { %8308 = vst [vmem:[#allocation71_spill] sm:$0xff] %v5235_v52  ;;  %vm5266_vm5 = vmor %vm8320_vm8, %vm8319_vm1  ;;  %vm8330_vm8 = vcmp.eq.s32.totalorder %v4844_v30, %v1707_v48  ;;  %v8372_v29 = vmov 0  ;;  %v8376_v61 = vmov 0  ;;  %v8393_v52 = vmov 0 }
 0x144   :  { %8318 = vst [vmem:[#allocation72_spill] sm:$0xff] %v5259_v5  ;;  %vm5275_vm6 = vmor %vm4963_vm11, %vm8323_vm13  ;;  %v8411_v63 = vmov 0  ;;  %v8432_v46 = vmov 0  ;;  %v8436_v19 = vmov 0  ;;  %v8451_v35 = vmov 0 }
 0x145   :  { %vm5286_vm1 = vmor %vm5058_vm2, %vm983_vm15  ;;  %vm8341_vm2 = vcmp.eq.s32.totalorder %v4844_v30, %v1747_v56  ;;  %8358 = vst [vmem:[#allocation15_spill] sm:$0xff] %v5388_v3  ;;  %v8389_v3 = vld [vmem:[#allocation35_spill] sm:$0xff] }
 0x146   :  { %vm5295_vm11 = vmor %vm5108_vm3, %vm984_vm12  ;;  %vm8333_vm3 = vcmp.eq.s32.totalorder %v4844_v30, %v1723_v50  ;;  %vm8334_vm12 = vnez %v8286_v25  ;;  %v8342_v25 = vmov 0 }
 0x147   :  { %vm5304_vm13 = vmor %vm5143_vm9, %vm8330_vm8  ;;  %vm8337_vm9 = vcmp.eq.s32.totalorder %v4844_v30, %v1737_v54  ;;  %vm8338_vm8 = vnez %v8294_v8  ;;  %v8351_v8 = vmov 0 }
 0x148   :  { %v8332_v43 = vsel %vm5304_vm13, 4294967295, %v8331_v43  ;;  %vm5317_vm4 = vmor %vm8334_vm12, %vm8333_vm3  ;;  %vm8349_vm12 = vcmp.eq.s32.totalorder %v4595_v15, %v7410_v26  ;;  %vm8350_vm3 = vnez %v8213_v40 }
 0x149   :  { %vm5326_vm13 = vmor %vm8338_vm8, %vm8337_vm9 }
 0x14a   :  { %v8340_v44 = vsel %vm5326_vm13, 4294967295, %v8339_v44  ;;  %vm5335_vm15 = vmor %vm5205_vm10, %vm8341_vm2  ;;  %vm8344_vm13 = vnez %v8207_v14  ;;  %vm8345_vm10 = vcmp.eq.s32.totalorder %v4595_v15, %v7409_v17  ;;  %vm8346_vm2 = vnez %v8210_v62 }
 0x14b   :  { %v8343_v25 = vsel %vm5335_vm15, 4294967295, %v8342_v25  ;;  %v1276_v27 = vsel %vm8344_vm13, %v5062_v24, 0.0  ;;  %vm5355_vm15 = vmor %vm8346_vm2, %vm8345_vm10  ;;  %vm8353_vm13 = vcmp.eq.s32.totalorder %v4844_v30, %v1755_v58  ;;  %v5378_v62 = vadd.s32 64, %v5226_v60 }
 0x14c   :  { %v8348_v11 = vsel %vm5355_vm15, 4294967295, %v8347_v11  ;;  %vm5364_vm9 = vmor %vm8350_vm3, %vm8349_vm12  ;;  %vm8356_vm12 = vnez %v8222_v23  ;;  %vm8360_vm2 = vnez %v8225_v57  ;;  %vm8363_vm10 = vcmp.eq.s32.totalorder %v4844_v30, %v8094_v1 }
 0x14d   :  { %v8352_v8 = vsel %vm5364_vm9, 4294967295, %v8351_v8  ;;  %vm5373_vm8 = vmor %vm5215_vm7, %vm8353_vm13  ;;  %v1277_v40 = vsel %vm8356_vm12, %v5062_v24, 0.0  ;;  %vm8359_vm7 = vcmp.eq.s32.totalorder %v4595_v15, %v1907_v16  ;;  %v8364_v23 = vmov 0 }
 0x14e   :  { %vm5395_vm13 = vmor %vm8360_vm2, %vm8359_vm7  ;;  %vm8366_vm7 = vcmp.eq.s32.totalorder %v5197_v12, %v7953_v38  ;;  %vm8367_vm2 = vcmp.eq.s32.totalorder %v5197_v12, %v7808_v55  ;;  %vm8374_vm12 = vcmp.eq.s32.totalorder %v4595_v15, %v7380_v2  ;;  %vm8375_vm9 = vnez %v8243_v0 }
 0x14f   :  { %v8362_v22 = vsel %vm5395_vm13, 4294967295, %v8361_v22  ;;  %vm5404_vm3 = vmor %vm5252_vm0, %vm8363_vm10  ;;  %vm8370_vm0 = vcmp.eq.s32.totalorder %v4595_v15, %v1920_v18  ;;  %vm8371_vm10 = vnez %v8240_v39  ;;  %v8378_v39 = vld [vmem:[#allocation16_spill] sm:$0xff]  ;;  %v8381_v15 = vmov 0 }
 0x150   :  { %v8365_v23 = vsel %vm5404_vm3, 4294967295, %v8364_v23  ;;  %vm5418_vm13 = vmor %vm8367_vm2, %vm8366_vm7  ;;  %vm8383_vm7 = vcmp.eq.s32.totalorder %v5197_v12, %v7964_v13  ;;  %vm8384_vm2 = vcmp.eq.s32.totalorder %v5197_v12, %v1618_v28  ;;  %v8385_v0 = vmov 0 }
 0x151   :  { %vm5427_vm3 = vmor %vm8371_vm10, %vm8370_vm0  ;;  %vm8388_vm10 = vnez %v8387_v31  ;;  %v5472_v5 = vadd.f32 %v8389_v3, %v1276_v27  ;;  %v8395_v31 = vld [vmem:[#allocation67_spill] sm:$0xff]  ;;  %v8399_v3 = vmov 0  ;;  %v8484_v57 = vmov 0 }
 0x152   :  { %v8373_v29 = vsel %vm5427_vm3, 4294967295, %v8372_v29  ;;  %vm5436_vm15 = vmor %vm8375_vm9, %vm8374_vm12  ;;  %vm8379_vm3 = vcmp.eq.s32.totalorder %v5197_v12, %v8098_v37  ;;  %vm8380_vm9 = vcmp.eq.s32.totalorder %v5197_v12, %v8097_v20  ;;  %v1278_v41 = vsel %vm8388_vm10, %v5062_v24, 0.0 }
 0x153   :  { %v8377_v61 = vsel %vm5436_vm15, 4294967295, %v8376_v61  ;;  %vm5454_vm12 = vmor %vm8380_vm9, %vm8379_vm3  ;;  %8390 = vst [vmem:[#allocation25_spill] sm:$0xff] %v5472_v5  ;;  %vm8396_vm10 = vnez %v8395_v31  ;;  %vm8397_vm15 = vcmp.eq.s32.totalorder %v5197_v12, %v7975_v53  ;;  %v8403_v31 = vmov 0 }
 0x154   :  { %v8382_v15 = vsel %vm5454_vm12, 4294967295, %v8381_v15  ;;  %vm5464_vm0 = vmor %vm8384_vm2, %vm8383_vm7  ;;  %vm8391_vm12 = vcmp.eq.s32.totalorder %v5197_v12, %v7966_v21  ;;  %vm8392_vm7 = vcmp.eq.s32.totalorder %v5197_v12, %v7847_v33  ;;  %v1279_v27 = vsel %vm8396_vm10, %v5062_v24, 0.0  ;;  %v5507_v24 = vpop.permute.xlu1 %561 }
 0x155   :  { %v8386_v0 = vsel %vm5464_vm0, 4294967295, %v8385_v0  ;;  %vm5484_vm2 = vmor %vm8392_vm7, %vm8391_vm12  ;;  %vm8398_vm12 = vcmp.eq.s32.totalorder %v5197_v12, %v1630_v32  ;;  %vm8405_vm10 = vcmp.eq.s32.totalorder %v5197_v12, %v8378_v39  ;;  %vm8406_vm3 = vcmp.eq.s32.totalorder %v5197_v12, %v1646_v36 }
 0x156   :  { %v8394_v52 = vsel %vm5484_vm2, 4294967295, %v8393_v52  ;;  %vm5503_vm7 = vmor %vm8398_vm12, %vm8397_vm15  ;;  %vm8401_vm15 = vcmp.eq.s32.totalorder %v5197_v12, %v7859_v6  ;;  %vm8402_vm12 = vcmp.eq.s32.totalorder %v5197_v12, %v1638_v34  ;;  %v8407_v5 = vmov 0 }
 0x157   :  { %v8400_v3 = vsel %vm5503_vm7, 4294967295, %v8399_v3  ;;  %vm5523_vm7 = vmor %vm8402_vm12, %vm8401_vm15  ;;  %v614_v39 = vsel %vm5242_vm14, %v5507_v24, 0.0  ;;  %vm8420_vm2 = vcmp.eq.s32.totalorder %v5378_v62, %v8098_v37  ;;  %v616_v49 = vsel %vm5275_vm6, %v5507_v24, 0.0 }
 0x158   :  { %v8404_v31 = vsel %vm5523_vm7, 4294967295, %v8403_v31  ;;  %vm5533_vm9 = vmor %vm8406_vm3, %vm8405_vm10  ;;  %vm8409_vm7 = vcmp.eq.s32.totalorder %v5197_v12, %v8290_v4  ;;  %vm8410_vm3 = vcmp.eq.s32.totalorder %v5197_v12, %v1671_v42  ;;  %vm8424_vm15 = vcmp.eq.s32.totalorder %v4844_v30, %v1843_v7 }
 0x159   :  { %v8408_v5 = vsel %vm5533_vm9, 4294967295, %v8407_v5  ;;  %vm5551_vm10 = vmor %vm8410_vm3, %vm8409_vm7  ;;  %vm8414_vm9 = vcmp.eq.s32.totalorder %v5378_v62, %v7953_v38  ;;  %vm8415_vm7 = vcmp.eq.s32.totalorder %v5378_v62, %v7808_v55  ;;  %vm8430_vm6 = vcmp.eq.s32.totalorder %v4844_v30, %v1855_v10 }
 0x15a   :  { %v8412_v63 = vsel %vm5551_vm10, 4294967295, %v8411_v63  ;;  %vm5569_vm3 = vmor %vm8415_vm7, %vm8414_vm9  ;;  %vm8421_vm9 = vcmp.eq.s32.totalorder %v5378_v62, %v8097_v20  ;;  %vm8431_vm14 = vnez %v8332_v43  ;;  %v8440_v43 = vld [vmem:[#allocation38_spill] sm:$0xff] }
 0x15b   :  { %8413 = vst [vmem:[#allocation26_spill] sm:$0xff] %v8412_v63  ;;  %v8418_v63 = vld [vmem:[#allocation36_spill] sm:$0xff]  ;;  %vm5589_vm7 = vmor %vm8421_vm9, %vm8420_vm2  ;;  %vm8427_vm9 = vcmp.eq.s32.totalorder %v4844_v30, %v1853_v9  ;;  %v5644_v37 = vadd.f32 %v8440_v43, %v1279_v27 }
 0x15c   :  { %v5574_v4 = vadd.f32 %v8418_v63, %v1277_v40  ;;  %v615_v63 = vsel %vm5266_vm5, %v5507_v24, 0.0  ;;  %vm5606_vm2 = vmor %vm5286_vm1, %vm8424_vm15  ;;  %vm8434_vm1 = vcmp.eq.s32.totalorder %v5378_v62, %v7964_v13  ;;  %vm8435_vm15 = vcmp.eq.s32.totalorder %v5378_v62, %v1618_v28 }
 0x15d   :  { %vm5615_vm5 = vmor %vm5295_vm11, %vm8427_vm9  ;;  %8441 = vst [vmem:[#allocation28_spill] sm:$0xff] %v5644_v37  ;;  %vm8449_vm11 = vcmp.eq.s32.totalorder %v4844_v30, %v1907_v16  ;;  %v8466_v37 = vmov 0 }
 0x15e   :  { %8419 = vst [vmem:[#allocation39_spill] sm:$0xff] %v5574_v4  ;;  %vm5624_vm12 = vmor %vm8431_vm14, %vm8430_vm6  ;;  %v5641_v4 = vadd.f32 %v8438_v59, %v1278_v41  ;;  %vm8442_vm14 = vcmp.eq.s32.totalorder %v4844_v30, %v7409_v17  ;;  %vm8445_vm6 = vcmp.eq.s32.totalorder %v4844_v30, %v7410_v26  ;;  %v8447_v41 = vmov 0  ;;  %v8462_v59 = vld [vmem:[#allocation45_spill] sm:$0xff] }
 0x15f   :  { %v8433_v46 = vsel %vm5624_vm12, 4294967295, %v8432_v46  ;;  %vm5634_vm0 = vmor %vm8435_vm15, %vm8434_vm1  ;;  %vm8446_vm1 = vnez %v8340_v44  ;;  %v8454_v44 = vmov 0  ;;  %v5703_v43 = vadd.f32 %v8462_v59, %v614_v39  ;;  %v8471_v59 = vld [vmem:[#allocation47_spill] sm:$0xff] }
 0x160   :  { %v8437_v19 = vsel %vm5634_vm0, 4294967295, %v8436_v19  ;;  %8439 = vst [vmem:[#allocation27_spill] sm:$0xff] %v5641_v4  ;;  %vm5651_vm9 = vmor %vm5317_vm4, %vm8442_vm14  ;;  %vm8450_vm0 = vnez %v8343_v25  ;;  %vm8453_vm4 = vcmp.eq.s32.totalorder %v4844_v30, %v1920_v18  ;;  %v8458_v25 = vmov 0 }
 0x161   :  { %vm5660_vm15 = vmor %vm8446_vm1, %vm8445_vm6  ;;  %vm8456_vm6 = vcmp.eq.s32.totalorder %v5378_v62, %v7966_v21  ;;  %vm8457_vm1 = vcmp.eq.s32.totalorder %v5378_v62, %v7847_v33  ;;  %8463 = vst [vmem:[#allocation29_spill] sm:$0xff] %v5703_v43  ;;  %v5724_v43 = vadd.f32 %v8471_v59, %v616_v49  ;;  %v8475_v4 = vmov 0 }
 0x162   :  { %v8448_v41 = vsel %vm5660_vm15, 4294967295, %v8447_v41  ;;  %vm5669_vm12 = vmor %vm8450_vm0, %vm8449_vm11  ;;  %vm8468_vm11 = vnez %v8362_v22  ;;  %v8478_v22 = vmov 0 }
 0x163   :  { %v8452_v35 = vsel %vm5669_vm12, 4294967295, %v8451_v35  ;;  %vm5678_vm14 = vmor %vm5373_vm8, %vm8453_vm4  ;;  %vm8460_vm8 = vnez %v8348_v11  ;;  %vm8461_vm4 = vnez %v8352_v8  ;;  %v619_v11 = vsel %vm8468_vm11, %v5507_v24, 0.0  ;;  %v8469_v8 = vld [vmem:[#allocation46_spill] sm:$0xff]  ;;  %8472 = vst [vmem:[#allocation21_spill] sm:$0xff] %v5724_v43  ;;  %v8582_v43 = vld [vmem:[#allocation57_spill] sm:$0xff] }
 0x164   :  { %v8455_v44 = vsel %vm5678_vm14, 4294967295, %v8454_v44  ;;  %vm5688_vm15 = vmor %vm8457_vm1, %vm8456_vm6  ;;  %v617_v14 = vsel %vm8460_vm8, %v5507_v24, 0.0  ;;  %v618_v27 = vsel %vm8461_vm4, %v5507_v24, 0.0  ;;  %vm8464_vm6 = vcmp.eq.s32.totalorder %v5378_v62, %v7975_v53 }
 0x165   :  { %v8459_v25 = vsel %vm5688_vm15, 4294967295, %v8458_v25  ;;  %vm8465_vm1 = vcmp.eq.s32.totalorder %v5378_v62, %v1630_v32  ;;  %v5721_v39 = vadd.f32 %v8469_v8, %v615_v63  ;;  %vm8473_vm4 = vcmp.eq.s32.totalorder %v4844_v30, %v7380_v2  ;;  %v8492_v63 = vld [vmem:[#allocation49_spill] sm:$0xff]  ;;  %v8506_v8 = vld [vmem:[#allocation68_spill] sm:$0xff] }
 0x166   :  { %vm5711_vm0 = vmor %vm8465_vm1, %vm8464_vm6  ;;  %vm8474_vm6 = vnez %v8365_v23  ;;  %vm8477_vm11 = vcmp.eq.s32.totalorder %v5197_v12, %v1689_v45  ;;  %vm8480_vm15 = vnez %v8373_v29  ;;  %v8488_v29 = vmov 0 }
 0x167   :  { %v8467_v37 = vsel %vm5711_vm0, 4294967295, %v8466_v37  ;;  %8470 = vst [vmem:[#allocation30_spill] sm:$0xff] %v5721_v39  ;;  %vm5731_vm1 = vmor %vm8474_vm6, %vm8473_vm4  ;;  %v620_v30 = vsel %vm8480_vm15, %v5507_v24, 0.0  ;;  %vm8481_vm4 = vnez %v8377_v61  ;;  %vm8486_vm15 = vcmp.eq.s32.totalorder %v5197_v12, %v1707_v48  ;;  %v8490_v61 = vld [vmem:[#allocation48_spill] sm:$0xff] }
 0x168   :  { %v8476_v4 = vsel %vm5731_vm1, 4294967295, %v8475_v4  ;;  %vm5742_vm0 = vmor %vm5418_vm13, %vm8477_vm11  ;;  %v621_v23 = vsel %vm8481_vm4, %v5507_v24, 0.0  ;;  %vm8482_vm13 = vcmp.eq.s32.totalorder %v5197_v12, %v1705_v47  ;;  %vm8483_vm11 = vnez %v8382_v15 }
 0x169   :  { %v8479_v22 = vsel %vm5742_vm0, 4294967295, %v8478_v22  ;;  %vm5761_vm0 = vmor %vm8483_vm11, %vm8482_vm13  ;;  %vm8487_vm4 = vnez %v8386_v0  ;;  %v5775_v24 = vadd.f32 %v8490_v61, %v617_v14  ;;  %v5778_v49 = vadd.f32 %v8492_v63, %v618_v27  ;;  %v8498_v0 = vld [vmem:[#allocation20_spill] sm:$0xff]  ;;  %v8517_v63 = vld [vmem:[#allocation18_spill] sm:$0xff] }
 0x16a   :  { %v8485_v57 = vsel %vm5761_vm0, 4294967295, %v8484_v57  ;;  %vm5770_vm1 = vmor %vm8487_vm4, %vm8486_vm15  ;;  %vm8494_vm8 = vcmp.eq.s32.totalorder %v5197_v12, %v1723_v50  ;;  %vm8495_vm15 = vnez %v8394_v52  ;;  %v8496_v15 = vmov 0  ;;  %v8504_v27 = vld [vmem:[#allocation24_spill] sm:$0xff] }
 0x16b   :  { %v8489_v29 = vsel %vm5770_vm1, 4294967295, %v8488_v29  ;;  %8491 = vst [vmem:[#allocation22_spill] sm:$0xff] %v5775_v24  ;;  %vm5789_vm4 = vmor %vm8495_vm15, %vm8494_vm8  ;;  %v5794_v14 = vadd.f32 %v8498_v0, %v619_v11  ;;  %vm8500_vm1 = vcmp.eq.s32.totalorder %v5197_v12, %v1737_v54  ;;  %vm8501_vm8 = vnez %v8400_v3  ;;  %v8516_v61 = vld [vmem:[#allocation16_spill] sm:$0xff]  ;;  %v8608_v0 = vld [vmem:[#allocation14_spill] sm:$0xff] }
 0x16c   :  { %8493 = vst [vmem:[#allocation41_spill] sm:$0xff] %v5778_v49  ;;  %v8497_v15 = vsel %vm5789_vm4, 4294967295, %v8496_v15  ;;  %vm5807_vm15 = vmor %vm8501_vm8, %vm8500_vm1  ;;  %v8502_v52 = vmov 0  ;;  %v5812_v11 = vadd.f32 %v8504_v27, %v620_v30  ;;  %v5815_v59 = vadd.f32 %v8506_v8, %v621_v23  ;;  %v5839_v23 = vpop.permute.xlu0 %1238  ;;  %v8575_v24 = vld [vmem:[#allocation12_spill] sm:$0xff] }
 0x16d   :  { %8499 = vst [vmem:[#allocation44_spill] sm:$0xff] %v5794_v14  ;;  %v8503_v52 = vsel %vm5807_vm15, 4294967295, %v8502_v52  ;;  %vm1000_vm6 = vcmp.eq.s32.totalorder %v5378_v62, %v1705_v47  ;;  %vm8508_vm11 = vcmp.eq.s32.totalorder %v5197_v12, %v1747_v56  ;;  %vm8509_vm1 = vnez %v8404_v31  ;;  %v8631_v30 = vld [vmem:[#allocation40_spill] sm:$0xff] }
 0x16e   :  { %8505 = vst [vmem:[#allocation42_spill] sm:$0xff] %v5812_v11  ;;  %vm5826_vm8 = vmor %vm8509_vm1, %vm8508_vm11  ;;  %v8510_v3 = vmov 0  ;;  %vm8512_vm15 = vcmp.eq.s32.totalorder %v5197_v12, %v1755_v58  ;;  %vm8513_vm4 = vnez %v8408_v5  ;;  %vm8522_vm11 = vcmp.eq.s32.totalorder %v5378_v62, %v1689_v45  ;;  %v8649_v31 = vld [vmem:[#allocation56_spill] sm:$0xff] }
 0x16f   :  { %8507 = vst [vmem:[#allocation54_spill] sm:$0xff] %v5815_v59  ;;  %v8511_v3 = vsel %vm5826_vm8, 4294967295, %v8510_v3  ;;  %vm5835_vm0 = vmor %vm8513_vm4, %vm8512_vm15  ;;  %vm8518_vm4 = vcmp.eq.s32.totalorder %v5197_v12, %v8094_v1  ;;  %v1288_v38 = vsel %vm5606_vm2, %v5839_v23, 0.0  ;;  %v1289_v60 = vsel %vm5615_vm5, %v5839_v23, 0.0  ;;  %v8554_v59 = vld [vmem:[#allocation10_spill] sm:$0xff] }
 0x170   :  { %vm5854_vm15 = vmor %vm5551_vm10, %vm8518_vm4  ;;  %vm8529_vm8 = vnez %v8437_v19  ;;  %v1291_v40 = vsel %vm5651_vm9, %v5839_v23, 0.0  ;;  %vm8532_vm5 = vnez %v8448_v41  ;;  %vm8537_vm9 = vcmp.eq.s32.totalorder %v5378_v62, %v1737_v54  ;;  %v8542_v19 = vld [vmem:[#allocation7_spill] sm:$0xff] }
 0x171   :  { %vm5865_vm1 = vmor %vm5569_vm3, %vm8522_vm11  ;;  %v1292_v51 = vsel %vm8532_vm5, %v5839_v23, 0.0  ;;  %vm8538_vm5 = vnez %v8467_v37  ;;  %vm8543_vm14 = vnez %v8476_v4  ;;  %v8546_v8 = vmov 0 }
 0x172   :  { %vm5877_vm13 = vmor %vm5589_vm7, %vm1000_vm6  ;;  %vm8527_vm7 = vnez %v8433_v46  ;;  %vm8528_vm6 = vcmp.eq.s32.totalorder %v5378_v62, %v1707_v48  ;;  %v1295_v37 = vsel %vm8543_vm14, %v5839_v23, 0.0  ;;  %vm8550_vm14 = vnez %v8479_v22 }
 0x173   :  { %vm5903_vm11 = vmor %vm8529_vm8, %vm8528_vm6  ;;  %vm8533_vm8 = vcmp.eq.s32.totalorder %v5378_v62, %v1723_v50  ;;  %vm8534_vm6 = vnez %v8459_v25  ;;  %v8541_v25 = vld [vmem:[#allocation69_spill] sm:$0xff]  ;;  %v8551_v4 = vmov 0  ;;  %vm8555_vm4 = vcmp.eq.s32.totalorder %v5378_v62, %v8516_v61 }
 0x174   :  { %vm5926_vm2 = vmor %vm8534_vm6, %vm8533_vm8  ;;  %vm8549_vm6 = vcmp.eq.s32.totalorder %v5197_v12, %v1843_v7  ;;  %vm8556_vm8 = vcmp.eq.s32.totalorder %v5378_v62, %v1646_v36  ;;  %v8557_v11 = vmov 0  ;;  %v8562_v22 = vmov 0 }
 0x175   :  { %vm5935_vm10 = vmor %vm8538_vm5, %vm8537_vm9  ;;  %vm8544_vm9 = vcmp.eq.s32.totalorder %v5378_v62, %v7859_v6  ;;  %vm8545_vm5 = vcmp.eq.s32.totalorder %v5378_v62, %v1638_v34  ;;  %v8567_v14 = vmov 0  ;;  %v8572_v49 = vmov 0 }
 0x176   :  { %vm5956_vm3 = vmor %vm8545_vm5, %vm8544_vm9  ;;  %vm8570_vm5 = vcmp.eq.s32.totalorder %v5197_v12, %v1855_v10  ;;  %v8667_v46 = vmov 0 }
 0x177   :  { %v8547_v8 = vsel %vm5956_vm3, 4294967295, %v8546_v8  ;;  %vm5969_vm12 = vmor %vm8550_vm14, %vm8549_vm6  ;;  %vm8560_vm6 = vcmp.eq.s32.totalorder %v5378_v62, %v8517_v63  ;;  %vm8561_vm14 = vcmp.eq.s32.totalorder %v5378_v62, %v1671_v42 }
 0x178   :  { %8548 = vst [vmem:[#allocation5_spill] sm:$0xff] %v8547_v8  ;;  %v8552_v4 = vsel %vm5969_vm12, 4294967295, %v8551_v4  ;;  %vm5983_vm3 = vmor %vm8556_vm8, %vm8555_vm4  ;;  %vm8571_vm12 = vnez %v8489_v29  ;;  %v8580_v29 = vld [vmem:[#allocation13_spill] sm:$0xff]  ;;  %vm8597_vm8 = vcmp.eq.s32.totalorder %v5378_v62, %v1843_v7 }
 0x179   :  { %8553 = vst [vmem:[#allocation51_spill] sm:$0xff] %v8552_v4  ;;  %v8558_v11 = vsel %vm5983_vm3, 4294967295, %v8557_v11  ;;  %vm5993_vm9 = vmor %vm8561_vm14, %vm8560_vm6  ;;  %vm8565_vm3 = vcmp.eq.s32.totalorder %v5197_v12, %v1853_v9  ;;  %vm8566_vm6 = vnez %v8485_v57  ;;  %v8578_v57 = vmov 0  ;;  %v8588_v4 = vld [vmem:[#allocation71_spill] sm:$0xff] }
 0x17a   :  { %8559 = vst [vmem:[#allocation31_spill] sm:$0xff] %v8558_v11  ;;  %v8563_v22 = vsel %vm5993_vm9, 4294967295, %v8562_v22  ;;  %vm6010_vm14 = vmor %vm8566_vm6, %vm8565_vm3  ;;  %vm8576_vm3 = vcmp.eq.s32.totalorder %v5197_v12, %v7409_v17  ;;  %vm8577_vm6 = vnez %v8497_v15  ;;  %v8598_v15 = vmov 0 }
 0x17b   :  { %8564 = vst [vmem:[#allocation32_spill] sm:$0xff] %v8563_v22  ;;  %v8568_v14 = vsel %vm6010_vm14, 4294967295, %v8567_v14  ;;  %vm6019_vm9 = vmor %vm8571_vm12, %vm8570_vm5  ;;  %vm8581_vm12 = vnez %v8580_v29  ;;  %v8585_v22 = vld [vmem:[#allocation52_spill] sm:$0xff] }
 0x17c   :  { %8569 = vst [vmem:[#allocation43_spill] sm:$0xff] %v8568_v14  ;;  %v8573_v49 = vsel %vm6019_vm9, 4294967295, %v8572_v49  ;;  %vm6032_vm14 = vmor %vm8577_vm6, %vm8576_vm3  ;;  %v8583_v39 = vsel %vm8581_vm12, %v8582_v43, 0.0  ;;  %vm8586_vm5 = vnez %v8585_v22  ;;  %vm8589_vm6 = vcmp.eq.s32.totalorder %v8541_v25, %v8542_v19  ;;  %v8607_v22 = vld [vmem:[#allocation72_spill] sm:$0xff] }
 0x17d   :  { %8574 = vst [vmem:[#allocation33_spill] sm:$0xff] %v8573_v49  ;;  %v8579_v57 = vsel %vm6032_vm14, 4294967295, %v8578_v57  ;;  %v8584_v49 = vld [vmem:[#allocation70_spill] sm:$0xff]  ;;  %v8587_v11 = vsel %vm8586_vm5, %v8582_v43, 0.0  ;;  %vm8590_vm12 = vcmp.eq.s32.totalorder %v8541_v25, %v7808_v55  ;;  %vm8593_vm5 = vcmp.eq.s32.totalorder %v5197_v12, %v7410_v26  ;;  %vm6074_vm3 = vmor %vm5865_vm1, %vm8597_vm8  ;;  %v8611_v55 = vld [vmem:[#allocation15_spill] sm:$0xff] }
 0x17e   :  { %v1322_v14 = vadd.f32 %v8584_v49, %v8583_v39  ;;  %v1335_v8 = vadd.f32 %v8588_v4, %v8587_v11  ;;  %vm6056_vm4 = vmor %vm8590_vm12, %vm8589_vm6  ;;  %vm8594_vm14 = vnez %v8503_v52  ;;  %v8599_v15 = vsel %vm6074_vm3, 4294967295, %v8598_v15  ;;  %v8604_v11 = vld [vmem:[#allocation59_spill] sm:$0xff]  ;;  %v8686_v39 = vld [vmem:[#allocation58_spill] sm:$0xff] }
 0x17f   :  { %vm6065_vm9 = vmor %vm8594_vm14, %vm8593_vm5  ;;  %8600 = vst [vmem:[#allocation34_spill] sm:$0xff] %v8599_v15  ;;  %vm8601_vm6 = vcmp.eq.s32.totalorder %v5378_v62, %v1853_v9  ;;  %v8602_v52 = vmov 0  ;;  %vm8605_vm14 = vnez %v8604_v11  ;;  %vm8609_vm1 = vnez %v8608_v0  ;;  %v8627_v11 = vld [vmem:[#allocation53_spill] sm:$0xff] }
 0x180   :  { %vm6083_vm12 = vmor %vm5877_vm13, %vm8601_vm6  ;;  %v8606_v4 = vsel %vm8605_vm14, %v8582_v43, 0.0  ;;  %v8610_v19 = vsel %vm8609_vm1, %v8582_v43, 0.0  ;;  %vm8612_vm5 = vcmp.eq.s32.totalorder %v8541_v25, %v8554_v59  ;;  %vm8613_vm6 = vcmp.eq.s32.totalorder %v8541_v25, %v8097_v20  ;;  %v8634_v20 = vld [vmem:[#allocation39_spill] sm:$0xff] }
 0x181   :  { %v8603_v52 = vsel %vm6083_vm12, 4294967295, %v8602_v52  ;;  %v1348_v29 = vadd.f32 %v8607_v22, %v8606_v4  ;;  %v1361_v15 = vadd.f32 %v8611_v55, %v8610_v19  ;;  %vm6107_vm14 = vmor %vm8613_vm6, %vm8612_vm5  ;;  %vm8616_vm1 = vcmp.eq.s32.totalorder %v5197_v12, %v1907_v16  ;;  %v8630_v22 = vld [vmem:[#allocation25_spill] sm:$0xff] }
 0x182   :  { %vm8617_vm12 = vnez %v8511_v3  ;;  %v8618_v55 = vmov 0  ;;  %vm8620_vm8 = vcmp.eq.s32.totalorder %v5197_v12, %v1920_v18  ;;  %v8621_v19 = vmov 0 }
 0x183   :  { %vm6116_vm3 = vmor %vm8617_vm12, %vm8616_vm1  ;;  %vm8624_vm5 = vcmp.eq.s32.totalorder %v5378_v62, %v1855_v10  ;;  %v8625_v3 = vmov 0  ;;  %vm8628_vm12 = vnez %v8627_v11  ;;  %vm8635_vm1 = vcmp.eq.s32.totalorder %v8541_v25, %v8575_v24  ;;  %v8645_v11 = vld [vmem:[#allocation55_spill] sm:$0xff]  ;;  %v8652_v24 = vld [vmem:[#allocation28_spill] sm:$0xff] }
 0x184   :  { %v8619_v55 = vsel %vm6116_vm3, 4294967295, %v8618_v55  ;;  %vm6125_vm13 = vmor %vm5835_vm0, %vm8620_vm8  ;;  %v8629_v4 = vsel %vm8628_vm12, %v8582_v43, 0.0  ;;  %vm8632_vm0 = vnez %v8631_v30  ;;  %vm8642_vm8 = vcmp.eq.s32.totalorder %v5378_v62, %v7409_v17 }
 0x185   :  { %v8622_v19 = vsel %vm6125_vm13, 4294967295, %v8621_v19  ;;  %vm6134_vm6 = vmor %vm5903_vm11, %vm8624_vm5  ;;  %v1374_v0 = vadd.f32 %v8630_v22, %v8629_v4  ;;  %v8633_v59 = vsel %vm8632_vm0, %v8582_v43, 0.0  ;;  %vm8636_vm5 = vcmp.eq.s32.totalorder %v8541_v25, %v1618_v28 }
 0x186   :  { %8623 = vst [vmem:[#allocation50_spill] sm:$0xff] %v8622_v19  ;;  %v8626_v3 = vsel %vm6134_vm6, 4294967295, %v8625_v3  ;;  %v1387_v19 = vadd.f32 %v8634_v20, %v8633_v59  ;;  %vm6158_vm12 = vmor %vm8636_vm5, %vm8635_vm1  ;;  %vm8639_vm0 = vcmp.eq.s32.totalorder %v5197_v12, %v7380_v2  ;;  %v8640_v20 = vmov 0  ;;  %v8648_v12 = vld [vmem:[#allocation27_spill] sm:$0xff] }
 0x187   :  { %vm6167_vm6 = vmor %vm5854_vm15, %vm8639_vm0  ;;  %v8643_v59 = vmov 0  ;;  %vm8646_vm1 = vnez %v8645_v11  ;;  %vm8650_vm15 = vnez %v8649_v31  ;;  %vm8654_vm0 = vcmp.eq.s32.totalorder %v8541_v25, %v7847_v33  ;;  %v8692_v31 = vld [vmem:[#allocation31_spill] sm:$0xff] }
 0x188   :  { %v8641_v20 = vsel %vm6167_vm6, 4294967295, %v8640_v20  ;;  %vm6176_vm11 = vmor %vm5926_vm2, %vm8642_vm8  ;;  %v8647_v4 = vsel %vm8646_vm1, %v8582_v43, 0.0  ;;  %v8651_v30 = vsel %vm8650_vm15, %v8582_v43, 0.0  ;;  %vm8653_vm8 = vcmp.eq.s32.totalorder %v8541_v25, %v7966_v21 }
 0x189   :  { %v8644_v59 = vsel %vm6176_vm11, 4294967295, %v8643_v59  ;;  %v1400_v22 = vadd.f32 %v8648_v12, %v8647_v4  ;;  %v1413_v28 = vadd.f32 %v8652_v24, %v8651_v30  ;;  %vm6200_vm1 = vmor %vm8654_vm0, %vm8653_vm8  ;;  %v1323_v11 = vadd.f32 %v1322_v14, %v1288_v38  ;;  %v8697_v30 = vld [vmem:[#allocation32_spill] sm:$0xff] }
 0x18a   :  { %v1336_v43 = vadd.f32 %v1335_v8, %v1289_v60  ;;  %vm109_vm15 = vcmp.eq.s32.totalorder %v8541_v25, %v1671_v42  ;;  %vm181_vm5 = vcmp.eq.s32.totalorder %v8541_v25, %v8517_v63  ;;  %vm8657_vm2 = vcmp.eq.s32.totalorder %v8541_v25, %v7975_v53 }
 0x18b   :  { %vm8658_vm11 = vcmp.eq.s32.totalorder %v8541_v25, %v1630_v32  ;;  %v8659_v24 = vmov 0  ;;  %v8661_v14 = vsel %vm8527_vm7, %v5839_v23, 0.0  ;;  %v1362_v60 = vadd.f32 %v1361_v15, %v1291_v40 }
 0x18c   :  { %vm6214_vm6 = vmor %vm8658_vm11, %vm8657_vm2  ;;  %v1349_v38 = vadd.f32 %v1348_v29, %v8661_v14  ;;  %v1375_v8 = vadd.f32 %v1374_v0, %v1292_v51  ;;  %vm8662_vm8 = vcmp.eq.s32.totalorder %v8541_v25, %v7859_v6  ;;  %vm8663_vm0 = vcmp.eq.s32.totalorder %v8541_v25, %v1638_v34 }
 0x18d   :  { %v8660_v24 = vsel %vm6214_vm6, 4294967295, %v8659_v24  ;;  %vm6228_vm13 = vmor %vm8663_vm0, %vm8662_vm8  ;;  %v8664_v4 = vmov 0  ;;  %vm310_vm11 = vcmp.eq.s32.totalorder %v8541_v25, %v1689_v45  ;;  %vm8666_vm2 = vcmp.eq.s32.totalorder %v5378_v62, %v7410_v26 }
 0x18e   :  { %v8665_v4 = vsel %vm6228_vm13, 4294967295, %v8664_v4  ;;  %vm6239_vm7 = vmor %vm5935_vm10, %vm8666_vm2  ;;  %vm8669_vm3 = vnez %v8452_v35  ;;  %vm8671_vm8 = vnez %v8455_v44  ;;  %v1414_v0 = vadd.f32 %v1413_v28, %v1295_v37  ;;  %v6289_v44 = vpop.permute.xlu1 %1248  ;;  %v8760_v37 = vld [vmem:[#allocation60_spill] sm:$0xff] }
 0x18f   :  { %v8668_v46 = vsel %vm6239_vm7, 4294967295, %v8667_v46  ;;  %v8670_v40 = vsel %vm8669_vm3, %v5839_v23, 0.0  ;;  %v8672_v15 = vsel %vm8671_vm8, %v5839_v23, 0.0  ;;  %vm8673_vm0 = vcmp.eq.s32.totalorder %v8541_v25, %v8516_v61  ;;  %vm6263_vm7 = vmor %vm109_vm15, %vm181_vm5  ;;  %v8682_v23 = vld [vmem:[#allocation5_spill] sm:$0xff] }
 0x190   :  { %v1388_v51 = vadd.f32 %v1387_v19, %v8670_v40  ;;  %v1401_v29 = vadd.f32 %v1400_v22, %v8672_v15  ;;  %vm8674_vm10 = vcmp.eq.s32.totalorder %v8541_v25, %v1646_v36  ;;  %vm311_vm3 = vcmp.eq.s32.totalorder %v8541_v25, %v1705_v47  ;;  %vm6281_vm15 = vmor %vm6056_vm4, %vm310_vm11  ;;  %v8687_v19 = vld [vmem:[#allocation51_spill] sm:$0xff] }
 0x191   :  { %vm6257_vm2 = vmor %vm8674_vm10, %vm8673_vm0  ;;  %vm8681_vm10 = vcmp.eq.s32.totalorder %v5378_v62, %v1747_v56  ;;  %vm8683_vm0 = vnez %v8682_v23  ;;  %vm8688_vm11 = vnez %v8687_v19  ;;  %vm8693_vm13 = vnez %v8692_v31  ;;  %v8701_v40 = vld [vmem:[#allocation43_spill] sm:$0xff]  ;;  %v8703_v23 = vld [vmem:[#allocation33_spill] sm:$0xff] }
 0x192   :  { %vm6296_vm5 = vmor %vm8683_vm0, %vm8681_vm10  ;;  %v1296_v12 = vsel %vm8688_vm11, %v8686_v39, 0.0  ;;  %vm8691_vm11 = vcmp.eq.s32.totalorder %v5378_v62, %v1755_v58  ;;  %vm8723_vm10 = vnez %v8626_v3 }
 0x193   :  { %vm6310_vm6 = vmor %vm6107_vm14, %vm311_vm3  ;;  %vm8696_vm14 = vcmp.eq.s32.totalorder %v5378_v62, %v8094_v1  ;;  %vm8698_vm3 = vnez %v8697_v30  ;;  %v1324_v31 = vadd.f32 %v1323_v11, %v1296_v12  ;;  %v8712_v11 = vld [vmem:[#allocation23_spill] sm:$0xff] }
 0x194   :  { %vm6325_vm8 = vmor %vm8693_vm13, %vm8691_vm11  ;;  %vm8702_vm13 = vnez %v8701_v40  ;;  %vm8704_vm11 = vnez %v8703_v23  ;;  %v6374_v12 = vadd.s32 64, %v8712_v11  ;;  %v8777_v11 = vld [vmem:[#allocation41_spill] sm:$0xff] }
 0x195   :  { %vm6334_vm0 = vmor %vm8698_vm3, %vm8696_vm14  ;;  %v1297_v15 = vsel %vm8702_vm13, %v8686_v39, 0.0  ;;  %v1298_v19 = vsel %vm8704_vm11, %v8686_v39, 0.0  ;;  %vm8705_vm14 = vcmp.eq.s32.totalorder %v8541_v25, %v1707_v48  ;;  %vm8708_vm13 = vnez %v8579_v57 }
 0x196   :  { %vm6353_vm3 = vmor %vm6158_vm12, %vm8705_vm14  ;;  %v1299_v40 = vsel %vm8708_vm13, %v8686_v39, 0.0  ;;  %v1337_v47 = vadd.f32 %v1336_v43, %v1297_v15  ;;  %v1350_v23 = vadd.f32 %v1349_v38, %v1298_v19  ;;  %vm8709_vm11 = vcmp.eq.s32.totalorder %v8541_v25, %v1723_v50  ;;  %v8713_v43 = vld [vmem:[#allocation34_spill] sm:$0xff] }
 0x197   :  { %vm6367_vm4 = vmor %vm6200_vm1, %vm8709_vm11  ;;  %v1300_v57 = vsel %vm6065_vm9, %v8686_v39, 0.0  ;;  %vm8714_vm14 = vnez %v8713_v43  ;;  %vm8715_vm1 = vnez %v8603_v52  ;;  %v1363_v15 = vadd.f32 %v1362_v60, %v1299_v40  ;;  %v8721_v52 = vld [vmem:[#allocation50_spill] sm:$0xff] }
 0x198   :  { %v1304_v38 = vsel %vm8714_vm14, %v6289_v44, 0.0  ;;  %v1305_v13 = vsel %vm8715_vm1, %v6289_v44, 0.0  ;;  %vm8716_vm13 = vcmp.eq.s32.totalorder %v8541_v25, %v1737_v54  ;;  %vm8717_vm11 = vnez %v8660_v24 }
 0x199   :  { %vm6390_vm12 = vmor %vm8717_vm11, %vm8716_vm13  ;;  %vm8720_vm14 = vnez %v8619_v55  ;;  %vm8722_vm1 = vnez %v8721_v52  ;;  %v1306_v40 = vsel %vm8723_vm10, %v6289_v44, 0.0  ;;  %v6405_v24 = vadd.f32 %v1375_v8, %v1300_v57  ;;  %v567_v57 = vpop.permute.xlu0 %566 }
 0x19a   :  { %v1301_v49 = vsel %vm8720_vm14, %v8686_v39, 0.0  ;;  %v1302_v60 = vsel %vm8722_vm1, %v8686_v39, 0.0  ;;  %vm8724_vm13 = vcmp.eq.s32.totalorder %v8541_v25, %v1747_v56  ;;  %vm8725_vm11 = vnez %v8665_v4 }
 0x19b   :  { %vm6412_vm9 = vmor %vm8725_vm11, %vm8724_vm13  ;;  %vm8728_vm14 = vnez %v8641_v20  ;;  %vm8729_vm1 = vnez %v8644_v59  ;;  %v6422_v43 = vadd.f32 %v1388_v51, %v1301_v49  ;;  %v6424_v8 = vadd.f32 %v1401_v29, %v1302_v60  ;;  %v8738_v29 = vld [vmem:[#allocation6_spill] sm:$0xff] }
 0x19c   :  { %v1303_v55 = vsel %vm8728_vm14, %v8686_v39, 0.0  ;;  %v1307_v3 = vsel %vm8729_vm1, %v6289_v44, 0.0  ;;  %vm8730_vm10 = vcmp.eq.s32.totalorder %v8541_v25, %v1755_v58  ;;  %v8731_v4 = vmov 0  ;;  %v8752_v49 = vld [vmem:[#allocation30_spill] sm:$0xff] }
 0x19d   :  { %vm6431_vm13 = vmor %vm6257_vm2, %vm8730_vm10  ;;  %v6435_v20 = vadd.f32 %v1324_v31, %v1304_v38  ;;  %v6437_v39 = vadd.f32 %v1337_v47, %v1305_v13  ;;  %v6439_v59 = vadd.f32 %v1414_v0, %v1303_v55  ;;  %vm8735_vm11 = vcmp.eq.s32.totalorder %v8541_v25, %v8094_v1  ;;  %v8741_v47 = vld [vmem:[#allocation8_spill] sm:$0xff]  ;;  %v8742_v0 = vld [vmem:[#allocation9_spill] sm:$0xff] }
 0x19e   :  { %v8732_v4 = vsel %vm6431_vm13, 4294967295, %v8731_v4  ;;  %vm6446_vm14 = vmor %vm6263_vm7, %vm8735_vm11  ;;  %v8736_v51 = vmov 0  ;;  %v6452_v41 = vadd.f32 %v1350_v23, %v1306_v40  ;;  %vm8740_vm1 = vcmp.eq.s32.totalorder %v8541_v25, %v1843_v7  ;;  %v8747_v38 = vld [vmem:[#allocation29_spill] sm:$0xff]  ;;  %v8753_v60 = vld [vmem:[#allocation10_spill] sm:$0xff] }
 0x19f   :  { %8733 = vst [vmem:[#allocation35_spill] sm:$0xff] %v6435_v20  ;;  %v8737_v51 = vsel %vm6446_vm14, 4294967295, %v8736_v51  ;;  %vm510_vm10 = vmor %vm6281_vm15, %vm8740_vm1  ;;  %v6468_v31 = vadd.f32 %v1363_v15, %v1307_v3  ;;  %vm8745_vm14 = vcmp.eq.s32.totalorder %v8541_v25, %v1853_v9  ;;  %vm8746_vm7 = vcmp.eq.s32.totalorder %v8541_v25, %v1855_v10  ;;  %v8748_v15 = vld [vmem:[#allocation7_spill] sm:$0xff]  ;;  %v8754_v40 = vld [vmem:[#allocation12_spill] sm:$0xff] }
 0x1a0   :  { %8734 = vst [vmem:[#allocation67_spill] sm:$0xff] %v6437_v39  ;;  %vm511_vm15 = vmor %vm6310_vm6, %vm8745_vm14  ;;  %v622_v28 = vsel %vm510_vm10, %v567_v57, 0.0  ;;  %vm879_vm2 = vcmp.eq.s32.totalorder %v6374_v12, %v8748_v15  ;;  %vm8749_vm6 = vcmp.eq.s32.totalorder %v8541_v25, %v7409_v17  ;;  %vm880_vm10 = vcmp.eq.s32.totalorder %v6374_v12, %v8753_v60  ;;  %v8759_v3 = vld [vmem:[#allocation21_spill] sm:$0xff]  ;;  %v8801_v60 = vld [vmem:[#allocation64_spill] sm:$0xff] }
 0x1a1   :  { %8739 = vst [vmem:[#allocation36_spill] sm:$0xff] %v6452_v41  ;;  %vm512_vm11 = vmor %vm6353_vm3, %vm8746_vm7  ;;  %v623_v23 = vsel %vm511_vm15, %v567_v57, 0.0  ;;  %v643_v13 = vadd.f32 %v8747_v38, %v622_v28  ;;  %vm881_vm7 = vcmp.eq.s32.totalorder %v6374_v12, %v8754_v40  ;;  %vm8755_vm15 = vcmp.eq.s32.totalorder %v5378_v62, %v1907_v16  ;;  %v8784_v41 = vld [vmem:[#allocation62_spill] sm:$0xff] }
 0x1a2   :  { %8744 = vst [vmem:[#allocation37_spill] sm:$0xff] %v6468_v31  ;;  %vm6492_vm14 = vmor %vm6367_vm4, %vm8749_vm6  ;;  %v624_v30 = vsel %vm512_vm11, %v567_v57, 0.0  ;;  %v656_v52 = vadd.f32 %v8752_v49, %v623_v23  ;;  %vm8758_vm11 = vcmp.eq.s32.totalorder %v8541_v25, %v7410_v26  ;;  %v8762_v23 = vld [vmem:[#allocation11_spill] sm:$0xff]  ;;  %vm8764_vm13 = vcmp.eq.s32.totalorder %v5378_v62, %v1920_v18  ;;  %v8778_v31 = vld [vmem:[#allocation61_spill] sm:$0xff] }
 0x1a3   :  { %vm6508_vm4 = vmor %vm6296_vm5, %vm8755_vm15  ;;  %v625_v55 = vsel %vm6492_vm14, %v567_v57, 0.0  ;;  %v669_v28 = vadd.f32 %v8759_v3, %v624_v30  ;;  %vm882_vm5 = vcmp.eq.s32.totalorder %v6374_v12, %v7966_v21  ;;  %vm8761_vm15 = vnez %v8760_v37  ;;  %v8772_v3 = vld [vmem:[#allocation17_spill] sm:$0xff] }
 0x1a4   :  { %vm514_vm6 = vmor %vm6390_vm12, %vm8758_vm11  ;;  %v8763_v38 = vsel %vm8761_vm15, %v8762_v23, 0.0  ;;  %vm8767_vm14 = vcmp.eq.s32.totalorder %v5378_v62, %v7380_v2  ;;  %vm8770_vm15 = vcmp.eq.s32.totalorder %v8541_v25, %v1907_v16 }
 0x1a5   :  { %v644_v49 = vadd.f32 %v643_v13, %v8763_v38  ;;  %vm6533_vm12 = vmor %vm6325_vm8, %vm8764_vm13  ;;  %v626_v27 = vsel %vm514_vm6, %v567_v57, 0.0  ;;  %v8771_v13 = vld [vmem:[#allocation22_spill] sm:$0xff]  ;;  %vm883_vm8 = vcmp.eq.s32.totalorder %v6374_v12, %v7975_v53  ;;  %vm8773_vm13 = vnez %v8772_v3  ;;  %v8783_v3 = vld [vmem:[#allocation44_spill] sm:$0xff] }
 0x1a6   :  { %vm6542_vm11 = vmor %vm6334_vm0, %vm8767_vm14  ;;  %v682_v30 = vadd.f32 %v8771_v13, %v625_v55  ;;  %v8774_v62 = vsel %vm8773_vm13, %v8762_v23, 0.0  ;;  %vm8775_vm0 = vcmp.eq.s32.totalorder %v8541_v25, %v1920_v18  ;;  %vm8776_vm14 = vnez %v8732_v4 }
 0x1a7   :  { %vm515_vm3 = vmor %vm6412_vm9, %vm8770_vm15  ;;  %v657_v14 = vadd.f32 %v656_v52, %v8774_v62  ;;  %v695_v38 = vadd.f32 %v8777_v11, %v626_v27  ;;  %v645_v35 = vrot.slane %v644_v49, 4  ;;  %vm8779_vm9 = vnez %v8778_v31  ;;  %v8787_v31 = vld [vmem:[#allocation42_spill] sm:$0xff]  ;;  %v8846_v53 = vld [vmem:[#allocation67_spill] sm:$0xff] }
 0x1a8   :  { %vm516_vm1 = vmor %vm8776_vm14, %vm8775_vm0  ;;  %v627_v37 = vsel %vm515_vm3, %v567_v57, 0.0  ;;  %v8780_v55 = vsel %vm8779_vm9, %v8762_v23, 0.0  ;;  %vm8781_vm6 = vcmp.eq.s32.totalorder %v8541_v25, %v7380_v2  ;;  %vm8782_vm15 = vnez %v8737_v51 }
 0x1a9   :  { %v670_v13 = vadd.f32 %v669_v28, %v8780_v55  ;;  %vm517_vm13 = vmor %vm8782_vm15, %vm8781_vm6  ;;  %v628_v52 = vsel %vm516_vm1, %v567_v57, 0.0  ;;  %v708_v62 = vadd.f32 %v8783_v3, %v627_v37  ;;  %v658_v4 = vrot.slane %v657_v14, 4  ;;  %v8791_v37 = vld [vmem:[#allocation54_spill] sm:$0xff] }
 0x1aa   :  { %vm8785_vm3 = vnez %v8784_v41  ;;  %v629_v39 = vsel %vm517_vm13, %v567_v57, 0.0  ;;  %v721_v20 = vadd.f32 %v8787_v31, %v628_v52  ;;  %vm8788_vm0 = vcmp.eq.s32.totalorder %v6374_v12, %v8738_v29 }
 0x1ab   :  { %v8786_v27 = vsel %vm8785_vm3, %v8762_v23, 0.0  ;;  %vm6585_vm14 = vmor %vm8788_vm0, %vm879_vm2  ;;  %v646_v51 = vadd.f32 %v645_v35, %v644_v49  ;;  %v671_v28 = vrot.slane %v670_v13, 4  ;;  %v734_v41 = vadd.f32 %v8791_v37, %v629_v39 }
 0x1ac   :  { %v683_v11 = vadd.f32 %v682_v30, %v8786_v27  ;;  %vm8792_vm1 = vcmp.eq.s32.totalorder %v6374_v12, %v8741_v47  ;;  %v659_v15 = vadd.f32 %v658_v4, %v657_v14  ;;  %v8795_v30 = vld [vmem:[#allocation63_spill] sm:$0xff]  ;;  %vm884_vm6 = vcmp.eq.s32.totalorder %v6374_v12, %v7859_v6 }
 0x1ad   :  { %vm6596_vm9 = vmor %vm8792_vm1, %vm880_vm10  ;;  %vm8796_vm2 = vnez %v8795_v30  ;;  %vm8798_vm15 = vcmp.eq.s32.totalorder %v6374_v12, %v8742_v0  ;;  %v672_v47 = vadd.f32 %v671_v28, %v670_v13  ;;  %vm8802_vm13 = vnez %v8801_v60  ;;  %v8822_v6 = vld [vmem:[#allocation19_spill] sm:$0xff]  ;;  %v8848_v28 = vld [vmem:[#allocation36_spill] sm:$0xff] }
 0x1ae   :  { %v684_v29 = vrot.slane %v683_v11, 4  ;;  %v8797_v55 = vsel %vm8796_vm2, %v8762_v23, 0.0  ;;  %vm6612_vm10 = vmor %vm8798_vm15, %vm881_vm7  ;;  %v8803_v49 = vsel %vm8802_vm13, %v8762_v23, 0.0  ;;  %vm885_vm0 = vcmp.eq.s32.totalorder %v6374_v12, %v8516_v61 }
 0x1af   :  { %v696_v35 = vadd.f32 %v695_v38, %v8797_v55  ;;  %v709_v14 = vadd.f32 %v708_v62, %v8803_v49  ;;  %v8804_v38 = vld [vmem:[#allocation65_spill] sm:$0xff]  ;;  %vm8807_vm7 = vcmp.eq.s32.totalorder %v6374_v12, %v7847_v33  ;;  %v8810_v62 = vld [vmem:[#allocation66_spill] sm:$0xff]  ;;  %vm886_vm15 = vcmp.eq.s32.totalorder %v6374_v12, %v8517_v63 }
 0x1b0   :  { %vm8805_vm3 = vnez %v8804_v38  ;;  %vm6632_vm1 = vmor %vm8807_vm7, %vm882_vm5  ;;  %v685_v40 = vadd.f32 %v684_v29, %v683_v11  ;;  %vm8811_vm2 = vnez %v8810_v62  ;;  %vm8813_vm13 = vcmp.eq.s32.totalorder %v6374_v12, %v1630_v32 }
 0x1b1   :  { %v8806_v52 = vsel %vm8805_vm3, %v8762_v23, 0.0  ;;  %v697_v13 = vrot.slane %v696_v35, 4  ;;  %v8812_v4 = vsel %vm8811_vm2, %v8762_v23, 0.0  ;;  %vm6648_vm5 = vmor %vm8813_vm13, %vm883_vm8  ;;  %vm1007_vm3 = vcmp.eq.s32.totalorder %v6374_v12, %v1689_v45 }
 0x1b2   :  { %v722_v3 = vadd.f32 %v721_v20, %v8806_v52  ;;  %v735_v20 = vadd.f32 %v734_v41, %v8812_v4  ;;  %v710_v21 = vrot.slane %v709_v14, 4  ;;  %vm8816_vm7 = vcmp.eq.s32.totalorder %v6374_v12, %v1638_v34  ;;  %v8845_v4 = vld [vmem:[#allocation35_spill] sm:$0xff] }
 0x1b3   :  { %vm6660_vm2 = vmor %vm8816_vm7, %vm884_vm6  ;;  %v647_v32 = vrot.slane %v646_v51, 2  ;;  %v660_v23 = vrot.slane %v659_v15, 2  ;;  %v698_v11 = vadd.f32 %v697_v13, %v696_v35  ;;  %vm8819_vm8 = vcmp.eq.s32.totalorder %v6374_v12, %v1646_v36 }
 0x1b4   :  { %v723_v27 = vrot.slane %v722_v3, 4  ;;  %v736_v31 = vrot.slane %v735_v20, 4  ;;  %vm6670_vm13 = vmor %vm8819_vm8, %vm885_vm0  ;;  %vm1008_vm6 = vcmp.eq.s32.totalorder %v6374_v12, %v8822_v6  ;;  %v673_v34 = vrot.slane %v672_v47, 2 }
 0x1b5   :  { %v686_v37 = vrot.slane %v685_v40, 2  ;;  %v711_v41 = vadd.f32 %v710_v21, %v709_v14  ;;  %v1309_v29 = vsel %vm6508_vm4, %v6289_v44, 0.0  ;;  %vm8823_vm7 = vcmp.eq.s32.totalorder %v6374_v12, %v1671_v42 }
 0x1b6   :  { %vm6685_vm0 = vmor %vm8823_vm7, %vm886_vm15  ;;  %vm1009_vm8 = vcmp.eq.s32.totalorder %v6374_v12, %v1707_v48  ;;  %v699_v61 = vrot.slane %v698_v11, 2  ;;  %v724_v30 = vadd.f32 %v723_v27, %v722_v3  ;;  %v1310_v5 = vsel %vm6533_vm12, %v6289_v44, 0.0 }
 0x1b7   :  { %v1311_v63 = vsel %vm6542_vm11, %v6289_v44, 0.0  ;;  %vm1010_vm4 = vcmp.eq.s32.totalorder %v6374_v12, %v1723_v50  ;;  %vm6704_vm15 = vmor %vm6585_vm14, %vm1007_vm3  ;;  %v737_v55 = vadd.f32 %v736_v31, %v735_v20  ;;  %vm1011_vm12 = vcmp.eq.s32.totalorder %v6374_v12, %v1737_v54  ;;  %v1254_v54 = vpop.permute.xlu0 %1253 }
 0x1b8   :  { %vm6715_vm11 = vmor %vm6596_vm9, %vm1008_vm6  ;;  %v648_v45 = vadd.f32 %v647_v32, %v646_v51  ;;  %v661_v22 = vadd.f32 %v660_v23, %v659_v15  ;;  %v712_v25 = vrot.slane %v711_v41, 2  ;;  %vm8830_vm14 = vnez %v8668_v46 }
 0x1b9   :  { %v8831_v35 = vsel %vm8830_vm14, %v6289_v44, 0.0  ;;  %vm1012_vm3 = vcmp.eq.s32.totalorder %v6374_v12, %v1747_v56  ;;  %vm6733_vm9 = vmor %vm6612_vm10, %vm1009_vm8  ;;  %v674_v51 = vadd.f32 %v673_v34, %v672_v47  ;;  %v687_v15 = vadd.f32 %v686_v37, %v685_v40 }
 0x1ba   :  { %v6724_v60 = vadd.f32 %v6405_v24, %v8831_v35  ;;  %v6738_v46 = vadd.f32 %v6422_v43, %v1309_v29  ;;  %vm1013_vm6 = vcmp.eq.s32.totalorder %v6374_v12, %v1755_v58  ;;  %vm6747_vm7 = vmor %vm6632_vm1, %vm1010_vm4  ;;  %v700_v56 = vadd.f32 %v699_v61, %v698_v11 }
 0x1bb   :  { %v725_v44 = vrot.slane %v724_v30, 2  ;;  %v6752_v24 = vadd.f32 %v6424_v8, %v1310_v5  ;;  %v6755_v43 = vadd.f32 %v6439_v59, %v1311_v63  ;;  %vm1014_vm10 = vcmp.eq.s32.totalorder %v6374_v12, %v8094_v1  ;;  %vm6764_vm1 = vmor %vm6648_vm5, %vm1011_vm12 }
 0x1bc   :  { %v738_v39 = vrot.slane %v737_v55, 2  ;;  %vm6770_vm8 = vmor %vm6660_vm2, %vm1012_vm3  ;;  %vm1135_vm4 = vcmp.eq.s32.totalorder %v6374_v12, %v1843_v7  ;;  %v649_v1 = vrot.slane %v648_v45, 1  ;;  %v662_v59 = vrot.slane %v661_v22, 1 }
 0x1bd   :  { %v713_v47 = vadd.f32 %v712_v25, %v711_v41  ;;  %vm6781_vm5 = vmor %vm6670_vm13, %vm1013_vm6  ;;  %vm1136_vm2 = vcmp.eq.s32.totalorder %v6374_v12, %v1853_v9  ;;  %v675_v14 = vrot.slane %v674_v51, 1  ;;  %v688_v38 = vrot.slane %v687_v15, 1  ;;  %v8849_v41 = vld [vmem:[#allocation37_spill] sm:$0xff] }
 0x1be   :  { %vm6791_vm14 = vmor %vm6685_vm0, %vm1014_vm10  ;;  %vm1138_vm13 = vcmp.eq.s32.totalorder %v6374_v12, %v7409_v17  ;;  %v701_v58 = vrot.slane %v700_v56, 1  ;;  %v6799_v3 = vadd.f32 %v725_v44, %v724_v30  ;;  %vm1140_vm6 = vcmp.eq.s32.totalorder %v6374_v12, %v1907_v16 }
 0x1bf   :  { %vm1199_vm10 = vmor %vm6704_vm15, %vm1135_vm4  ;;  %v6812_v9 = vadd.f32 %v738_v39, %v737_v55  ;;  %v6816_v40 = vadd.f32 %v649_v1, %v648_v45  ;;  %v6818_v13 = vadd.f32 %v662_v59, %v661_v22  ;;  %v714_v62 = vrot.slane %v713_v47, 1 }
 0x1c0   :  { %vm1200_vm3 = vmor %vm6715_vm11, %vm1136_vm2  ;;  %v1312_v0 = vsel %vm1199_vm10, %v1254_v54, 0.0  ;;  %vm8844_vm0 = vcmp.eq.s32.totalorder %v6374_v12, %v1855_v10  ;;  %v6826_v33 = vadd.f32 %v675_v14, %v674_v51  ;;  %v6828_v21 = vadd.f32 %v688_v38, %v687_v15 }
 0x1c1   :  { %vm1201_vm12 = vmor %vm6733_vm9, %vm8844_vm0  ;;  %v1313_v7 = vsel %vm1200_vm3, %v1254_v54, 0.0  ;;  %v1326_v20 = vadd.f32 %v8845_v4, %v1312_v0  ;;  %v6836_v10 = vadd.f32 %v701_v58, %v700_v56  ;;  %v727_v23 = vrot.slane %v6799_v3, 1 }
 0x1c2   :  { %vm1202_vm15 = vmor %vm6747_vm7, %vm1138_vm13  ;;  %v1314_v27 = vsel %vm1201_vm12, %v1254_v54, 0.0  ;;  %v1339_v32 = vadd.f32 %v8846_v53, %v1313_v7  ;;  %vm8847_vm11 = vcmp.eq.s32.totalorder %v6374_v12, %v7410_v26  ;;  %v740_v6 = vrot.slane %v6812_v9, 1 }
 0x1c3   :  { %vm1203_vm9 = vmor %vm6764_vm1, %vm8847_vm11  ;;  %v1315_v11 = vsel %vm1202_vm15, %v1254_v54, 0.0  ;;  %v1327_v31 = vrot.slane %v1326_v20, 4  ;;  %v1352_v17 = vadd.f32 %v8848_v28, %v1314_v27  ;;  %v6852_v26 = vadd.f32 %v714_v62, %v713_v47 }
 0x1c4   :  { %vm1204_vm7 = vmor %vm6770_vm8, %vm1140_vm6  ;;  %v1316_v34 = vsel %vm1203_vm9, %v1254_v54, 0.0  ;;  %v1340_v37 = vrot.slane %v1339_v32, 4  ;;  %v1365_v29 = vadd.f32 %v8849_v41, %v1315_v11  ;;  %vm8850_vm1 = vcmp.eq.s32.totalorder %v6374_v12, %v1920_v18 }
 0x1c5   :  { %vm1205_vm4 = vmor %vm6781_vm5, %vm8850_vm1  ;;  %v1317_v36 = vsel %vm1204_vm7, %v1254_v54, 0.0  ;;  %v1328_v61 = vadd.f32 %v1327_v31, %v1326_v20  ;;  %v1353_v30 = vrot.slane %v1352_v17, 4  ;;  %v1378_v16 = vadd.f32 %v6724_v60, %v1316_v34 }
 0x1c6   :  { %vm8851_vm8 = vcmp.eq.s32.totalorder %v6374_v12, %v7380_v2  ;;  %v1318_v5 = vsel %vm1205_vm4, %v1254_v54, 0.0  ;;  %v1341_v63 = vadd.f32 %v1340_v37, %v1339_v32  ;;  %v1366_v42 = vrot.slane %v1365_v29, 4 }
 0x1c7   :  { %vm1206_vm2 = vmor %vm6791_vm14, %vm8851_vm8  ;;  %v1391_v55 = vadd.f32 %v6738_v46, %v1317_v36  ;;  %v1354_v19 = vadd.f32 %v1353_v30, %v1352_v17  ;;  %v1379_v45 = vrot.slane %v1378_v16, 4  ;;  %v1404_v22 = vadd.f32 %v6752_v24, %v1318_v5 }
 0x1c8   :  { %v1319_v18 = vsel %vm1206_vm2, %v1254_v54, 0.0  ;;  %v1367_v25 = vadd.f32 %v1366_v42, %v1365_v29  ;;  %v1329_v57 = vrot.slane %v1328_v61, 2  ;;  %v1342_v12 = vrot.slane %v1341_v63, 2 }
 0x1c9   :  { %v1392_v35 = vrot.slane %v1391_v55, 4  ;;  %v1417_v60 = vadd.f32 %v6755_v43, %v1319_v18  ;;  %v1380_v51 = vadd.f32 %v1379_v45, %v1378_v16  ;;  %v1405_v2 = vrot.slane %v1404_v22, 4 }
 0x1ca   :  { %v1355_v15 = vrot.slane %v1354_v19, 2  ;;  %v1330_v44 = vadd.f32 %v1329_v57, %v1328_v61  ;;  %v1368_v50 = vrot.slane %v1367_v25, 2  ;;  %v1343_v46 = vadd.f32 %v1342_v12, %v1341_v63 }
 0x1cb   :  { %v1393_v48 = vadd.f32 %v1392_v35, %v1391_v55  ;;  %v1418_v56 = vrot.slane %v1417_v60, 4  ;;  %v1406_v39 = vadd.f32 %v1405_v2, %v1404_v22  ;;  %v1381_v1 = vrot.slane %v1380_v51, 2 }
 0x1cc   :  { %v1356_v8 = vadd.f32 %v1355_v15, %v1354_v19  ;;  %vm1447_vm5 = vcmask 1040384   ;;  %vm1449_vm12 = vcmask 1042434   ;;  %v1331_v59 = vrot.slane %v1330_v44, 1 }
 0x1cd   :  { %v1419_v24 = vadd.f32 %v1418_v56, %v1417_v60  ;;  %v1369_v47 = vadd.f32 %v1368_v50, %v1367_v25  ;;  %v1394_v54 = vrot.slane %v1393_v48, 2  ;;  %v1344_v43 = vrot.slane %v1343_v46, 1 }
 0x1ce   :  { %v1357_v49 = vrot.slane %v1356_v8, 1  ;;  %v1382_v14 = vadd.f32 %v1381_v1, %v1380_v51  ;;  %v1407_v38 = vrot.slane %v1406_v39, 2  ;;  %v728_v52 = vadd.f32 %v727_v23, %v6799_v3 }
 0x1cf   :  { %v1370_v58 = vrot.slane %v1369_v47, 1  ;;  %v1395_v0 = vadd.f32 %v1394_v54, %v1393_v48  ;;  %v1420_v62 = vrot.slane %v1419_v24, 2  ;;  %v1345_v7 = vadd.f32 %v1344_v43, %v1343_v46 }
 0x1d0   :  { %v1358_v4 = vadd.f32 %v1357_v49, %v1356_v8  ;;  %v1383_v20 = vrot.slane %v1382_v14, 1  ;;  %v1408_v27 = vadd.f32 %v1407_v38, %v1406_v39  ;;  %v1332_v53 = vadd.f32 %v1331_v59, %v1330_v44 }
 0x1d1   :  { %v1371_v32 = vadd.f32 %v1370_v58, %v1369_v47  ;;  %v1396_v11 = vrot.slane %v1395_v0, 1  ;;  %v1421_v31 = vadd.f32 %v1420_v62, %v1419_v24  ;;  %v1425_v34 = vadd.f32 %v1345_v7, %v6818_v13 }
 0x1d2   :  { %v1384_v28 = vadd.f32 %v1383_v20, %v1382_v14  ;;  %v1409_v17 = vrot.slane %v1408_v27, 1  ;;  %v1426_v37 = vadd.f32 %v1358_v4, %v6826_v33  ;;  %v741_v41 = vadd.f32 %v740_v6, %v6812_v9 }
 0x1d3   :  { %v1397_v3 = vadd.f32 %v1396_v11, %v1395_v0  ;;  %v1422_v23 = vrot.slane %v1421_v31, 1  ;;  %v1427_v29 = vadd.f32 %v1371_v32, %v6828_v21  ;;  %v1440_v30 = vrot.slane %v1425_v34, 7 }
 0x1d4   :  { %v1410_v36 = vadd.f32 %v1409_v17, %v1408_v27  ;;  %v1428_v61 = vadd.f32 %v1384_v28, %v6836_v10  ;;  %v1441_v16 = vrot.slane %v1426_v37, 6  ;;  %v1424_v63 = vadd.f32 %v1332_v53, %v6816_v40 }
 0x1d5   :  { %v1423_v5 = vadd.f32 %v1422_v23, %v1421_v31  ;;  %v1429_v42 = vadd.f32 %v1397_v3, %v6852_v26  ;;  %v1442_v55 = vrot.slane %v1427_v29, 5  ;;  %vm1451_vm14 = vcmask 1041408  }
 0x1d6   :  { %v1430_v13 = vadd.f32 %v1410_v36, %v728_v52  ;;  %v1443_v18 = vrot.slane %v1428_v61, 4  ;;  %vm1453_vm13 = vcmask 1044484   ;;  %v1448_v6 = vsel %vm1447_vm5, %v1424_v63, %v1440_v30 }
 0x1d7   :  { %v1431_v9 = vadd.f32 %v1423_v5, %v741_v41  ;;  %v1444_v33 = vrot.slane %v1429_v42, 3  ;;  %v1450_v21 = vsel %vm1449_vm12, %v1441_v16, %v1442_v55  ;;  %vm1455_vm3 = vcmask 1046534  }
 0x1d8   :  { %v1445_v19 = vrot.slane %v1430_v13, 2  ;;  %vm1457_vm6 = vcmask 1045508   ;;  %v1452_v40 = vsel %vm1451_vm14, %v1448_v6, %v1450_v21  ;;  %vm1459_vm0 = vcmask 1043456  }
 0x1d9   :  { %v1446_v10 = vrot.slane %v1431_v9, 1  ;;  %v1454_v45 = vsel %vm1453_vm13, %v1443_v18, %v1444_v33 }
 0x1db   :  { %v1456_v26 = vsel %vm1455_vm3, %v1445_v19, %v1446_v10 }
 0x1dc   :  { %v1458_v22 = vsel %vm1457_vm6, %v1454_v45, %v1456_v26 }
 0x1dd   :  { %v1460_v25 = vsel %vm1459_vm0, %v1452_v40, %v1458_v22 }
 0x1de   :  { %1462 = vst [vmem:[#allocation2] sm:$0xff] %v1460_v25 }
 0x1df   :  { %1473 = dma.vmem_to_hbm [thread:$0]  %s1469_s3, 128, %s1471_s7, [#allocation3]  }
 0x1e0   :  { %1516 = dma.done.wait [#allocation3], 128  }
 0x1e1   :  { %1517 = vsyncadd [#allocation3], 4294967168 }
 0x1e2   :  { %1478 = vsyncpa [#allocation3], 1 }

</bundles_post_ra>
